<compile_context>
chip_gen: v7x
topology: tpu7x:2x2x1
jax: 0.10.0
libtpu: 0.0.40
codegen_flags: <defaults>
</compile_context>

<pallas_src>
import functools

import jax
import jax.numpy as jnp
from jax import lax
from jax.experimental import pallas as pl
from jax.experimental.pallas import tpu as pltpu


def _round_up(x: int, m: int) -> int:
    return (x + m - 1) // m * m


def rnn_kernel(ids_ref, wxh_ref, bias_ref, whhT_ref, wfcT_ref, bfc_ref,
               out_ref, xproj_ref, *, seq_len: int, batch_pad: int, precision):
    """Single-invocation RNN forward.

    ids_ref   : (S*Bp, 1) int32  token ids, row = s*Bp + b
    wxh_ref   : (Vp, Hp)  f32    pre-fused  emb_table @ W_ih^T  (zero padded)
    bias_ref  : (1, Hp)   f32    folded bias  b_ih + b_hh  (zero padded)
    whhT_ref  : (Hp, Hp)  f32    W_hh^T (zero padded)
    wfcT_ref  : (Hp, Op)  f32    W_fc^T (zero padded)
    bfc_ref   : (1, Op)   f32
    out_ref   : (Bp, Op)  f32    fc(final hidden state)
    xproj_ref : (S*Bp, Hp) f32   VMEM scratch holding all input projections
    """
    vp, hp = wxh_ref.shape
    sb = seq_len * batch_pad

    # --- Embedding lookup + input projection as ONE MXU matmul. -------------
    # TODO(synk): for production vocab sizes replace the one-hot matmul with a
    # scalar-prefetch / DMA row gather of the fused table (O(S*B*Hp) bytes
    # instead of O(V) FLOPs + vregs) and tile the (Vp, Hp) table over a vocab
    # grid axis so it fits v7x's 64 MiB VMEM; the one-hot trick is kept only
    # because V is tiny here.
    ids = ids_ref[...]                                        # (S*Bp, 1)
    col = lax.broadcasted_iota(jnp.int32, (sb, vp), 1)        # lane index
    onehot = (col == ids).astype(jnp.float32)                 # (S*Bp, Vp)
    # x_proj[s*Bp + b, :] = emb[ids[s, b]] @ W_ih^T + (b_ih + b_hh)
    # Bias fold: paying the add once here keeps the serial per-step chain to
    # just tanh(x_t + h @ W_hh^T).
    xproj_ref[...] = (
        jnp.dot(onehot, wxh_ref[...], preferred_element_type=jnp.float32,
                precision=precision)
        + bias_ref[...]
    )

    # --- Recurrence over the sequence (inherently sequential). --------------
    # TODO(synk): hold W_hh^T resident in MXU weight registers across steps via
    # pltpu.matmul_push_rhs / matmul_acc_lhs / matmul_pop once that path is
    # validated; jnp.dot restages the RHS every step.
    whh_t = whhT_ref[...]

    def step(t, h):
        off = pl.multiple_of(t * batch_pad, 8)                # Bp is 8-aligned
        x_t = xproj_ref[pl.ds(off, batch_pad), :]             # (Bp, Hp)
        return jnp.tanh(
            x_t + jnp.dot(h, whh_t, preferred_element_type=jnp.float32,
                          precision=precision))

    h0 = jnp.zeros((batch_pad, hp), jnp.float32)
    # Fully unroll short sequences (LLO visibility); partial unroll for long
    # sequences so vreg pressure and compile time stay bounded.
    unroll = True if seq_len <= 16 else 4
    h = lax.fori_loop(0, seq_len, step, h0, unroll=unroll)

    # --- Final linear layer on the last hidden state. -----------------------
    out_ref[...] = (
        jnp.dot(h, wfcT_ref[...], preferred_element_type=jnp.float32,
                precision=precision)
        + bfc_ref[...]
    ).astype(out_ref.dtype)


def rnn_forward(text_ids, emb_table, w_ih, b_ih, w_hh, b_hh, fc_w, fc_b,
                *, precision=lax.Precision.HIGHEST):
    """Forward of the PyTorch module: fc(rnn(embedding(text)) final hidden).

    text_ids : (S, B) int     emb_table : (V, E)
    w_ih : (H, E)  b_ih : (H,)   w_hh : (H, H)  b_hh : (H,)
    fc_w : (O, H)  fc_b : (O,)
    returns  : (B, O) float32
    """
    S, B = text_ids.shape
    V, E = emb_table.shape
    H = w_hh.shape[0]
    O = fc_w.shape[0]

    # Lane/sublane-aligned padded sizes. Zero padding is exact: padded hidden
    # columns feed only zero weights downstream and padded batch rows / vocab
    # columns are sliced off / never selected.
    Bp = _round_up(B, 8)
    Vp = _round_up(V, 128)
    Hp = _round_up(H, 128)
    Op = _round_up(O, 128)

    def pad2(a, rows, cols):
        return jnp.zeros((rows, cols), a.dtype).at[: a.shape[0], : a.shape[1]].set(a)

    # Pre-fuse embedding table with the input projection (one-time cost):
    #   onehot @ (emb_table @ W_ih^T)  ==  (onehot @ emb_table) @ W_ih^T
    wxh_p = pad2(jnp.dot(emb_table, w_ih.T, precision=precision), Vp, Hp)
    bias_p = pad2((b_ih + b_hh).reshape(1, H), 1, Hp)          # folded bias
    whhT_p = pad2(w_hh.T, Hp, Hp)
    wfcT_p = pad2(fc_w.T, Hp, Op)
    bfc_p = pad2(fc_b.reshape(1, O), 1, Op)

    # TODO(synk): ids stay (S*Bp, 1); for production switch to lane-dense /
    # scalar-prefetch ids together with the gather-based embedding lookup.
    ids_p = (
        jnp.zeros((S, Bp), jnp.int32)
        .at[:, :B]
        .set(text_ids.astype(jnp.int32))
        .reshape(S * Bp, 1)
    )

    # Advisory cost estimate so XLA schedules the wrapper-side pre-fusion and
    # padding sensibly around the kernel.
    flops = 2 * S * Bp * Vp * Hp + 2 * S * Bp * Hp * Hp + 2 * Bp * Hp * Op
    bytes_accessed = 4 * (S * Bp + Vp * Hp + Hp + Hp * Hp + Hp * Op + Op
                          + Bp * Op)
    cost = pl.CostEstimate(flops=flops, transcendentals=S * Bp * Hp,
                           bytes_accessed=bytes_accessed)

    # Everything is VMEM-resident in a single invocation; state the budget
    # explicitly (operands + output + x_proj scratch, with headroom).
    vmem_need = bytes_accessed + 4 * (S * Bp * Hp)
    vmem_limit = int(vmem_need * 2 + (4 << 20))

    # TODO(synk): for production batch sizes add a "parallel" batch-tile grid
    # axis (dimension_semantics=("parallel",)) so v7x's two TensorCores split
    # the batch; with a single 8-row tile here one core would be idle anyway.
    out_p = pl.pallas_call(
        functools.partial(rnn_kernel, seq_len=S, batch_pad=Bp,
                          precision=precision),
        out_shape=jax.ShapeDtypeStruct((Bp, Op), jnp.float32),
        in_specs=[pl.BlockSpec(memory_space=pltpu.MemorySpace.VMEM)] * 6,
        out_specs=pl.BlockSpec(memory_space=pltpu.MemorySpace.VMEM),
        scratch_shapes=[pltpu.VMEM((S * Bp, Hp), jnp.float32)],
        compiler_params=pltpu.CompilerParams(vmem_limit_bytes=vmem_limit),
        cost_estimate=cost,
    )(ids_p, wxh_p, bias_p, whhT_p, wfcT_p, bfc_p)

    return out_p[:B, :O]


if __name__ == "__main__":
    # input_dim, embedding_dim, hidden_dim, output_dim  (small demo shapes)
    VOCAB, EMB, HID, OUT = 32, 32, 32, 8
    SEQ, BATCH = 8, 4

    key = jax.random.PRNGKey(0)
    ks = jax.random.split(key, 8)

    emb_table = jax.random.normal(ks[0], (VOCAB, EMB), dtype=jnp.float32)
    bound = 1.0 / (HID ** 0.5)
    w_ih = jax.random.uniform(ks[1], (HID, EMB), jnp.float32, -bound, bound)
    b_ih = jax.random.uniform(ks[2], (HID,), jnp.float32, -bound, bound)
    w_hh = jax.random.uniform(ks[3], (HID, HID), jnp.float32, -bound, bound)
    b_hh = jax.random.uniform(ks[4], (HID,), jnp.float32, -bound, bound)
    fc_w = jax.random.uniform(ks[5], (OUT, HID), jnp.float32, -bound, bound)
    fc_b = jax.random.uniform(ks[6], (OUT,), jnp.float32, -bound, bound)
    text = jax.random.randint(ks[7], (SEQ, BATCH), 0, VOCAB, dtype=jnp.int32)

    out = jax.block_until_ready(
        rnn_forward(text, emb_table, w_ih, b_ih, w_hh, b_hh, fc_w, fc_b)
    )

    # Pure-JAX reference of the PyTorch forward (same per-dot precision):
    #   embedded = embedding(text); output, hidden = rnn(embedded); fc(hidden.squeeze(0))
    P = lax.Precision.HIGHEST
    embedded = emb_table[text]                      # (S, B, E)
    h_ref = jnp.zeros((BATCH, HID), jnp.float32)
    for t in range(SEQ):
        h_ref = jnp.tanh(
            jnp.dot(embedded[t], w_ih.T, precision=P) + b_ih
            + jnp.dot(h_ref, w_hh.T, precision=P) + b_hh)
    ref = jnp.dot(h_ref, fc_w.T, precision=P) + fc_b   # (B, O)

    assert out.shape == (BATCH, OUT)
    err = float(jnp.max(jnp.abs(out - ref)))
    assert jnp.allclose(out, ref, atol=1e-4, rtol=1e-4), f"max abs err {err}"
    print("KERNEL_OK")
</pallas_src>

<mosaic_0001>
module attributes {stable_mosaic.version = 11 : i64} {
  func.func @rnn_kernel(%arg0: memref<64x1xi32, #tpu.memory_space<vmem>>, %arg1: memref<128x128xf32, #tpu.memory_space<vmem>>, %arg2: memref<1x128xf32, #tpu.memory_space<vmem>>, %arg3: memref<128x128xf32, #tpu.memory_space<vmem>>, %arg4: memref<128x128xf32, #tpu.memory_space<vmem>>, %arg5: memref<1x128xf32, #tpu.memory_space<vmem>>, %arg6: memref<8x128xf32, #tpu.memory_space<vmem>>, %arg7: memref<64x128xf32, #tpu.memory_space<vmem>>) attributes {dimension_semantics = [], scalar_prefetch = 0 : i64, scratch_operands = 1 : i64, tpu.core_type = #tpu.core_type<tc>} {
    %c0 = arith.constant 0 : index
    %c0_0 = arith.constant 0 : index
    %0 = vector.load %arg0[%c0, %c0_0] : memref<64x1xi32, #tpu.memory_space<vmem>>, vector<64x1xi32>
    %1 = tpu.iota {dimensions = array<i32: 1>} : vector<64x128xi32>
    %2 = vector.broadcast %0 : vector<64x1xi32> to vector<64x128xi32>
    %3 = arith.cmpi eq, %1, %2 : vector<64x128xi32>
    %4 = arith.extui %3 : vector<64x128xi1> to vector<64x128xi32>
    %5 = arith.sitofp %4 : vector<64x128xi32> to vector<64x128xf32>
    %c0_1 = arith.constant 0 : index
    %c0_2 = arith.constant 0 : index
    %6 = vector.load %arg1[%c0_1, %c0_2] : memref<128x128xf32, #tpu.memory_space<vmem>>, vector<128x128xf32>
    %cst = arith.constant dense<0.000000e+00> : vector<64x128xf32>
    %7 = tpu.matmul %5, %6, %cst {dimension_numbers = #tpu.dot_dimension_numbers<[1], [0], [0], [1], [0, 0, 1, 1], [], []>, precision = #tpu.contract_precision<fp32>} : vector<64x128xf32>, vector<128x128xf32>, vector<64x128xf32> -> vector<64x128xf32>
    %c0_3 = arith.constant 0 : index
    %c0_4 = arith.constant 0 : index
    %8 = vector.load %arg2[%c0_3, %c0_4] : memref<1x128xf32, #tpu.memory_space<vmem>>, vector<1x128xf32>
    %9 = vector.broadcast %8 : vector<1x128xf32> to vector<64x128xf32>
    %10 = arith.addf %7, %9 : vector<64x128xf32>
    %c0_5 = arith.constant 0 : index
    %c0_6 = arith.constant 0 : index
    %11 = vector.load %arg7[%c0_5, %c0_6] : memref<64x128xf32, #tpu.memory_space<vmem>>, vector<64x128xf32>
    tpu.vector_store %arg7[%c0_5, %c0_6], %10 {strides = array<i32>} : memref<64x128xf32, #tpu.memory_space<vmem>>, vector<64x128xf32>,
    %c0_7 = arith.constant 0 : index
    %c0_8 = arith.constant 0 : index
    %12 = vector.load %arg3[%c0_7, %c0_8] : memref<128x128xf32, #tpu.memory_space<vmem>>, vector<128x128xf32>
    %cst_9 = arith.constant 0.000000e+00 : f32
    %13 = vector.broadcast %cst_9 : f32 to vector<8x128xf32>
    %c0_i32 = arith.constant 0 : i32
    %c8_i32 = arith.constant 8 : i32
    %14 = arith.muli %c0_i32, %c8_i32 : i32
    %15 = tpu.assume_multiple %14, 8 : i32
    %16 = arith.index_cast %15 : i32 to index
    %c0_10 = arith.constant 0 : index
    %17 = vector.load %arg7[%16, %c0_10] : memref<64x128xf32, #tpu.memory_space<vmem>>, vector<8x128xf32>
    %cst_11 = arith.constant dense<0.000000e+00> : vector<8x128xf32>
    %18 = tpu.matmul %13, %12, %cst_11 {dimension_numbers = #tpu.dot_dimension_numbers<[1], [0], [0], [1], [0, 0, 1, 1], [], []>, precision = #tpu.contract_precision<fp32>} : vector<8x128xf32>, vector<128x128xf32>, vector<8x128xf32> -> vector<8x128xf32>
    %19 = arith.addf %17, %18 : vector<8x128xf32>
    %20 = math.tanh %19 : vector<8x128xf32>
    %c1_i32 = arith.constant 1 : i32
    %c8_i32_12 = arith.constant 8 : i32
    %21 = arith.muli %c1_i32, %c8_i32_12 : i32
    %22 = tpu.assume_multiple %21, 8 : i32
    %23 = arith.index_cast %22 : i32 to index
    %c0_13 = arith.constant 0 : index
    %24 = vector.load %arg7[%23, %c0_13] : memref<64x128xf32, #tpu.memory_space<vmem>>, vector<8x128xf32>
    %cst_14 = arith.constant dense<0.000000e+00> : vector<8x128xf32>
    %25 = tpu.matmul %20, %12, %cst_14 {dimension_numbers = #tpu.dot_dimension_numbers<[1], [0], [0], [1], [0, 0, 1, 1], [], []>, precision = #tpu.contract_precision<fp32>} : vector<8x128xf32>, vector<128x128xf32>, vector<8x128xf32> -> vector<8x128xf32>
    %26 = arith.addf %24, %25 : vector<8x128xf32>
    %27 = math.tanh %26 : vector<8x128xf32>
    %c2_i32 = arith.constant 2 : i32
    %c8_i32_15 = arith.constant 8 : i32
    %28 = arith.muli %c2_i32, %c8_i32_15 : i32
    %29 = tpu.assume_multiple %28, 8 : i32
    %30 = arith.index_cast %29 : i32 to index
    %c0_16 = arith.constant 0 : index
    %31 = vector.load %arg7[%30, %c0_16] : memref<64x128xf32, #tpu.memory_space<vmem>>, vector<8x128xf32>
    %cst_17 = arith.constant dense<0.000000e+00> : vector<8x128xf32>
    %32 = tpu.matmul %27, %12, %cst_17 {dimension_numbers = #tpu.dot_dimension_numbers<[1], [0], [0], [1], [0, 0, 1, 1], [], []>, precision = #tpu.contract_precision<fp32>} : vector<8x128xf32>, vector<128x128xf32>, vector<8x128xf32> -> vector<8x128xf32>
    %33 = arith.addf %31, %32 : vector<8x128xf32>
    %34 = math.tanh %33 : vector<8x128xf32>
    %c3_i32 = arith.constant 3 : i32
    %c8_i32_18 = arith.constant 8 : i32
    %35 = arith.muli %c3_i32, %c8_i32_18 : i32
    %36 = tpu.assume_multiple %35, 8 : i32
    %37 = arith.index_cast %36 : i32 to index
    %c0_19 = arith.constant 0 : index
    %38 = vector.load %arg7[%37, %c0_19] : memref<64x128xf32, #tpu.memory_space<vmem>>, vector<8x128xf32>
    %cst_20 = arith.constant dense<0.000000e+00> : vector<8x128xf32>
    %39 = tpu.matmul %34, %12, %cst_20 {dimension_numbers = #tpu.dot_dimension_numbers<[1], [0], [0], [1], [0, 0, 1, 1], [], []>, precision = #tpu.contract_precision<fp32>} : vector<8x128xf32>, vector<128x128xf32>, vector<8x128xf32> -> vector<8x128xf32>
    %40 = arith.addf %38, %39 : vector<8x128xf32>
    %41 = math.tanh %40 : vector<8x128xf32>
    %c4_i32 = arith.constant 4 : i32
    %c8_i32_21 = arith.constant 8 : i32
    %42 = arith.muli %c4_i32, %c8_i32_21 : i32
    %43 = tpu.assume_multiple %42, 8 : i32
    %44 = arith.index_cast %43 : i32 to index
    %c0_22 = arith.constant 0 : index
    %45 = vector.load %arg7[%44, %c0_22] : memref<64x128xf32, #tpu.memory_space<vmem>>, vector<8x128xf32>
    %cst_23 = arith.constant dense<0.000000e+00> : vector<8x128xf32>
    %46 = tpu.matmul %41, %12, %cst_23 {dimension_numbers = #tpu.dot_dimension_numbers<[1], [0], [0], [1], [0, 0, 1, 1], [], []>, precision = #tpu.contract_precision<fp32>} : vector<8x128xf32>, vector<128x128xf32>, vector<8x128xf32> -> vector<8x128xf32>
    %47 = arith.addf %45, %46 : vector<8x128xf32>
    %48 = math.tanh %47 : vector<8x128xf32>
    %c5_i32 = arith.constant 5 : i32
    %c8_i32_24 = arith.constant 8 : i32
    %49 = arith.muli %c5_i32, %c8_i32_24 : i32
    %50 = tpu.assume_multiple %49, 8 : i32
    %51 = arith.index_cast %50 : i32 to index
    %c0_25 = arith.constant 0 : index
    %52 = vector.load %arg7[%51, %c0_25] : memref<64x128xf32, #tpu.memory_space<vmem>>, vector<8x128xf32>
    %cst_26 = arith.constant dense<0.000000e+00> : vector<8x128xf32>
    %53 = tpu.matmul %48, %12, %cst_26 {dimension_numbers = #tpu.dot_dimension_numbers<[1], [0], [0], [1], [0, 0, 1, 1], [], []>, precision = #tpu.contract_precision<fp32>} : vector<8x128xf32>, vector<128x128xf32>, vector<8x128xf32> -> vector<8x128xf32>
    %54 = arith.addf %52, %53 : vector<8x128xf32>
    %55 = math.tanh %54 : vector<8x128xf32>
    %c6_i32 = arith.constant 6 : i32
    %c8_i32_27 = arith.constant 8 : i32
    %56 = arith.muli %c6_i32, %c8_i32_27 : i32
    %57 = tpu.assume_multiple %56, 8 : i32
    %58 = arith.index_cast %57 : i32 to index
    %c0_28 = arith.constant 0 : index
    %59 = vector.load %arg7[%58, %c0_28] : memref<64x128xf32, #tpu.memory_space<vmem>>, vector<8x128xf32>
    %cst_29 = arith.constant dense<0.000000e+00> : vector<8x128xf32>
    %60 = tpu.matmul %55, %12, %cst_29 {dimension_numbers = #tpu.dot_dimension_numbers<[1], [0], [0], [1], [0, 0, 1, 1], [], []>, precision = #tpu.contract_precision<fp32>} : vector<8x128xf32>, vector<128x128xf32>, vector<8x128xf32> -> vector<8x128xf32>
    %61 = arith.addf %59, %60 : vector<8x128xf32>
    %62 = math.tanh %61 : vector<8x128xf32>
    %c7_i32 = arith.constant 7 : i32
    %c8_i32_30 = arith.constant 8 : i32
    %63 = arith.muli %c7_i32, %c8_i32_30 : i32
    %64 = tpu.assume_multiple %63, 8 : i32
    %65 = arith.index_cast %64 : i32 to index
    %c0_31 = arith.constant 0 : index
    %66 = vector.load %arg7[%65, %c0_31] : memref<64x128xf32, #tpu.memory_space<vmem>>, vector<8x128xf32>
    %cst_32 = arith.constant dense<0.000000e+00> : vector<8x128xf32>
    %67 = tpu.matmul %62, %12, %cst_32 {dimension_numbers = #tpu.dot_dimension_numbers<[1], [0], [0], [1], [0, 0, 1, 1], [], []>, precision = #tpu.contract_precision<fp32>} : vector<8x128xf32>, vector<128x128xf32>, vector<8x128xf32> -> vector<8x128xf32>
    %68 = arith.addf %66, %67 : vector<8x128xf32>
    %69 = math.tanh %68 : vector<8x128xf32>
    %c8_i32_33 = arith.constant 8 : i32
    %c0_34 = arith.constant 0 : index
    %c0_35 = arith.constant 0 : index
    %70 = vector.load %arg4[%c0_34, %c0_35] : memref<128x128xf32, #tpu.memory_space<vmem>>, vector<128x128xf32>
    %cst_36 = arith.constant dense<0.000000e+00> : vector<8x128xf32>
    %71 = tpu.matmul %69, %70, %cst_36 {dimension_numbers = #tpu.dot_dimension_numbers<[1], [0], [0], [1], [0, 0, 1, 1], [], []>, precision = #tpu.contract_precision<fp32>} : vector<8x128xf32>, vector<128x128xf32>, vector<8x128xf32> -> vector<8x128xf32>
    %c0_37 = arith.constant 0 : index
    %c0_38 = arith.constant 0 : index
    %72 = vector.load %arg5[%c0_37, %c0_38] : memref<1x128xf32, #tpu.memory_space<vmem>>, vector<1x128xf32>
    %73 = vector.broadcast %72 : vector<1x128xf32> to vector<8x128xf32>
    %74 = arith.addf %71, %73 : vector<8x128xf32>
    %c0_39 = arith.constant 0 : index
    %c0_40 = arith.constant 0 : index
    %75 = vector.load %arg6[%c0_39, %c0_40] : memref<8x128xf32, #tpu.memory_space<vmem>>, vector<8x128xf32>
    tpu.vector_store %arg6[%c0_39, %c0_40], %74 {strides = array<i32>} : memref<8x128xf32, #tpu.memory_space<vmem>>, vector<8x128xf32>,
    return
  }
}

</mosaic_0001>

<bundles_post_ra>
// kernel: tpu_custom_call.1
= control target key start
LH: loop header
LB: loop body
LE: loop exit
PB: predicated region body
PF: predicated region fallthrough
CT: control target
= control target key end

     0   :  { %11 = vsyncpa [#allocation4], 0  ;;  %s14104_s0 = inlined_call_operand.vmem [shape: s32[64,1], index: 0, kind: input, shape index: {}]   ;;  %s14105_s1 = inlined_call_operand.hbm [shape: f32[128,128], index: 1, kind: input, shape index: {}]   ;;  %s14106_s2 = inlined_call_operand.vmem [shape: f32[1,128], index: 2, kind: input, shape index: {}]   ;;  %s14107_s3 = inlined_call_operand.hbm [shape: f32[128,128], index: 3, kind: input, shape index: {}]   ;;  %s14108_s4 = inlined_call_operand.hbm [shape: f32[128,128], index: 4, kind: input, shape index: {}]   ;;  %s14109_s5 = inlined_call_operand.vmem [shape: f32[1,128], index: 5, kind: input, shape index: {}]   ;;  %s14110_s6 = inlined_call_operand.hbm [shape: f32[8,128], index: 6, kind: output, shape index: {}]  }
   0x1   :  { %12 = vsyncpa [#allocation7], 0 }
   0x2   :  { %13 = vsyncpa [#allocation5], 0  ;;  %s11939_s21 = smov [#allocation6]   ;;  %s11940_s23 = smov [#allocation3]  }
   0x3   :  { %s35_s22 = sshll.u32 %s11939_s21, 4  ;;  %s21_s24 = sshll.u32 %s11940_s23, 4  ;;  %s36_s22 = int_to_ptr.vmem [resolvable:$true] %s35_s22  ;;  %s11985_s24 = int_to_ptr.vmem [resolvable:$true] %s21_s24 }
   0x4   :  { %s11845_s27 = scalar_lea.hbm %s14107_s3, 2048 }
   0x5   :  { %p11846_p0 = scmp.ne.s32.totalorder %s14107_s3, %s11845_s27  ;;  %p11849_p1 = scmp.lt.u32.totalorder %s11845_s27, %s14107_s3 }
   0x7   :  { %p11851_p2 = pnand %p11849_p1, %p11846_p0 }
   0x9   :  { %11854 = shalt.err (!%p11851_p2)
}
   0xa   :  { %s11855_s8 = scalar_lea.vmem %s36_s22, 2048  ;;  %p11860_p4 = scmp.lt.s32.totalorder %s36_s22, %s36_s22 }
   0xb   :  { %p11856_p3 = scmp.ne.s32.totalorder %s36_s22, %s11855_s8  ;;  %p11861_p5 = scmp.lt.s32.totalorder %s11855_s8, %s11855_s8 }
   0xd   :  { %p11862_p6 = por %p11861_p5, %p11860_p4 }
   0xf   :  { %p11863_p7 = pnand %p11862_p6, %p11856_p3 }
  0x11   :  { %11866 = shalt.err (!%p11863_p7)
}
  0x12   :  { %s11941_s9 = smov 128   ;;  %s11942_s10 = smov 8  }
  0x13   :  { %41 = dma.hbm_to_vmem [thread:$0]  %s14107_s3, 2048, %s36_s22, [#allocation7], %s11941_s9, %s11941_s9, %s11942_s10  }
  0x14   :  { %s11867_s15 = scalar_lea.hbm %s14105_s1, 2048 }
  0x15   :  { %p11868_p8 = scmp.ne.s32.totalorder %s14105_s1, %s11867_s15  ;;  %p11871_p9 = scmp.lt.u32.totalorder %s11867_s15, %s14105_s1 }
  0x17   :  { %p11873_p10 = pnand %p11871_p9, %p11868_p8 }
  0x19   :  { %11876 = shalt.err (!%p11873_p10)
}
  0x1a   :  { %s11877_s20 = scalar_lea.vmem %s11985_s24, 2048  ;;  %p11882_p12 = scmp.lt.s32.totalorder %s11985_s24, %s11985_s24 }
  0x1b   :  { %p11878_p11 = scmp.ne.s32.totalorder %s11985_s24, %s11877_s20  ;;  %p11883_p13 = scmp.lt.s32.totalorder %s11877_s20, %s11877_s20 }
  0x1d   :  { %p11884_p0 = por %p11883_p13, %p11882_p12 }
  0x1f   :  { %p11885_p1 = pnand %p11884_p0, %p11878_p11 }
  0x21   :  { %11888 = shalt.err (!%p11885_p1)
}
  0x22   :  { %27 = dma.hbm_to_vmem [thread:$0]  %s14105_s1, 2048, %s11985_s24, [#allocation4], %s11941_s9, %s11941_s9, %s11942_s10  }
  0x23   :  { %s11943_s22 = smov [#allocation8]   ;;  %s11889_s27 = scalar_lea.hbm %s14108_s4, 2048 }
  0x24   :  { %s47_s23 = sshll.u32 %s11943_s22, 4  ;;  %p11890_p2 = scmp.ne.s32.totalorder %s14108_s4, %s11889_s27  ;;  %s48_s23 = int_to_ptr.vmem [resolvable:$true] %s47_s23 }
  0x25   :  { %p11893_p3 = scmp.lt.u32.totalorder %s11889_s27, %s14108_s4 }
  0x27   :  { %p11895_p4 = pnand %p11893_p3, %p11890_p2 }
  0x29   :  { %11898 = shalt.err (!%p11895_p4)
}
  0x2a   :  { %s11899_s8 = scalar_lea.vmem %s48_s23, 2048  ;;  %p11904_p6 = scmp.lt.s32.totalorder %s48_s23, %s48_s23 }
  0x2b   :  { %p11900_p5 = scmp.ne.s32.totalorder %s48_s23, %s11899_s8  ;;  %p11905_p7 = scmp.lt.s32.totalorder %s11899_s8, %s11899_s8 }
  0x2d   :  { %p11906_p8 = por %p11905_p7, %p11904_p6 }
  0x2f   :  { %p11907_p9 = pnand %p11906_p8, %p11900_p5 }
  0x31   :  { %11910 = shalt.err (!%p11907_p9)
}
  0x32   :  { %53 = dma.hbm_to_vmem [thread:$0]  %s14108_s4, 2048, %s48_s23, [#allocation7], %s11941_s9, %s11941_s9, %s11942_s10  }
  0x33   :  { %11933 = dma.done.wait [#allocation4], 2048  }
  0x34   :  { %11934 = vsyncadd [#allocation4], 4294965248 }
  0x35   :  { %11935 = dma.done.wait [#allocation7], 4096  }
  0x36   :  { %11936 = vsyncadd [#allocation7], 4294963200  ;;  %v11944_v0 = vmov 0   ;;  %v14123_v1 = vmov 0.0|0.0   ;;  %vm11946_vm0 = vmmov 0   ;;  %v14117_v2 = vmov 0.0  }
  0x37   :  { %11827 = vset.pattern.permute.xlu0 %v11944_v0  ;;  %10381 = vmatprep.subr.bf16.mxu1 %v14123_v1  ;;  %v65_v3 = vld [vmem:[%s14104_s0] sm:$0xff]  ;;  %v1097_v5 = vld [vmem:[#allocation6 + $0x8] sm:$0xff]  ;;  %v67_v8 = vld [vmem:[%s14104_s0 + $0x10] sm:$0xff]  ;;  %s11949_s26 = smov [#allocation9]  }
  0x38   :  { %11828 = vset.pattern.permute.xlu1 %v11944_v0  ;;  %8331 = vmatprep.mubr.msk.f32.mxu1 %vm11946_vm0, %v14117_v2  ;;  %v1096_v4 = vld [vmem:[#allocation6] sm:$0xff]  ;;  %v1117_v7 = vand.u32 4294901760, %v1097_v5  ;;  %v1098_v9 = vld [vmem:[#allocation6 + $0x10] sm:$0xff]  ;;  %v66_v10 = vld [vmem:[%s14104_s0 + $0x8] sm:$0xff]  ;;  %s6929_s27 = sshll.u32 %s11949_s26, 4  ;;  %s6930_s27 = int_to_ptr.vmem [resolvable:$true] %s6929_s27 }
  0x39   :  { %76 = vperm.xlu0 %11827, %v65_v3   ;;  %v1114_v6 = vand.u32 4294901760, %v1096_v4  ;;  %82 = vperm.xlu1 %11828, %v67_v8   ;;  %v1099_v11 = vld [vmem:[#allocation6 + $0x18] sm:$0xff]  ;;  %v1120_v12 = vand.u32 4294901760, %v1098_v9  ;;  %v1100_v16 = vld [vmem:[#allocation6 + $0x20] sm:$0xff]  ;;  %v1101_v17 = vld [vmem:[#allocation6 + $0x28] sm:$0xff]  ;;  %s11911_s28 = scalar_lea.vmem %s6930_s27, 128  ;;  %p11916_p11 = scmp.lt.s32.totalorder %s6930_s27, %s6930_s27 }
  0x3a   :  { %v1123_v14 = vand.u32 4294901760, %v1099_v11  ;;  %v68_v15 = vld [vmem:[%s14104_s0 + $0x18] sm:$0xff]  ;;  %v1102_v18 = vld [vmem:[#allocation6 + $0x30] sm:$0xff]  ;;  %v1126_v21 = vand.u32 4294901760, %v1100_v16  ;;  %v1129_v22 = vand.u32 4294901760, %v1101_v17  ;;  %v69_v23 = vld [vmem:[%s14104_s0 + $0x20] sm:$0xff]  ;;  %v12066_v29 = vsub.f32 %v1097_v5, %v1117_v7  ;;  %p11912_p10 = scmp.ne.s32.totalorder %s6930_s27, %s11911_s28  ;;  %p11917_p12 = scmp.lt.s32.totalorder %s11911_s28, %s11911_s28 }
  0x3b   :  { %v12049_v13 = vpack.c.bf16 %v1117_v7, %v1114_v6  ;;  %v1103_v19 = vld [vmem:[#allocation6 + $0x38] sm:$0xff]  ;;  %v12061_v24 = vsub.f32 %v1096_v4, %v1114_v6  ;;  %v70_v25 = vld [vmem:[%s14104_s0 + $0x28] sm:$0xff]  ;;  %v1132_v26 = vand.u32 4294901760, %v1102_v18  ;;  %v1104_v28 = vld [vmem:[#allocation6 + $0x40] sm:$0xff]  ;;  %v12071_v33 = vsub.f32 %v1098_v9, %v1120_v12 }
  0x3c   :  { %v12055_v20 = vpack.c.bf16 %v1123_v14, %v1120_v12  ;;  %v1135_v27 = vand.u32 4294901760, %v1103_v19  ;;  %v1105_v30 = vld [vmem:[#allocation6 + $0x48] sm:$0xff]  ;;  %v12069_v31 = vpack.c.bf16 %v1129_v22, %v1126_v21  ;;  %v1106_v32 = vld [vmem:[#allocation6 + $0x50] sm:$0xff]  ;;  %v1138_v35 = vand.u32 4294901760, %v1104_v28  ;;  %v1107_v36 = vld [vmem:[#allocation6 + $0x58] sm:$0xff]  ;;  %p11918_p13 = por %p11917_p12, %p11916_p11 }
  0x3d   :  { %14225 = vst [vmem:[#allocation13_spill] sm:$0xff] %v12049_v13  ;;  %10383 = vmatpush3.bf16.msra.mxu1 %v12049_v13  ;;  %79 = vperm.xlu0 %11827, %v66_v10   ;;  %v71_v34 = vld [vmem:[%s14104_s0 + $0x30] sm:$0xff]  ;;  %v14128_v37 = vand.u32 4294901760, %v12061_v24  ;;  %v12078_v38 = vsub.f32 %v1099_v11, %v1123_v14  ;;  %v72_v40 = vld [vmem:[%s14104_s0 + $0x38] sm:$0xff]  ;;  %v1141_v41 = vand.u32 4294901760, %v1105_v30  ;;  %v12085_v42 = vld [vmem:[#allocation6 + $0x60] sm:$0xff]  ;;  %v12088_v44 = vsub.f32 %v1100_v16, %v1126_v21 }
  0x3e   :  { %14226 = vst [vmem:[#allocation14_spill] sm:$0xff] %v12055_v20  ;;  %10384 = vmatprep.subr.bf16.mxu1 %v14123_v1  ;;  %85 = vperm.xlu1 %11828, %v68_v15   ;;  %14227 = vst [vmem:[#allocation15_spill] sm:$0xff] %v12069_v31  ;;  %v12080_v39 = vpack.c.bf16 %v1135_v27, %v1132_v26  ;;  %v14127_v43 = vand.u32 4294901760, %v12066_v29  ;;  %v1144_v45 = vand.u32 4294901760, %v1106_v32  ;;  %v1147_v49 = vand.u32 4294901760, %v1107_v36  ;;  %v1109_v50 = vld [vmem:[#allocation6 + $0x68] sm:$0xff]  ;;  %p11919_p0 = pnand %p11918_p13, %p11912_p10 }
  0x3f   :  { %14229 = vst [vmem:[#allocation17_spill] sm:$0xff] %v12088_v44  ;;  %v12090_v46 = vsub.f32 %v1101_v17, %v1129_v22  ;;  %v12092_v47 = vsub.f32 %v1102_v18, %v1132_v26  ;;  %v12094_v48 = vsub.f32 %v1103_v19, %v1135_v27  ;;  %v1110_v51 = vld [vmem:[#allocation6 + $0x70] sm:$0xff]  ;;  %v14126_v52 = vand.u32 4294901760, %v12071_v33  ;;  %v1111_v60 = vld [vmem:[#allocation6 + $0x78] sm:$0xff] }
  0x40   :  { %14228 = vst [vmem:[#allocation16_spill] sm:$0xff] %v12080_v39  ;;  %v14125_v53 = vand.u32 4294901760, %v12078_v38  ;;  %v12099_v54 = vsub.f32 %v1104_v28, %v1138_v35  ;;  %v1150_v55 = vand.u32 4294901760, %v12085_v42  ;;  %v14122_v56 = vand.u32 4294901760, %v12088_v44 }
  0x41   :  { %10386 = vmatpush3.bf16.msra.mxu1 %v12055_v20  ;;  %88 = vperm.xlu0 %11827, %v69_v23   ;;  %14230 = vst [vmem:[#allocation18_spill] sm:$0xff] %v12090_v46  ;;  %v14121_v57 = vand.u32 4294901760, %v12090_v46  ;;  %v14120_v58 = vand.u32 4294901760, %v12092_v47  ;;  %v12106_v59 = vpack.c.bf16 %v1141_v41, %v1138_v35  ;;  %v14119_v61 = vand.u32 4294901760, %v12094_v48 }
  0x42   :  { %10387 = vmatprep.subr.bf16.mxu1 %v14123_v1  ;;  %91 = vperm.xlu1 %11828, %v70_v25   ;;  %v12109_v62 = vsub.f32 %v1105_v30, %v1141_v41  ;;  %v12111_v63 = vsub.f32 %v1106_v32, %v1144_v45  ;;  %v1153_v0 = vand.u32 4294901760, %v1109_v50  ;;  %v1156_v3 = vand.u32 4294901760, %v1110_v51 }
  0x43   :  { %14231 = vst [vmem:[#allocation19_spill] sm:$0xff] %v12106_v59  ;;  %v1203_v4 = vsub.f32 %v12061_v24, %v14128_v37  ;;  %v1210_v5 = vsub.f32 %v12066_v29, %v14127_v43  ;;  %v1217_v6 = vsub.f32 %v12071_v33, %v14126_v52  ;;  %v1224_v7 = vsub.f32 %v12078_v38, %v14125_v53  ;;  %v12242_v53 = vld [vmem:[#allocation3 + $0x60] sm:$0xff] }
  0x44   :  { %v14115_v8 = vand.u32 4294901760, %v12099_v54  ;;  %v14114_v9 = vand.u32 4294901760, %v12109_v62  ;;  %v1159_v10 = vand.u32 4294901760, %v1111_v60  ;;  %v1231_v11 = vsub.f32 %v12088_v44, %v14122_v56  ;;  %v12231_v56 = vld [vmem:[#allocation3 + $0x58] sm:$0xff] }
  0x45   :  { %10389 = vmatpush3.bf16.msra.mxu1 %v12069_v31  ;;  %94 = vperm.xlu0 %11827, %v71_v34   ;;  %v1238_v12 = vsub.f32 %v12090_v46, %v14121_v57  ;;  %v1245_v14 = vsub.f32 %v12092_v47, %v14120_v58  ;;  %v12138_v15 = vpack.c.bf16 %v1147_v49, %v1144_v45  ;;  %v14113_v17 = vand.u32 4294901760, %v12111_v63  ;;  %v12229_v57 = vld [vmem:[#allocation3 + $0x50] sm:$0xff] }
  0x46   :  { %10390 = vmatprep.subr.bf16.mxu1 %v14123_v1  ;;  %97 = vperm.xlu1 %11828, %v72_v40   ;;  %v1252_v16 = vsub.f32 %v12094_v48, %v14119_v61  ;;  %v12144_v18 = vsub.f32 %v1107_v36, %v1147_v49  ;;  %v1204_v19 = vand.u32 4294901760, %v1203_v4  ;;  %v1211_v21 = vand.u32 4294901760, %v1210_v5  ;;  %v12160_v36 = vld [vmem:[#allocation3] sm:$0xff] }
  0x47   :  { %14232 = vst [vmem:[#allocation20_spill] sm:$0xff] %v12138_v15  ;;  %v12147_v22 = vsub.f32 %v12085_v42, %v1150_v55  ;;  %v12149_v23 = vsub.f32 %v1109_v50, %v1153_v0  ;;  %v1218_v25 = vand.u32 4294901760, %v1217_v6  ;;  %v1225_v26 = vand.u32 4294901760, %v1224_v7 }
  0x48   :  { %v1259_v27 = vsub.f32 %v12099_v54, %v14115_v8  ;;  %v1266_v28 = vsub.f32 %v12109_v62, %v14114_v9  ;;  %v1232_v30 = vand.u32 4294901760, %v1231_v11  ;;  %v1239_v32 = vand.u32 4294901760, %v1238_v12  ;;  %v124_v11 = vld [vmem:[#allocation3 + $0x8] sm:$0xff] }
  0x49   :  { %10392 = vmatpush3.bf16.msra.mxu1 %v12080_v39  ;;  %v1246_v34 = vand.u32 4294901760, %v1245_v14  ;;  %v14111_v35 = vand.u32 4294901760, %v12144_v18  ;;  %v1253_v40 = vand.u32 4294901760, %v1252_v16  ;;  %v12165_v41 = vsub.f32 %v12111_v63, %v14113_v17  ;;  %v125_v14 = vld [vmem:[#allocation3 + $0x10] sm:$0xff]  ;;  %v12193_v16 = vld [vmem:[#allocation3 + $0x28] sm:$0xff] }
  0x4a   :  { %10393 = vmatprep.subr.bf16.mxu1 %v14123_v1  ;;  %v14112_v42 = vand.u32 4294901760, %v12147_v22  ;;  %v12168_v45 = vsub.f32 %v1110_v51, %v1156_v3  ;;  %v12170_v49 = vpack.c.bf16 %v1153_v0, %v1150_v55  ;;  %v14116_v50 = vand.u32 4294901760, %v12149_v23 }
  0x4b   :  { %v12173_v4 = vsub.f32 %v1111_v60, %v1159_v10  ;;  %v12176_v5 = vpack.c.bf16 %v1159_v10, %v1156_v3  ;;  %v1260_v6 = vand.u32 4294901760, %v1259_v27  ;;  %v1267_v7 = vand.u32 4294901760, %v1266_v28  ;;  %v126_v3 = vld [vmem:[#allocation3 + $0x18] sm:$0xff]  ;;  %v12191_v10 = vld [vmem:[#allocation3 + $0x20] sm:$0xff] }
  0x4c   :  { %14233 = vst [vmem:[#allocation21_spill] sm:$0xff] %v12170_v49  ;;  %v147_v12 = vand.u32 4294901760, %v12160_v36  ;;  %v12180_v51 = vpack.c.bf16 %v1211_v21, %v1204_v19  ;;  %v12182_v55 = vpack.c.bf16 %v1225_v26, %v1218_v25  ;;  %v12184_v0 = vpack.c.bf16 %v1239_v32, %v1232_v30  ;;  %v12204_v25 = vld [vmem:[#allocation3 + $0x30] sm:$0xff]  ;;  %v12206_v26 = vld [vmem:[#allocation3 + $0x38] sm:$0xff]  ;;  %v12214_v28 = vld [vmem:[#allocation3 + $0x40] sm:$0xff] }
  0x4d   :  { %10395 = vmatpush3.bf16.msra.mxu1 %v12106_v59  ;;  %14234 = vst [vmem:[#allocation22_spill] sm:$0xff] %v12176_v5  ;;  %v12189_v60 = vsub.f32 %v12144_v18, %v14111_v35  ;;  %v12195_v27 = vpack.c.bf16 %v1253_v40, %v1246_v34  ;;  %v12201_v19 = vsub.f32 %v12147_v22, %v14112_v42  ;;  %v14129_v21 = vand.u32 4294901760, %v12168_v45  ;;  %v12216_v35 = vld [vmem:[#allocation3 + $0x48] sm:$0xff] }
  0x4e   :  { %10396 = vmatprep.subr.bf16.mxu1 %v14123_v1  ;;  %14235 = vst [vmem:[#allocation23_spill] sm:$0xff] %v12180_v51  ;;  %14236 = vst [vmem:[#allocation24_spill] sm:$0xff] %v12182_v55  ;;  %v12211_v30 = vsub.f32 %v12149_v23, %v14116_v50  ;;  %v14132_v32 = vand.u32 4294901760, %v12173_v4  ;;  %v150_v34 = vand.u32 4294901760, %v124_v11  ;;  %v153_v40 = vand.u32 4294901760, %v125_v14 }
  0x4f   :  { %14237 = vst [vmem:[#allocation25_spill] sm:$0xff] %v12184_v0  ;;  %14238 = vst [vmem:[#allocation26_spill] sm:$0xff] %v12195_v27  ;;  %v12219_v42 = vpack.c.bf16 %v1267_v7, %v1260_v6  ;;  %v156_v17 = vand.u32 4294901760, %v126_v3  ;;  %v159_v9 = vand.u32 4294901760, %v12191_v10  ;;  %v162_v8 = vand.u32 4294901760, %v12193_v16 }
  0x50   :  { %v12225_v2 = vpack.c.bf16 %v150_v34, %v147_v12  ;;  %v165_v61 = vand.u32 4294901760, %v12204_v25  ;;  %v168_v58 = vand.u32 4294901760, %v12206_v26  ;;  %v12236_v6 = vsub.f32 %v12168_v45, %v14129_v21 }
  0x51   :  { %10398 = vmatpush3.bf16.msra.mxu1 %v12138_v15  ;;  %14239 = vst [vmem:[#allocation27_spill] sm:$0xff] %v12219_v42  ;;  %v12238_v7 = vpack.c.bf16 %v156_v17, %v153_v40  ;;  %v12249_v37 = vsub.f32 %v12173_v4, %v14132_v32  ;;  %v14242_v21 = vand.u32 4294901760, %v12061_v24  ;;  %v12260_v52 = vpack.c.bf16 %v162_v8, %v159_v9  ;;  %v12264_v32 = vld [vmem:[#allocation3 + $0x68] sm:$0xff] }
  0x52   :  { %10399 = vmatprep.subr.bf16.mxu1 %v14123_v1  ;;  %14240 = vst [vmem:[#allocation28_spill] sm:$0xff] %v12225_v2  ;;  %10190 = vmatprep.subr.bf16.mxu0 %v12225_v2  ;;  %v14246_v15 = vand.u32 4294901760, %v12071_v33  ;;  %v14247_v59 = vand.u32 4294901760, %v12078_v38  ;;  %v14251_v50 = vand.u32 4294901760, %v12088_v44  ;;  %v12286_v31 = vsub.f32 %v12160_v36, %v147_v12 }
  0x53   :  { %14241 = vst [vmem:[#allocation29_spill] sm:$0xff] %v12238_v7  ;;  %10192 = vmatpush3.bf16.msra.mxu0 %v12225_v2  ;;  %14245 = vst [vmem:[#allocation31_spill] sm:$0xff] %v12260_v52  ;;  %v12276_v2 = vpack.c.bf16 %v168_v58, %v165_v61  ;;  %v12294_v20 = vsub.f32 %v124_v11, %v150_v34  ;;  %v14257_v13 = vand.u32 4294901760, %v12092_v47  ;;  %v14258_v43 = vand.u32 4294901760, %v12094_v48 }
  0x54   :  { %v12270_v39 = vpack.c.bf16 %v14247_v59, %v14246_v15  ;;  %10194 = vmatprep.subr.bf16.mxu0 %v12238_v7  ;;  %v14254_v59 = vand.u32 4294901760, %v12214_v28  ;;  %v14255_v15 = vand.u32 4294901760, %v12216_v35  ;;  %v186_v36 = vand.u32 4294901760, %v12264_v32 }
  0x55   :  { %10401 = vmatpush3.bf16.msra.mxu1 %v12170_v49  ;;  %v14243_v49 = vand.u32 4294901760, %v12066_v29  ;;  %14250 = vst [vmem:[#allocation33_spill] sm:$0xff] %v12276_v2  ;;  %v12300_v44 = vpack.c.bf16 %v14258_v43, %v14257_v13  ;;  %v12307_v12 = vsub.f32 %v126_v3, %v156_v17  ;;  %v14262_v11 = vand.u32 4294901760, %v12109_v62 }
  0x56   :  { %10402 = vmatprep.subr.bf16.mxu1 %v14123_v1  ;;  %14248 = vst [vmem:[#allocation32_spill] sm:$0xff] %v12270_v39  ;;  %v12292_v39 = vpack.c.bf16 %v14255_v15, %v14254_v59  ;;  %v14261_v59 = vand.u32 4294901760, %v12099_v54  ;;  %v14264_v13 = vand.u32 4294901760, %v12229_v57  ;;  %v14265_v43 = vand.u32 4294901760, %v12231_v56 }
  0x57   :  { %v12256_v1 = vpack.c.bf16 %v14243_v49, %v14242_v21  ;;  %v12272_v49 = vld [vmem:[#allocation3 + $0x70] sm:$0xff]  ;;  %v14249_v21 = vmov 0.0|0.0   ;;  %14259 = vst [vmem:[#allocation36_spill] sm:$0xff] %v12300_v44  ;;  %v12328_v3 = vsub.f32 %v12191_v10, %v159_v9  ;;  %v12331_v15 = vsub.f32 %v12193_v16, %v162_v8  ;;  %10196 = vmatpush3.bf16.msra.mxu0 %v12238_v7 }
  0x58   :  { %14256 = vst [vmem:[#allocation35_spill] sm:$0xff] %v12292_v39  ;;  %v12313_v34 = vpack.c.bf16 %v14262_v11, %v14261_v59  ;;  %v12344_v9 = vsub.f32 %v12204_v25, %v165_v61  ;;  %10198 = vmatprep.subr.bf16.mxu0 %v12260_v52  ;;  %v12359_v25 = vsub.f32 %v12206_v26, %v168_v58  ;;  %v14270_v8 = vand.u32 4294901760, %v12242_v53 }
  0x59   :  { %14244 = vst [vmem:[#allocation30_spill] sm:$0xff] %v12256_v1  ;;  %10404 = vmatpush3.bf16.msra.mxu1 %v12176_v5  ;;  %v14252_v1 = vand.u32 4294901760, %v12090_v46  ;;  %v12302_v46 = vsub.f32 %v125_v14, %v153_v40  ;;  %v12322_v14 = vpack.c.bf16 %v14265_v43, %v14264_v13  ;;  %v12324_v40 = vld [vmem:[#allocation3 + $0x78] sm:$0xff]  ;;  %v14266_v13 = vand.u32 4294901760, %v12111_v63 }
  0x5a   :  { %10405 = vmatprep.subr.bf16.mxu1 %v14249_v21  ;;  %14263 = vst [vmem:[#allocation37_spill] sm:$0xff] %v12313_v34  ;;  %v14267_v43 = vand.u32 4294901760, %v12144_v18  ;;  %v14164_v61 = vand.u32 4294901760, %v12344_v9  ;;  %v14271_v59 = vand.u32 4294901760, %v12328_v3  ;;  %v14273_v58 = vand.u32 4294901760, %v12286_v31 }
  0x5b   :  { %v12283_v5 = vpack.c.bf16 %v14252_v1, %v14251_v50  ;;  %v14260_v1 = vmov 0.0   ;;  %v14153_v17 = vand.u32 4294901760, %v12302_v46  ;;  %10200 = vmatpush3.bf16.msra.mxu0 %v12260_v52 }
  0x5c   :  { %8332 = vmatmul.mubr.f32.vlgmr.msra.gmra.mrb[0].mxu1 %v14260_v1  ;;  %v12341_v50 = vpack.c.bf16 %v14267_v43, %v14266_v13  ;;  %v14269_v13 = vand.u32 4294901760, %v12307_v12  ;;  %v339_v11 = vsub.f32 %v12328_v3, %v14271_v59  ;;  %v12377_v26 = vsub.f32 %v12286_v31, %v14273_v58  ;;  %10202 = vmatprep.subr.bf16.mxu0 %v12276_v2 }
  0x5d   :  { %14253 = vst [vmem:[#allocation34_spill] sm:$0xff] %v12283_v5  ;;  %10407 = vmatpush3.bf16.msra.mxu1 %v12180_v51  ;;  %8366 = vmatprep.mubr.msk.f32.mxu1 %vm11946_vm0, %v14260_v1  ;;  %v325_v10 = vsub.f32 %v12302_v46, %v14153_v17  ;;  %v12364_v17 = vpack.c.bf16 %v186_v36, %v14270_v8  ;;  %v14272_v51 = vand.u32 4294901760, %v12331_v15  ;;  %v14167_v59 = vand.u32 4294901760, %v12359_v25 }
  0x5e   :  { %10408 = vmatprep.subr.bf16.mxu1 %v14249_v21  ;;  %14268 = vst [vmem:[#allocation38_spill] sm:$0xff] %v12341_v50  ;;  %v332_v43 = vsub.f32 %v12307_v12, %v14269_v13  ;;  %v340_v52 = vand.u32 4294901760, %v339_v11  ;;  %v14275_v50 = vand.u32 4294901760, %v12147_v22  ;;  %v14276_v58 = vand.u32 4294901760, %v12149_v23 }
  0x5f   :  { %v326_v16 = vand.u32 4294901760, %v325_v10  ;;  %v346_v13 = vsub.f32 %v12331_v15, %v14272_v51  ;;  %v353_v10 = vsub.f32 %v12344_v9, %v14164_v61  ;;  %v14274_v51 = vand.u32 4294901760, %v12294_v20  ;;  %10204 = vmatpush3.bf16.msra.mxu0 %v12276_v2 }
  0x60   :  { %v333_v8 = vand.u32 4294901760, %v332_v43  ;;  %v12393_v43 = vpack.c.bf16 %v14276_v58, %v14275_v50  ;;  %v360_v44 = vsub.f32 %v12359_v25, %v14167_v59  ;;  %v14278_v5 = vand.u32 4294901760, %v12214_v28  ;;  %10206 = vmatprep.subr.bf16.mxu0 %v12292_v39 }
  0x61   :  { %10410 = vmatpush3.bf16.msra.mxu1 %v12182_v55  ;;  %v12387_v55 = vsub.f32 %v12294_v20, %v14274_v51  ;;  %v347_v7 = vand.u32 4294901760, %v346_v13  ;;  %v354_v61 = vand.u32 4294901760, %v353_v10  ;;  %v14279_v13 = vand.u32 4294901760, %v12216_v35 }
  0x62   :  { %10411 = vmatprep.subr.bf16.mxu1 %v14249_v21  ;;  %14277 = vst [vmem:[#allocation39_spill] sm:$0xff] %v12393_v43  ;;  %v12395_v34 = vpack.c.bf16 %v333_v8, %v326_v16  ;;  %v12403_v51 = vsub.f32 %v12214_v28, %v14278_v5  ;;  %v14281_v16 = vand.u32 4294901760, %v12168_v45  ;;  %v14282_v8 = vand.u32 4294901760, %v12173_v4 }
  0x63   :  { %v12406_v11 = vpack.c.bf16 %v347_v7, %v340_v52  ;;  %v12411_v50 = vsub.f32 %v12216_v35, %v14279_v13  ;;  %v14284_v58 = vand.u32 4294901760, %v12229_v57  ;;  %v361_v52 = vand.u32 4294901760, %v360_v44  ;;  %10208 = vmatpush3.bf16.msra.mxu0 %v12292_v39 }
  0x64   :  { %v12417_v10 = vpack.c.bf16 %v14282_v8, %v14281_v16  ;;  %v14168_v28 = vand.u32 4294901760, %v12403_v51  ;;  %v14286_v35 = vand.u32 4294901760, %v12231_v56  ;;  %v14288_v13 = vand.u32 4294901760, %v12242_v53  ;;  %10210 = vmatprep.subr.bf16.mxu0 %v12322_v14 }
  0x65   :  { %10413 = vmatpush3.bf16.msra.mxu1 %v12184_v0  ;;  %14280 = vst [vmem:[#allocation40_spill] sm:$0xff] %v12411_v50  ;;  %v12422_v5 = vsub.f32 %v12229_v57, %v14284_v58  ;;  %v14169_v57 = vand.u32 4294901760, %v12411_v50  ;;  %v12441_v44 = vsub.f32 %v12264_v32, %v186_v36  ;;  %v14291_v58 = vand.u32 4294901760, %v12272_v49 }
  0x66   :  { %14283 = vst [vmem:[#allocation41_spill] sm:$0xff] %v12417_v10  ;;  %10414 = vmatprep.subr.bf16.mxu1 %v14249_v21  ;;  %v12430_v7 = vsub.f32 %v12231_v56, %v14286_v35  ;;  %v12435_v16 = vsub.f32 %v12242_v53, %v14288_v13  ;;  %v12448_v56 = vpack.c.bf16 %v361_v52, %v354_v61 }
  0x67   :  { %14285 = vst [vmem:[#allocation42_spill] sm:$0xff] %v12422_v5  ;;  %v14172_v8 = vand.u32 4294901760, %v12422_v5  ;;  %14290 = vst [vmem:[#allocation45_spill] sm:$0xff] %v12441_v44  ;;  %v12446_v59 = vsub.f32 %v12272_v49, %v14291_v58  ;;  %v367_v53 = vsub.f32 %v12403_v51, %v14168_v28  ;;  %v374_v32 = vsub.f32 %v12411_v50, %v14169_v57 }
  0x68   :  { %14287 = vst [vmem:[#allocation43_spill] sm:$0xff] %v12430_v7  ;;  %14289 = vst [vmem:[#allocation44_spill] sm:$0xff] %v12435_v16  ;;  %v14177_v35 = vand.u32 4294901760, %v12430_v7  ;;  %v14181_v13 = vand.u32 4294901760, %v12435_v16  ;;  %v14296_v0 = vand.u32 4294901760, %v12441_v44  ;;  %10212 = vmatpush3.bf16.msra.mxu0 %v12322_v14 }
  0x69   :  { %14292 = vst [vmem:[#allocation46_spill] sm:$0xff] %v12446_v59  ;;  %14293 = vst [vmem:[#allocation47_spill] sm:$0xff] %v12448_v56  ;;  %10416 = vmatpush3.bf16.msra.mxu1 %v12195_v27  ;;  %v381_v36 = vsub.f32 %v12422_v5, %v14172_v8  ;;  %v368_v58 = vand.u32 4294901760, %v367_v53  ;;  %v14294_v27 = vand.u32 4294901760, %v12324_v40  ;;  %v375_v52 = vand.u32 4294901760, %v374_v32  ;;  %10214 = vmatprep.subr.bf16.mxu0 %v12364_v17 }
  0x6a   :  { %10417 = vmatprep.subr.bf16.mxu1 %v14249_v21  ;;  %v388_v28 = vsub.f32 %v12430_v7, %v14177_v35  ;;  %v395_v57 = vsub.f32 %v12435_v16, %v14181_v13  ;;  %v402_v53 = vsub.f32 %v12441_v44, %v14296_v0  ;;  %v14297_v39 = vand.u32 4294901760, %v12446_v59 }
  0x6b   :  { %v12475_v8 = vsub.f32 %v12324_v40, %v14294_v27  ;;  %v382_v61 = vand.u32 4294901760, %v381_v36  ;;  %v12487_v27 = vpack.c.bf16 %v12294_v20, %v12286_v31  ;;  %v14298_v32 = vand.u32 4294901760, %v12165_v41 }
  0x6c   :  { %v409_v35 = vsub.f32 %v12446_v59, %v14297_v39  ;;  %v389_v2 = vand.u32 4294901760, %v388_v28  ;;  %v396_v10 = vand.u32 4294901760, %v395_v57  ;;  %v14299_v36 = vand.u32 4294901760, %v12189_v60  ;;  %10216 = vmatpush3.bf16.msra.mxu0 %v12364_v17 }
  0x6d   :  { %14295 = vst [vmem:[#allocation48_spill] sm:$0xff] %v12475_v8  ;;  %v14184_v13 = vand.u32 4294901760, %v12475_v8  ;;  %10419 = vmatpush3.bf16.msra.mxu1 %v12219_v42  ;;  %v12496_v0 = vpack.c.bf16 %v375_v52, %v368_v58  ;;  %v403_v56 = vand.u32 4294901760, %v402_v53  ;;  %v12500_v39 = vpack.c.bf16 %v12307_v12, %v12302_v46 }
  0x6e   :  { %v12494_v43 = vpack.c.bf16 %v14299_v36, %v14298_v32  ;;  %10420 = vmatprep.subr.bf16.mxu1 %v14249_v21  ;;  %v12504_v28 = vpack.c.bf16 %v389_v2, %v382_v61  ;;  %v410_v57 = vand.u32 4294901760, %v409_v35  ;;  %v12511_v60 = vpack.c.bf16 %v12331_v15, %v12328_v3 }
  0x6f   :  { %v416_v41 = vsub.f32 %v12475_v8, %v14184_v13  ;;  %v14301_v52 = vand.u32 4294901760, %v12272_v49  ;;  %v14302_v58 = vand.u32 4294901760, %v12324_v40  ;;  %v312_v2 = vand.u32 4294901760, %v12377_v26 }
  0x70   :  { %14300 = vst [vmem:[#allocation49_spill] sm:$0xff] %v12494_v43  ;;  %v319_v35 = vand.u32 4294901760, %v12387_v55  ;;  %v12522_v61 = vpack.c.bf16 %v403_v56, %v396_v10  ;;  %v14303_v36 = vand.u32 4294901760, %v12201_v19  ;;  %v14304_v13 = vand.u32 4294901760, %v12211_v30 }
  0x71   :  { %v12518_v53 = vpack.c.bf16 %v14302_v58, %v14301_v52  ;;  %v417_v32 = vand.u32 4294901760, %v416_v41  ;;  %10422 = vmatpush3.bf16.msra.mxu1 %v12494_v43  ;;  %v1302_v49 = vand.u32 4294901760, %v12236_v6  ;;  %v1309_v40 = vand.u32 4294901760, %v12249_v37 }
  0x72   :  { %v12529_v42 = vpack.c.bf16 %v14304_v13, %v14303_v36  ;;  %v12535_v26 = vpack.c.bf16 %v12359_v25, %v12344_v9  ;;  %10423 = vmatprep.subr.bf16.mxu1 %v14249_v21  ;;  %v12542_v19 = vpack.c.bf16 %v319_v35, %v312_v2  ;;  %v12549_v37 = vpack.c.bf16 %v12411_v50, %v12403_v51  ;;  %v14324_v35 = vld [vmem:[#allocation22_spill] sm:$0xff] }
  0x73   :  { %v12539_v55 = vpack.c.bf16 %v417_v32, %v410_v57  ;;  %10218 = vmatprep.subr.bf16.mxu0 %v12518_v53  ;;  %v12545_v30 = vpack.c.bf16 %v1309_v40, %v1302_v49  ;;  %v12557_v6 = vpack.c.bf16 %v12066_v29, %v12061_v24  ;;  %v12561_v10 = vpack.c.bf16 %v12430_v7, %v12422_v5  ;;  %v14309_v29 = vld [vmem:[#allocation17_spill] sm:$0xff]  ;;  %v14310_v57 = vld [vmem:[#allocation18_spill] sm:$0xff] }
  0x74   :  { %14305 = vst [vmem:[#allocation50_spill] sm:$0xff] %v12529_v42  ;;  %10220 = vmatpush3.bf16.msra.mxu0 %v12518_v53  ;;  %v12567_v56 = vpack.c.bf16 %v12441_v44, %v12435_v16  ;;  %v12572_v13 = vpack.c.bf16 %v12078_v38, %v12071_v33  ;;  %v12579_v24 = vpack.c.bf16 %v12475_v8, %v12446_v59 }
  0x75   :  { %10425 = vmatpush3.bf16.msra.mxu1 %v12529_v42  ;;  %14306 = vst [vmem:[#allocation51_spill] sm:$0xff] %v12545_v30  ;;  %10222 = vmatprep.subr.bf16.mxu0 %v12542_v19  ;;  %14307 = vst [vmem:[#allocation52_spill] sm:$0xff] %v12557_v6  ;;  %v12584_v41 = vpack.c.bf16 %v14310_v57, %v14309_v29  ;;  %v12590_v33 = vpack.c.bf16 %v12094_v48, %v12092_v47 }
  0x76   :  { %10426 = vmatprep.subr.bf16.mxu1 %v14249_v21  ;;  %14308 = vst [vmem:[#allocation53_spill] sm:$0xff] %v12572_v13  ;;  %v12596_v38 = vpack.c.bf16 %v12109_v62, %v12099_v54  ;;  %v12602_v52 = vpack.c.bf16 %v12144_v18, %v12111_v63  ;;  %v12608_v47 = vpack.c.bf16 %v12149_v23, %v12147_v22  ;;  %v14317_v54 = vld [vmem:[#allocation13_spill] sm:$0xff]  ;;  %v14318_v62 = vld [vmem:[#allocation14_spill] sm:$0xff]  ;;  %v14319_v63 = vld [vmem:[#allocation15_spill] sm:$0xff] }
  0x77   :  { %14311 = vst [vmem:[#allocation17_spill] sm:$0xff] %v12584_v41  ;;  %14312 = vst [vmem:[#allocation18_spill] sm:$0xff] %v12590_v33  ;;  %v12614_v48 = vpack.c.bf16 %v12173_v4, %v12168_v45  ;;  %v14320_v18 = vld [vmem:[#allocation16_spill] sm:$0xff]  ;;  %v14321_v22 = vld [vmem:[#allocation19_spill] sm:$0xff]  ;;  %v73_v45 = vlaneseq }
  0x78   :  { %14313 = vst [vmem:[#allocation54_spill] sm:$0xff] %v12596_v38  ;;  %14314 = vst [vmem:[#allocation55_spill] sm:$0xff] %v12602_v52  ;;  %v14322_v23 = vld [vmem:[#allocation20_spill] sm:$0xff]  ;;  %v14323_v4 = vld [vmem:[#allocation21_spill] sm:$0xff] }
  0x79   :  { %10428 = vmatpush3.bf16.msra.mxu1 %v12545_v30  ;;  %14315 = vst [vmem:[#allocation56_spill] sm:$0xff] %v12608_v47  ;;  %14316 = vst [vmem:[#allocation57_spill] sm:$0xff] %v12614_v48  ;;  %v12635_v58 = vand.u32 127, %v73_v45  ;;  %v14325_v45 = vld [vmem:[#allocation30_spill] sm:$0xff] }
  0x7a   :  { %10429 = vmatprep.subr.bf16.mxu1 %v14249_v21 }
  0x7c   :  { %8367 = vmatmul.mubr.f32.vlgmr.msra.gmra.mrb[0].mxu1 %v14260_v1 }
  0x7d   :  { %10431 = vmatpush3.bf16.msra.mxu1 %v12557_v6  ;;  %8401 = vmatprep.mubr.msk.f32.mxu1 %vm11946_vm0, %v14260_v1 }
  0x7e   :  { %10432 = vmatprep.subr.bf16.mxu1 %v14249_v21 }
  0x81   :  { %10434 = vmatpush3.bf16.msra.mxu1 %v12572_v13 }
  0x82   :  { %10435 = vmatprep.subr.bf16.mxu1 %v14249_v21 }
  0x85   :  { %10437 = vmatpush3.bf16.msra.mxu1 %v12584_v41 }
  0x86   :  { %10438 = vmatprep.subr.bf16.mxu1 %v14249_v21 }
  0x89   :  { %10440 = vmatpush3.bf16.msra.mxu1 %v12590_v33 }
  0x8a   :  { %10441 = vmatprep.subr.bf16.mxu1 %v14249_v21 }
  0x8d   :  { %10443 = vmatpush3.bf16.msra.mxu1 %v12596_v38 }
  0x8e   :  { %10444 = vmatprep.subr.bf16.mxu1 %v14249_v21 }
  0x91   :  { %10446 = vmatpush3.bf16.msra.mxu1 %v12602_v52 }
  0x92   :  { %10447 = vmatprep.subr.bf16.mxu1 %v14249_v21 }
  0x95   :  { %10449 = vmatpush3.bf16.msra.mxu1 %v12608_v47 }
  0x96   :  { %10450 = vmatprep.subr.bf16.mxu1 %v14249_v21 }
  0x99   :  { %10452 = vmatpush3.bf16.msra.mxu1 %v12614_v48 }
  0x9a   :  { %10453 = vmatprep.subr.bf16.mxu1 %v14249_v21 }
  0x9c   :  { %8402 = vmatmul.mubr.f32.vlgmr.msra.gmra.mrb[0].mxu1 %v14260_v1 }
  0x9d   :  { %10455 = vmatpush3.bf16.msra.mxu1 %v14317_v54  ;;  %8436 = vmatprep.mubr.msk.f32.mxu1 %vm11946_vm0, %v14260_v1 }
  0x9e   :  { %10456 = vmatprep.subr.bf16.mxu1 %v14249_v21 }
  0xa1   :  { %10458 = vmatpush3.bf16.msra.mxu1 %v14318_v62 }
  0xa2   :  { %10459 = vmatprep.subr.bf16.mxu1 %v14249_v21 }
  0xa5   :  { %10461 = vmatpush3.bf16.msra.mxu1 %v14319_v63 }
  0xa6   :  { %10462 = vmatprep.subr.bf16.mxu1 %v14249_v21 }
  0xa9   :  { %10464 = vmatpush3.bf16.msra.mxu1 %v14320_v18 }
  0xaa   :  { %10465 = vmatprep.subr.bf16.mxu1 %v14249_v21 }
  0xad   :  { %10467 = vmatpush3.bf16.msra.mxu1 %v14321_v22 }
  0xae   :  { %10468 = vmatprep.subr.bf16.mxu1 %v14249_v21 }
  0xb1   :  { %10470 = vmatpush3.bf16.msra.mxu1 %v14322_v23 }
  0xb2   :  { %10471 = vmatprep.subr.bf16.mxu1 %v14249_v21 }
  0xb5   :  { %10473 = vmatpush3.bf16.msra.mxu1 %v14323_v4 }
  0xb6   :  { %10474 = vmatprep.subr.bf16.mxu1 %v14249_v21 }
  0xb8   :  { %v12638_v2 = vpop.permute.xlu0 %76  ;;  %v12643_v32 = vpop.permute.xlu1 %82 }
  0xb9   :  { %vm99_vm1 = vcmp.eq.s32.totalorder %v12635_v58, %v12638_v2  ;;  %10476 = vmatpush3.bf16.msra.mxu1 %v14324_v35  ;;  %vm101_vm2 = vcmp.eq.s32.totalorder %v12635_v58, %v12643_v32 }
  0xba   :  { %v6939_v36 = vsel %vm99_vm1, 1.0, %v14260_v1  ;;  %10477 = vmatprep.subr.bf16.mxu1 %v14249_v21  ;;  %v6941_v40 = vsel %vm101_vm2, 1.0, %v14260_v1 }
  0xbb   :  { %v12652_v49 = vsub.f32 %v6939_v36, %v6939_v36  ;;  %v12658_v29 = vsub.f32 %v6941_v40, %v6941_v40 }
  0xbc   :  { %v12660_v57 = vpop.permute.xlu0 %79  ;;  %8437 = vmatmul.mubr.f32.vlgmr.msra.gmra.mrb[0].mxu1 %v14260_v1 }
  0xbd   :  { %vm100_vm3 = vcmp.eq.s32.totalorder %v12635_v58, %v12660_v57  ;;  %10479 = vmatpush3.bf16.msra.mxu1 %v14325_v45  ;;  %v12666_v48 = vpop.permute.xlu1 %85  ;;  %8471 = vmatprep.mubr.msk.f32.mxu1 %vm11946_vm0, %v14260_v1  ;;  %v14207_v47 = vand.u32 4294901760, %v12658_v29  ;;  %v14326_v52 = vand.u32 4294901760, %v12652_v49 }
  0xbe   :  { %v6940_v40 = vsel %vm100_vm3, 1.0, %v14260_v1  ;;  %10480 = vmatprep.subr.bf16.mxu1 %v14249_v21  ;;  %vm102_vm4 = vcmp.eq.s32.totalorder %v12635_v58, %v12666_v48 }
  0xbf   :  { %v12679_v45 = vsub.f32 %v6940_v40, %v6940_v40  ;;  %v6942_v36 = vsel %vm102_vm4, 1.0, %v14260_v1  ;;  %v230_v38 = vsub.f32 %v12652_v49, %v14326_v52  ;;  %v250_v13 = vsub.f32 %v12658_v29, %v14207_v47  ;;  %v14327_v40 = vld [vmem:[#allocation32_spill] sm:$0xff] }
  0xc0   :  { %v12688_v33 = vsub.f32 %v6942_v36, %v6942_v36  ;;  %v12690_v41 = vpop.permute.xlu0 %88 }
  0xc1   :  { %vm103_vm5 = vcmp.eq.s32.totalorder %v12635_v58, %v12690_v41  ;;  %10482 = vmatpush3.bf16.msra.mxu1 %v14327_v40  ;;  %v231_v6 = vand.u32 4294901760, %v230_v38  ;;  %v12698_v30 = vpop.permute.xlu1 %91  ;;  %v14216_v42 = vand.u32 4294901760, %v12679_v45  ;;  %v251_v59 = vand.u32 4294901760, %v250_v13 }
  0xc2   :  { %v6943_v52 = vsel %vm103_vm5, 1.0, %v14260_v1  ;;  %10483 = vmatprep.subr.bf16.mxu1 %v14249_v21  ;;  %vm104_vm6 = vcmp.eq.s32.totalorder %v12635_v58, %v12698_v30  ;;  %v14215_v36 = vand.u32 4294901760, %v12688_v33 }
  0xc3   :  { %v12709_v47 = vsub.f32 %v6943_v52, %v6943_v52  ;;  %8067 = vmatprep.mubr.f32.mxu0 %v231_v6  ;;  %v6944_v38 = vsel %vm104_vm6, 1.0, %v14260_v1  ;;  %v240_v40 = vsub.f32 %v12679_v45, %v14216_v42  ;;  %v14328_v6 = vld [vmem:[#allocation34_spill] sm:$0xff] }
  0xc4   :  { %v12718_v43 = vsub.f32 %v6944_v38, %v6944_v38  ;;  %v12720_v8 = vpop.permute.xlu0 %94  ;;  %v260_v52 = vsub.f32 %v12688_v33, %v14215_v36 }
  0xc5   :  { %vm105_vm7 = vcmp.eq.s32.totalorder %v12635_v58, %v12720_v8  ;;  %10485 = vmatpush3.bf16.msra.mxu1 %v14328_v6  ;;  %v241_v44 = vand.u32 4294901760, %v240_v40  ;;  %v12728_v16 = vpop.permute.xlu1 %97  ;;  %v14219_v7 = vand.u32 4294901760, %v12709_v47 }
  0xc6   :  { %v6945_v38 = vsel %vm105_vm7, 1.0, %v14260_v1  ;;  %10486 = vmatprep.subr.bf16.mxu1 %v14249_v21  ;;  %vm106_vm8 = vcmp.eq.s32.totalorder %v12635_v58, %v12728_v16  ;;  %v14220_v13 = vand.u32 4294901760, %v12718_v43  ;;  %v261_v42 = vand.u32 4294901760, %v260_v52  ;;  %v6947_v16 = vld [vmem:[%s14106_s2] ss:$0 sm:$0xff] }
  0xc7   :  { %v12739_v36 = vsub.f32 %v6945_v38, %v6945_v38  ;;  %8068 = vmatmul.mubr.f32.vlgmr.msra.gmra.mrb[0].mxu0 %v241_v44  ;;  %v6946_v40 = vsel %vm106_vm8, 1.0, %v14260_v1  ;;  %v270_v6 = vsub.f32 %v12709_v47, %v14219_v7  ;;  %v14329_v44 = vld [vmem:[#allocation36_spill] sm:$0xff] }
  0xc8   :  { %10224 = vmatpush3.bf16.msra.mxu0 %v12542_v19  ;;  %v12749_v5 = vsub.f32 %v6946_v40, %v6946_v40  ;;  %8070 = vmatprep.mubr.f32.mxu0 %v251_v59  ;;  %v280_v38 = vsub.f32 %v12718_v43, %v14220_v13 }
  0xc9   :  { %10488 = vmatpush3.bf16.msra.mxu1 %v14329_v44  ;;  %10226 = vmatprep.subr.bf16.mxu0 %v12395_v34  ;;  %v271_v50 = vand.u32 4294901760, %v270_v6  ;;  %v289_v52 = vand.u32 4294901760, %v12739_v36  ;;  %v14330_v6 = vld [vmem:[#allocation37_spill] sm:$0xff] }
  0xca   :  { %10489 = vmatprep.subr.bf16.mxu1 %v14249_v21  ;;  %v299_v7 = vand.u32 4294901760, %v12749_v5  ;;  %v281_v19 = vand.u32 4294901760, %v280_v38  ;;  %v14331_v38 = vld [vmem:[#allocation38_spill] sm:$0xff] }
  0xcb   :  { %8071 = vmatmul.mubr.f32.gmra.mrb[2].mxu0 %v261_v42  ;;  %v290_v59 = vsub.f32 %v12739_v36, %v289_v52 }
  0xcc   :  { %10228 = vmatpush3.bf16.msra.mxu0 %v12395_v34  ;;  %8073 = vmatprep.mubr.f32.mxu0 %v271_v50  ;;  %v300_v40 = vsub.f32 %v12749_v5, %v299_v7  ;;  %v14332_v34 = vld [vmem:[#allocation47_spill] sm:$0xff]  ;;  %v11948_v50 = vmov 1.0  }
  0xcd   :  { %10491 = vmatpush3.bf16.msra.mxu1 %v14330_v6  ;;  %10230 = vmatprep.subr.bf16.mxu0 %v12406_v11  ;;  %v291_v13 = vand.u32 4294901760, %v290_v59 }
  0xce   :  { %10492 = vmatprep.subr.bf16.mxu1 %v14249_v21  ;;  %v301_v42 = vand.u32 4294901760, %v300_v40  ;;  %v14349_v40 = vand.u32 4294901760, %v12688_v33 }
  0xcf   :  { %8074 = vmatmul.mubr.f32.gmra.mrb[4].mxu0 %v281_v19  ;;  %v14333_v19 = vld [vmem:[#allocation39_spill] sm:$0xff] }
  0xd0   :  { %10232 = vmatpush3.bf16.msra.mxu0 %v12406_v11  ;;  %8076 = vmatprep.mubr.f32.mxu0 %v291_v13  ;;  %v14334_v11 = vld [vmem:[#allocation41_spill] sm:$0xff]  ;;  %v14346_v13 = vand.u32 4294901760, %v12658_v29 }
  0xd1   :  { %10494 = vmatpush3.bf16.msra.mxu1 %v14331_v38  ;;  %10234 = vmatprep.subr.bf16.mxu0 %v14332_v34 }
  0xd2   :  { %10495 = vmatprep.subr.bf16.mxu1 %v14249_v21 }
  0xd3   :  { %8077 = vmatmul.mubr.f32.gmra.mrb[6].mxu0 %v301_v42  ;;  %v14353_v42 = vand.u32 4294901760, %v12718_v43 }
  0xd4   :  { %10236 = vmatpush3.bf16.msra.mxu0 %v14332_v34  ;;  %8111 = vmatprep.mubr.msk.f32.mxu0 %vm99_vm1, %v11948_v50 }
  0xd5   :  { %10497 = vmatpush3.bf16.msra.mxu1 %v14333_v19  ;;  %10238 = vmatprep.subr.bf16.mxu0 %v12496_v0 }
  0xd6   :  { %10498 = vmatprep.subr.bf16.mxu1 %v14249_v21 }
  0xd8   :  { %10240 = vmatpush3.bf16.msra.mxu0 %v12496_v0  ;;  %v14336_v0 = vld [vmem:[#allocation29_spill] sm:$0xff] }
  0xd9   :  { %10500 = vmatpush3.bf16.msra.mxu1 %v14334_v11  ;;  %10242 = vmatprep.subr.bf16.mxu0 %v12504_v28 }
  0xda   :  { %10501 = vmatprep.subr.bf16.mxu1 %v14249_v21 }
  0xdc   :  { %10244 = vmatpush3.bf16.msra.mxu0 %v12504_v28  ;;  %8472 = vmatmul.mubr.f32.vlgmr.msra.gmra.mrb[0].mxu1 %v14260_v1  ;;  %v14338_v28 = vld [vmem:[#allocation33_spill] sm:$0xff] }
  0xdd   :  { %10503 = vmatpush3.bf16.msra.mxu1 %v14317_v54  ;;  %10246 = vmatprep.subr.bf16.mxu0 %v12522_v61 }
  0xde   :  { %10504 = vmatprep.subr.bf16.mxu1 %v14249_v21  ;;  %8506 = vmatprep.mubr.msk.f32.mxu1 %vm11946_vm0, %v14260_v1 }
  0xe0   :  { %10248 = vmatpush3.bf16.msra.mxu0 %v12522_v61  ;;  %v14340_v61 = vld [vmem:[#allocation35_spill] sm:$0xff] }
  0xe1   :  { %10506 = vmatpush3.bf16.msra.mxu1 %v14318_v62  ;;  %10250 = vmatprep.subr.bf16.mxu0 %v12539_v55 }
  0xe2   :  { %10507 = vmatprep.subr.bf16.mxu1 %v14249_v21 }
  0xe4   :  { %10252 = vmatpush3.bf16.msra.mxu0 %v12539_v55  ;;  %v14342_v55 = vand.u32 4294901760, %v12294_v20  ;;  %v14348_v20 = vand.u32 4294901760, %v12331_v15  ;;  %v14355_v15 = vld [vmem:[#allocation40_spill] sm:$0xff] }
  0xe5   :  { %10509 = vmatpush3.bf16.msra.mxu1 %v14319_v63  ;;  %10254 = vmatprep.subr.bf16.mxu0 %v12487_v27 }
  0xe6   :  { %10510 = vmatprep.subr.bf16.mxu1 %v14249_v21 }
  0xe7   :  { %8112 = vmatmul.mubr.msk.f32.vlgmr.msra.gmra.mrb[0].mxu0 %vm100_vm3, %v11948_v50 }
  0xe8   :  { %8114 = vmatprep.mubr.msk.f32.mxu0 %vm101_vm2, %v11948_v50  ;;  %10256 = vmatpush3.bf16.msra.mxu0 %v12487_v27  ;;  %v14335_v27 = vld [vmem:[#allocation28_spill] sm:$0xff] }
  0xe9   :  { %10512 = vmatpush3.bf16.msra.mxu1 %v14320_v18  ;;  %10258 = vmatprep.subr.bf16.mxu0 %v12500_v39 }
  0xea   :  { %10513 = vmatprep.subr.bf16.mxu1 %v14249_v21 }
  0xeb   :  { %8115 = vmatmul.mubr.msk.f32.gmra.mrb[2].mxu0 %vm102_vm4, %v11948_v50 }
  0xec   :  { %8117 = vmatprep.mubr.msk.f32.mxu0 %vm103_vm5, %v11948_v50  ;;  %10260 = vmatpush3.bf16.msra.mxu0 %v12500_v39  ;;  %v14337_v39 = vld [vmem:[#allocation31_spill] sm:$0xff] }
  0xed   :  { %10515 = vmatpush3.bf16.msra.mxu1 %v14321_v22  ;;  %10262 = vmatprep.subr.bf16.mxu0 %v12511_v60 }
  0xee   :  { %10516 = vmatprep.subr.bf16.mxu1 %v14249_v21 }
  0xef   :  { %8118 = vmatmul.mubr.msk.f32.gmra.mrb[4].mxu0 %vm104_vm6, %v11948_v50 }
  0xf0   :  { %8120 = vmatprep.mubr.msk.f32.mxu0 %vm105_vm7, %v11948_v50  ;;  %10264 = vmatpush3.bf16.msra.mxu0 %v12511_v60  ;;  %v14339_v60 = vand.u32 4294901760, %v12652_v49 }
  0xf1   :  { %10518 = vmatpush3.bf16.msra.mxu1 %v14322_v23  ;;  %10266 = vmatprep.subr.bf16.mxu0 %v12535_v26 }
  0xf2   :  { %10519 = vmatprep.subr.bf16.mxu1 %v14249_v21 }
  0xf3   :  { %8121 = vmatmul.mubr.msk.f32.gmra.mrb[6].mxu0 %vm106_vm8, %v11948_v50 }
  0xf4   :  { %10268 = vmatpush3.bf16.msra.mxu0 %v12535_v26  ;;  %8155 = vmatprep.mubr.f32.mxu0 %v12652_v49  ;;  %v14341_v26 = vand.u32 4294901760, %v12286_v31  ;;  %v14345_v49 = vand.u32 4294901760, %v12679_v45  ;;  %v14347_v31 = vand.u32 4294901760, %v12328_v3  ;;  %v14354_v3 = vand.u32 4294901760, %v12403_v51  ;;  %v14361_v51 = vld [vmem:[#allocation44_spill] sm:$0xff] }
  0xf5   :  { %10521 = vmatpush3.bf16.msra.mxu1 %v14323_v4  ;;  %10270 = vmatprep.subr.bf16.mxu0 %v12549_v37  ;;  %v14362_v34 = vand.u32 4294901760, %v14361_v51  ;;  %v14382_v51 = vld [vmem:[#allocation55_spill] sm:$0xff] }
  0xf6   :  { %10522 = vmatprep.subr.bf16.mxu1 %v14249_v21  ;;  %v10325_v59 = vpack.c.bf16 %v14348_v20, %v14347_v31 }
  0xf8   :  { %10272 = vmatpush3.bf16.msra.mxu0 %v12549_v37  ;;  %v10317_v37 = vpack.c.bf16 %v14342_v55, %v14341_v26 }
  0xf9   :  { %10524 = vmatpush3.bf16.msra.mxu1 %v14324_v35  ;;  %10274 = vmatprep.subr.bf16.mxu0 %v12561_v10 }
  0xfa   :  { %10669 = vmatprep.subr.bf16.mxu1 %v14249_v21 }
  0xfc   :  { %10276 = vmatpush3.bf16.msra.mxu0 %v12561_v10  ;;  %8507 = vmatmul.mubr.f32.vlgmr.msra.gmra.mrb[0].mxu1 %v14260_v1  ;;  %v14343_v10 = vand.u32 4294901760, %v12302_v46  ;;  %v14350_v46 = vand.u32 4294901760, %v12709_v47 }
  0xfd   :  { %10278 = vmatprep.subr.bf16.mxu0 %v12567_v56  ;;  %10671 = vmatpush3.bf16.msra.mxu1 %v14317_v54 }
  0xfe   :  { %10672 = vmatprep.subr.bf16.mxu1 %v14249_v21  ;;  %8751 = vmatprep.mubr.msk.f32.mxu1 %vm11946_vm0, %v14260_v1 }
 0x100   :  { %10280 = vmatpush3.bf16.msra.mxu0 %v12567_v56  ;;  %v14344_v56 = vand.u32 4294901760, %v12307_v12  ;;  %v14351_v12 = vand.u32 4294901760, %v12344_v9  ;;  %v14357_v9 = vld [vmem:[#allocation42_spill] sm:$0xff] }
 0x101   :  { %10282 = vmatprep.subr.bf16.mxu0 %v12579_v24  ;;  %10674 = vmatpush3.bf16.msra.mxu1 %v14318_v62 }
 0x102   :  { %10675 = vmatprep.subr.bf16.mxu1 %v14249_v21 }
 0x104   :  { %10284 = vmatpush3.bf16.msra.mxu0 %v12579_v24  ;;  %v10321_v24 = vpack.c.bf16 %v14344_v56, %v14343_v10 }
 0x105   :  { %10286 = vmatprep.subr.bf16.mxu0 %v14335_v27  ;;  %10677 = vmatpush3.bf16.msra.mxu1 %v14319_v63 }
 0x106   :  { %10678 = vmatprep.subr.bf16.mxu1 %v14249_v21 }
 0x107   :  { %8156 = vmatmul.mubr.f32.vlgmr.msra.gmra.mrb[0].mxu0 %v12679_v45 }
 0x108   :  { %8158 = vmatprep.mubr.f32.mxu0 %v12658_v29  ;;  %10288 = vmatpush3.bf16.msra.mxu0 %v14335_v27  ;;  %v14352_v29 = vand.u32 4294901760, %v12359_v25  ;;  %v14358_v25 = vand.u32 4294901760, %v14357_v9  ;;  %v14377_v9 = vld [vmem:[#allocation52_spill] sm:$0xff] }
 0x109   :  { %10290 = vmatprep.subr.bf16.mxu0 %v14336_v0  ;;  %10680 = vmatpush3.bf16.msra.mxu1 %v14320_v18 }
 0x10a   :  { %10681 = vmatprep.subr.bf16.mxu1 %v14249_v21  ;;  %v10329_v45 = vpack.c.bf16 %v14352_v29, %v14351_v12  ;;  %v14369_v12 = vld [vmem:[#allocation23_spill] sm:$0xff]  ;;  %v14370_v29 = vld [vmem:[#allocation24_spill] sm:$0xff] }
 0x10b   :  { %8159 = vmatmul.mubr.f32.gmra.mrb[2].mxu0 %v12688_v33  ;;  %v14356_v33 = vand.u32 4294901760, %v14355_v15  ;;  %v14374_v15 = vld [vmem:[#allocation49_spill] sm:$0xff] }
 0x10c   :  { %8161 = vmatprep.mubr.f32.mxu0 %v12709_v47  ;;  %10292 = vmatpush3.bf16.msra.mxu0 %v14336_v0 }
 0x10d   :  { %10294 = vmatprep.subr.bf16.mxu0 %v14337_v39  ;;  %10683 = vmatpush3.bf16.msra.mxu1 %v14321_v22  ;;  %v10333_v47 = vpack.c.bf16 %v14356_v33, %v14354_v3  ;;  %v14373_v3 = vld [vmem:[#allocation27_spill] sm:$0xff]  ;;  %v14375_v33 = vld [vmem:[#allocation50_spill] sm:$0xff] }
 0x10e   :  { %10684 = vmatprep.subr.bf16.mxu1 %v14249_v21 }
 0x10f   :  { %8162 = vmatmul.mubr.f32.gmra.mrb[4].mxu0 %v12718_v43  ;;  %v14359_v43 = vld [vmem:[#allocation43_spill] sm:$0xff] }
 0x110   :  { %8164 = vmatprep.mubr.f32.mxu0 %v12739_v36  ;;  %10296 = vmatpush3.bf16.msra.mxu0 %v14337_v39  ;;  %v14360_v36 = vand.u32 4294901760, %v14359_v43  ;;  %v14379_v43 = vld [vmem:[#allocation17_spill] sm:$0xff] }
 0x111   :  { %10298 = vmatprep.subr.bf16.mxu0 %v14338_v28  ;;  %10686 = vmatpush3.bf16.msra.mxu1 %v14322_v23 }
 0x112   :  { %10687 = vmatprep.subr.bf16.mxu1 %v14249_v21 }
 0x113   :  { %8165 = vmatmul.mubr.f32.gmra.mrb[6].mxu0 %v12749_v5 }
 0x114   :  { %10300 = vmatpush3.bf16.msra.mxu0 %v14338_v28  ;;  %8199 = vmatprep.mubr.f32.mxu0 %v14339_v60  ;;  %v14363_v60 = vld [vmem:[#allocation45_spill] sm:$0xff] }
 0x115   :  { %10302 = vmatprep.subr.bf16.mxu0 %v14340_v61  ;;  %10689 = vmatpush3.bf16.msra.mxu1 %v14323_v4  ;;  %v14364_v26 = vand.u32 4294901760, %v14363_v60  ;;  %v14384_v60 = vld [vmem:[#allocation57_spill] sm:$0xff] }
 0x116   :  { %10690 = vmatprep.subr.bf16.mxu1 %v14249_v21 }
 0x117   :  { %v10341_v5 = vpack.c.bf16 %v14364_v26, %v14362_v34  ;;  %v14383_v34 = vld [vmem:[#allocation56_spill] sm:$0xff]  ;;  %v14385_v26 = vld [vmem:[#allocation30_spill] sm:$0xff] }
 0x118   :  { %10304 = vmatpush3.bf16.msra.mxu0 %v14340_v61 }
 0x119   :  { %10306 = vmatprep.subr.bf16.mxu0 %v12322_v14  ;;  %10692 = vmatpush3.bf16.msra.mxu1 %v14324_v35 }
 0x11a   :  { %10693 = vmatprep.subr.bf16.mxu1 %v14249_v21 }
 0x11c   :  { %10308 = vmatpush3.bf16.msra.mxu0 %v12322_v14 }
 0x11d   :  { %10310 = vmatprep.subr.bf16.mxu0 %v12364_v17 }
 0x120   :  { %10312 = vmatpush3.bf16.msra.mxu0 %v12364_v17 }
 0x121   :  { %10314 = vmatprep.subr.bf16.mxu0 %v12518_v53 }
 0x124   :  { %10316 = vmatpush3.bf16.msra.mxu0 %v12518_v53 }
 0x125   :  { %10318 = vmatprep.subr.bf16.mxu0 %v10317_v37 }
 0x127   :  { %8200 = vmatmul.mubr.f32.vlgmr.msra.gmra.mrb[0].mxu0 %v14345_v49 }
 0x128   :  { %8202 = vmatprep.mubr.f32.mxu0 %v14346_v13  ;;  %10320 = vmatpush3.bf16.msra.mxu0 %v10317_v37  ;;  %v14367_v37 = vld [vmem:[#allocation48_spill] sm:$0xff] }
 0x129   :  { %10322 = vmatprep.subr.bf16.mxu0 %v10321_v24  ;;  %v14368_v10 = vand.u32 4294901760, %v14367_v37 }
 0x12b   :  { %8203 = vmatmul.mubr.f32.gmra.mrb[2].mxu0 %v14349_v40 }
 0x12c   :  { %8205 = vmatprep.mubr.f32.mxu0 %v14350_v46  ;;  %10324 = vmatpush3.bf16.msra.mxu0 %v10321_v24 }
 0x12d   :  { %10326 = vmatprep.subr.bf16.mxu0 %v10325_v59 }
 0x12f   :  { %8206 = vmatmul.mubr.f32.gmra.mrb[4].mxu0 %v14353_v42  ;;  %v14372_v42 = vld [vmem:[#allocation26_spill] sm:$0xff] }
 0x130   :  { %8208 = vmatprep.mubr.f32.mxu0 %v289_v52  ;;  %10328 = vmatpush3.bf16.msra.mxu0 %v10325_v59  ;;  %v10337_v52 = vpack.c.bf16 %v14360_v36, %v14358_v25  ;;  %v14378_v25 = vld [vmem:[#allocation53_spill] sm:$0xff]  ;;  %v14380_v36 = vld [vmem:[#allocation18_spill] sm:$0xff] }
 0x131   :  { %10330 = vmatprep.subr.bf16.mxu0 %v10329_v45 }
 0x133   :  { %8209 = vmatmul.mubr.f32.gmra.mrb[6].mxu0 %v299_v7  ;;  %v14365_v7 = vld [vmem:[#allocation46_spill] sm:$0xff] }
 0x134   :  { %10332 = vmatpush3.bf16.msra.mxu0 %v10329_v45  ;;  %8243 = vmatprep.mubr.msk.f32.mxu0 %vm99_vm1, %v11948_v50  ;;  %v14366_v55 = vand.u32 4294901760, %v14365_v7  ;;  %v14371_v45 = vld [vmem:[#allocation25_spill] sm:$0xff]  ;;  %v14387_v7 = vld [vmem:[#allocation34_spill] sm:$0xff] }
 0x135   :  { %10334 = vmatprep.subr.bf16.mxu0 %v10333_v47 }
 0x136   :  { %v10345_v56 = vpack.c.bf16 %v14368_v10, %v14366_v55 }
 0x138   :  { %10336 = vmatpush3.bf16.msra.mxu0 %v10333_v47  ;;  %v14376_v47 = vld [vmem:[#allocation51_spill] sm:$0xff] }
 0x139   :  { %10338 = vmatprep.subr.bf16.mxu0 %v10337_v52 }
 0x13c   :  { %10340 = vmatpush3.bf16.msra.mxu0 %v10337_v52  ;;  %v14381_v52 = vld [vmem:[#allocation54_spill] sm:$0xff] }
 0x13d   :  { %10342 = vmatprep.subr.bf16.mxu0 %v10341_v5 }
 0x140   :  { %10344 = vmatpush3.bf16.msra.mxu0 %v10341_v5  ;;  %v14386_v5 = vld [vmem:[#allocation32_spill] sm:$0xff] }
 0x141   :  { %10346 = vmatprep.subr.bf16.mxu0 %v10345_v56 }
 0x144   :  { %10348 = vmatpush3.bf16.msra.mxu0 %v10345_v56 }
 0x145   :  { %10350 = vmatprep.subr.bf16.mxu0 %v14335_v27 }
 0x147   :  { %8244 = vmatmul.mubr.msk.f32.vlgmr.msra.gmra.mrb[0].mxu0 %vm100_vm3, %v11948_v50 }
 0x148   :  { %8246 = vmatprep.mubr.msk.f32.mxu0 %vm101_vm2, %v11948_v50  ;;  %10352 = vmatpush3.bf16.msra.mxu0 %v14335_v27 }
 0x149   :  { %10354 = vmatprep.subr.bf16.mxu0 %v14336_v0 }
 0x14b   :  { %8247 = vmatmul.mubr.msk.f32.gmra.mrb[2].mxu0 %vm102_vm4, %v11948_v50 }
 0x14c   :  { %8249 = vmatprep.mubr.msk.f32.mxu0 %vm103_vm5, %v11948_v50  ;;  %10356 = vmatpush3.bf16.msra.mxu0 %v14336_v0 }
 0x14d   :  { %10358 = vmatprep.subr.bf16.mxu0 %v14337_v39 }
 0x14f   :  { %8250 = vmatmul.mubr.msk.f32.gmra.mrb[4].mxu0 %vm104_vm6, %v11948_v50 }
 0x150   :  { %8252 = vmatprep.mubr.msk.f32.mxu0 %vm105_vm7, %v11948_v50  ;;  %10360 = vmatpush3.bf16.msra.mxu0 %v14337_v39 }
 0x151   :  { %10362 = vmatprep.subr.bf16.mxu0 %v14338_v28 }
 0x153   :  { %8253 = vmatmul.mubr.msk.f32.gmra.mrb[6].mxu0 %vm106_vm8, %v11948_v50 }
 0x154   :  { %10364 = vmatpush3.bf16.msra.mxu0 %v14338_v28  ;;  %8287 = vmatprep.mubr.msk.f32.mxu0 %vm99_vm1, %v11948_v50 }
 0x155   :  { %10366 = vmatprep.subr.bf16.mxu0 %v14340_v61 }
 0x158   :  { %10368 = vmatpush3.bf16.msra.mxu0 %v14340_v61 }
 0x159   :  { %10370 = vmatprep.subr.bf16.mxu0 %v12322_v14 }
 0x15c   :  { %10372 = vmatpush3.bf16.msra.mxu0 %v12322_v14 }
 0x15d   :  { %10374 = vmatprep.subr.bf16.mxu0 %v12364_v17 }
 0x160   :  { %10376 = vmatpush3.bf16.msra.mxu0 %v12364_v17 }
 0x161   :  { %10378 = vmatprep.subr.bf16.mxu0 %v12518_v53 }
 0x164   :  { %10380 = vmatpush3.bf16.msra.mxu0 %v12518_v53 }
 0x165   :  { %10525 = vmatprep.subr.bf16.mxu0 %v14249_v21 }
 0x167   :  { %8288 = vmatmul.mubr.msk.f32.vlgmr.msra.gmra.mrb[0].mxu0 %vm100_vm3, %v11948_v50 }
 0x168   :  { %8290 = vmatprep.mubr.msk.f32.mxu0 %vm101_vm2, %v11948_v50  ;;  %10527 = vmatpush3.bf16.msra.mxu0 %v14317_v54 }
 0x169   :  { %10528 = vmatprep.subr.bf16.mxu0 %v14249_v21 }
 0x16b   :  { %8291 = vmatmul.mubr.msk.f32.gmra.mrb[2].mxu0 %vm102_vm4, %v11948_v50 }
 0x16c   :  { %8293 = vmatprep.mubr.msk.f32.mxu0 %vm103_vm5, %v11948_v50  ;;  %10530 = vmatpush3.bf16.msra.mxu0 %v14318_v62 }
 0x16d   :  { %10531 = vmatprep.subr.bf16.mxu0 %v14249_v21 }
 0x16f   :  { %8294 = vmatmul.mubr.msk.f32.gmra.mrb[4].mxu0 %vm104_vm6, %v11948_v50 }
 0x170   :  { %8296 = vmatprep.mubr.msk.f32.mxu0 %vm105_vm7, %v11948_v50  ;;  %10533 = vmatpush3.bf16.msra.mxu0 %v14319_v63 }
 0x171   :  { %10534 = vmatprep.subr.bf16.mxu0 %v14249_v21 }
 0x173   :  { %8297 = vmatmul.mubr.msk.f32.gmra.mrb[6].mxu0 %vm106_vm8, %v11948_v50 }
 0x174   :  { %10536 = vmatpush3.bf16.msra.mxu0 %v14320_v18  ;;  %8541 = vmatprep.mubr.msk.f32.mxu0 %vm11946_vm0, %v14260_v1 }
 0x175   :  { %10537 = vmatprep.subr.bf16.mxu0 %v14249_v21 }
 0x178   :  { %10539 = vmatpush3.bf16.msra.mxu0 %v14321_v22 }
 0x179   :  { %10540 = vmatprep.subr.bf16.mxu0 %v14249_v21 }
 0x17c   :  { %10542 = vmatpush3.bf16.msra.mxu0 %v14322_v23 }
 0x17d   :  { %10543 = vmatprep.subr.bf16.mxu0 %v14249_v21 }
 0x180   :  { %10545 = vmatpush3.bf16.msra.mxu0 %v14323_v4 }
 0x181   :  { %10546 = vmatprep.subr.bf16.mxu0 %v14249_v21 }
 0x184   :  { %10548 = vmatpush3.bf16.msra.mxu0 %v14324_v35 }
 0x185   :  { %10549 = vmatprep.subr.bf16.mxu0 %v14249_v21 }
 0x1cf   :  { %v1737_v14 = vpop.f32.mrb[0].mxu1 }
 0x1d0   :  { %v8508_v17 = vpop.f32.mrb[1].mxu1 }
 0x23a   :  { %v8289_v8 = vpop.f32.mrb[0].mxu0 }
 0x23b   :  { %v13046_v53 = vadd.f32 %v8289_v8, %v6947_v16  ;;  %v1042_v30 = vpop.f32.mrb[1].mxu0 }
 0x23c   :  { %v11678_v41 = vadd.f32 %v6947_v16, %v1042_v30 }
 0x23e   :  { %v1741_v48 = vadd.f32 %v11678_v41, %v1737_v14  ;;  %v8292_v58 = vpop.f32.mrb[2].mxu0 }
 0x23f   :  { %v13048_v2 = vadd.f32 %v8292_v58, %v6947_v16  ;;  %v1054_v32 = vpop.f32.mrb[3].mxu0 }
 0x240   :  { %11829 = vtanh.f32 %v1741_v48  ;;  %v13050_v57 = vadd.f32 %v6947_v16, %v1054_v32 }
 0x242   :  { %v8295_v50 = vpop.f32.mrb[4].mxu0 }
 0x243   :  { %v13052_v27 = vadd.f32 %v8295_v50, %v6947_v16  ;;  %v1066_v0 = vpop.f32.mrb[5].mxu0 }
 0x244   :  { %v13054_v39 = vadd.f32 %v6947_v16, %v1066_v0 }
 0x246   :  { %v8298_v28 = vpop.f32.mrb[6].mxu0 }
 0x247   :  { %v13056_v61 = vadd.f32 %v8298_v28, %v6947_v16  ;;  %v1078_v24 = vpop.f32.mrb[7].mxu0 }
 0x248   :  { %v13058_v49 = vadd.f32 %v6947_v16, %v1078_v24 }
 0x24a   :  { %v11830_v13 = vpop.eup %11829 }
 0x24b   :  { %v13060_v31 = vand.u32 4294901760, %v11830_v13 }
 0x24d   :  { %v1827_v20 = vsub.f32 %v11830_v13, %v13060_v31 }
 0x24f   :  { %v1828_v59 = vand.u32 4294901760, %v1827_v20 }
 0x251   :  { %v1829_v40 = vsub.f32 %v1827_v20, %v1828_v59 }
 0x253   :  { %v1830_v46 = vand.u32 4294901760, %v1829_v40 }
 0x255   :  { %8542 = vmatmul.mubr.f32.vlgmr.msra.gmra.mrb[8].mxu0 %v1830_v46 }
 0x256   :  { %10551 = vmatpush3.bf16.msra.mxu0 %v14369_v12  ;;  %8576 = vmatprep.mubr.msk.f32.mxu0 %vm11946_vm0, %v14260_v1 }
 0x257   :  { %10552 = vmatprep.subr.bf16.mxu0 %v14249_v21 }
 0x25a   :  { %10554 = vmatpush3.bf16.msra.mxu0 %v14370_v29 }
 0x25b   :  { %10555 = vmatprep.subr.bf16.mxu0 %v14249_v21 }
 0x25e   :  { %10557 = vmatpush3.bf16.msra.mxu0 %v14371_v45 }
 0x25f   :  { %10558 = vmatprep.subr.bf16.mxu0 %v14249_v21 }
 0x262   :  { %10560 = vmatpush3.bf16.msra.mxu0 %v14372_v42 }
 0x263   :  { %10561 = vmatprep.subr.bf16.mxu0 %v14249_v21 }
 0x266   :  { %10563 = vmatpush3.bf16.msra.mxu0 %v14373_v3 }
 0x267   :  { %10564 = vmatprep.subr.bf16.mxu0 %v14249_v21 }
 0x26a   :  { %10566 = vmatpush3.bf16.msra.mxu0 %v14374_v15 }
 0x26b   :  { %10567 = vmatprep.subr.bf16.mxu0 %v14249_v21 }
 0x26e   :  { %10569 = vmatpush3.bf16.msra.mxu0 %v14375_v33 }
 0x26f   :  { %10570 = vmatprep.subr.bf16.mxu0 %v14249_v21 }
 0x272   :  { %10572 = vmatpush3.bf16.msra.mxu0 %v14376_v47 }
 0x273   :  { %10573 = vmatprep.subr.bf16.mxu0 %v14249_v21 }
 0x275   :  { %8577 = vmatmul.mubr.f32.vlgmr.msra.gmra.mrb[8].mxu0 %v13060_v31 }
 0x276   :  { %10575 = vmatpush3.bf16.msra.mxu0 %v14377_v9  ;;  %8611 = vmatprep.mubr.msk.f32.mxu0 %vm11946_vm0, %v14260_v1 }
 0x277   :  { %10576 = vmatprep.subr.bf16.mxu0 %v14249_v21 }
 0x27a   :  { %10578 = vmatpush3.bf16.msra.mxu0 %v14378_v25 }
 0x27b   :  { %10579 = vmatprep.subr.bf16.mxu0 %v14249_v21 }
 0x27e   :  { %10581 = vmatpush3.bf16.msra.mxu0 %v14379_v43 }
 0x27f   :  { %10582 = vmatprep.subr.bf16.mxu0 %v14249_v21 }
 0x282   :  { %10584 = vmatpush3.bf16.msra.mxu0 %v14380_v36 }
 0x283   :  { %10585 = vmatprep.subr.bf16.mxu0 %v14249_v21 }
 0x286   :  { %10587 = vmatpush3.bf16.msra.mxu0 %v14381_v52 }
 0x287   :  { %10588 = vmatprep.subr.bf16.mxu0 %v14249_v21 }
 0x28a   :  { %10590 = vmatpush3.bf16.msra.mxu0 %v14382_v51 }
 0x28b   :  { %10591 = vmatprep.subr.bf16.mxu0 %v14249_v21 }
 0x28e   :  { %10593 = vmatpush3.bf16.msra.mxu0 %v14383_v34 }
 0x28f   :  { %10594 = vmatprep.subr.bf16.mxu0 %v14249_v21 }
 0x292   :  { %10596 = vmatpush3.bf16.msra.mxu0 %v14384_v60 }
 0x293   :  { %10597 = vmatprep.subr.bf16.mxu0 %v14249_v21 }
 0x295   :  { %8612 = vmatmul.mubr.f32.vlgmr.msra.gmra.mrb[8].mxu0 %v1827_v20 }
 0x296   :  { %10599 = vmatpush3.bf16.msra.mxu0 %v14317_v54  ;;  %8646 = vmatprep.mubr.msk.f32.mxu0 %vm11946_vm0, %v14260_v1 }
 0x297   :  { %10600 = vmatprep.subr.bf16.mxu0 %v14249_v21 }
 0x29a   :  { %10602 = vmatpush3.bf16.msra.mxu0 %v14318_v62 }
 0x29b   :  { %10603 = vmatprep.subr.bf16.mxu0 %v14249_v21 }
 0x29e   :  { %10605 = vmatpush3.bf16.msra.mxu0 %v14319_v63 }
 0x29f   :  { %10606 = vmatprep.subr.bf16.mxu0 %v14249_v21 }
 0x2a2   :  { %10608 = vmatpush3.bf16.msra.mxu0 %v14320_v18 }
 0x2a3   :  { %10609 = vmatprep.subr.bf16.mxu0 %v14249_v21 }
 0x2a6   :  { %10611 = vmatpush3.bf16.msra.mxu0 %v14321_v22 }
 0x2a7   :  { %10612 = vmatprep.subr.bf16.mxu0 %v14249_v21 }
 0x2aa   :  { %10614 = vmatpush3.bf16.msra.mxu0 %v14322_v23 }
 0x2ab   :  { %10615 = vmatprep.subr.bf16.mxu0 %v14249_v21 }
 0x2ae   :  { %10617 = vmatpush3.bf16.msra.mxu0 %v14323_v4 }
 0x2af   :  { %10618 = vmatprep.subr.bf16.mxu0 %v14249_v21 }
 0x2b2   :  { %10620 = vmatpush3.bf16.msra.mxu0 %v14324_v35 }
 0x2b3   :  { %10621 = vmatprep.subr.bf16.mxu0 %v14249_v21 }
 0x2b5   :  { %8647 = vmatmul.mubr.f32.vlgmr.msra.gmra.mrb[8].mxu0 %v1828_v59 }
 0x2b6   :  { %10623 = vmatpush3.bf16.msra.mxu0 %v14385_v26  ;;  %8681 = vmatprep.mubr.msk.f32.mxu0 %vm11946_vm0, %v14260_v1 }
 0x2b7   :  { %10624 = vmatprep.subr.bf16.mxu0 %v14249_v21 }
 0x2ba   :  { %10626 = vmatpush3.bf16.msra.mxu0 %v14386_v5 }
 0x2bb   :  { %10627 = vmatprep.subr.bf16.mxu0 %v14249_v21 }
 0x2be   :  { %10629 = vmatpush3.bf16.msra.mxu0 %v14387_v7 }
 0x2bf   :  { %10630 = vmatprep.subr.bf16.mxu0 %v14249_v21 }
 0x2c2   :  { %10632 = vmatpush3.bf16.msra.mxu0 %v14329_v44 }
 0x2c3   :  { %10633 = vmatprep.subr.bf16.mxu0 %v14249_v21 }
 0x2c6   :  { %10635 = vmatpush3.bf16.msra.mxu0 %v14330_v6 }
 0x2c7   :  { %10636 = vmatprep.subr.bf16.mxu0 %v14249_v21 }
 0x2ca   :  { %10638 = vmatpush3.bf16.msra.mxu0 %v14331_v38 }
 0x2cb   :  { %10639 = vmatprep.subr.bf16.mxu0 %v14249_v21 }
 0x2ce   :  { %10641 = vmatpush3.bf16.msra.mxu0 %v14333_v19 }
 0x2cf   :  { %10642 = vmatprep.subr.bf16.mxu0 %v14249_v21 }
 0x2d2   :  { %10644 = vmatpush3.bf16.msra.mxu0 %v14334_v11 }
 0x2d3   :  { %10645 = vmatprep.subr.bf16.mxu0 %v14249_v21 }
 0x2d5   :  { %8682 = vmatmul.mubr.f32.vlgmr.msra.gmra.mrb[8].mxu0 %v13060_v31 }
 0x2d6   :  { %10647 = vmatpush3.bf16.msra.mxu0 %v14317_v54  ;;  %8716 = vmatprep.mubr.msk.f32.mxu0 %vm11946_vm0, %v14260_v1 }
 0x2d7   :  { %10648 = vmatprep.subr.bf16.mxu0 %v14249_v21 }
 0x2da   :  { %10650 = vmatpush3.bf16.msra.mxu0 %v14318_v62 }
 0x2db   :  { %10651 = vmatprep.subr.bf16.mxu0 %v14249_v21 }
 0x2de   :  { %10653 = vmatpush3.bf16.msra.mxu0 %v14319_v63 }
 0x2df   :  { %10654 = vmatprep.subr.bf16.mxu0 %v14249_v21 }
 0x2e2   :  { %10656 = vmatpush3.bf16.msra.mxu0 %v14320_v18 }
 0x2e3   :  { %10657 = vmatprep.subr.bf16.mxu0 %v14249_v21 }
 0x2e6   :  { %10659 = vmatpush3.bf16.msra.mxu0 %v14321_v22 }
 0x2e7   :  { %10660 = vmatprep.subr.bf16.mxu0 %v14249_v21 }
 0x2ea   :  { %10662 = vmatpush3.bf16.msra.mxu0 %v14322_v23 }
 0x2eb   :  { %10663 = vmatprep.subr.bf16.mxu0 %v14249_v21 }
 0x2ee   :  { %10665 = vmatpush3.bf16.msra.mxu0 %v14323_v4 }
 0x2ef   :  { %10666 = vmatprep.subr.bf16.mxu0 %v14249_v21 }
 0x2f2   :  { %10668 = vmatpush3.bf16.msra.mxu0 %v14324_v35 }
 0x2f3   :  { %10813 = vmatprep.subr.bf16.mxu0 %v14249_v21 }
 0x2f5   :  { %8717 = vmatmul.mubr.f32.vlgmr.msra.gmra.mrb[8].mxu0 %v13060_v31 }
 0x2f6   :  { %10815 = vmatpush3.bf16.msra.mxu0 %v14317_v54  ;;  %8961 = vmatprep.mubr.msk.f32.mxu0 %vm11946_vm0, %v14260_v1 }
 0x2f7   :  { %10816 = vmatprep.subr.bf16.mxu0 %v14249_v21 }
 0x2fa   :  { %10818 = vmatpush3.bf16.msra.mxu0 %v14318_v62 }
 0x2fb   :  { %10819 = vmatprep.subr.bf16.mxu0 %v14249_v21 }
 0x2fe   :  { %10821 = vmatpush3.bf16.msra.mxu0 %v14319_v63 }
 0x2ff   :  { %10822 = vmatprep.subr.bf16.mxu0 %v14249_v21 }
 0x302   :  { %10824 = vmatpush3.bf16.msra.mxu0 %v14320_v18 }
 0x303   :  { %10825 = vmatprep.subr.bf16.mxu0 %v14249_v21 }
 0x306   :  { %10827 = vmatpush3.bf16.msra.mxu0 %v14321_v22 }
 0x307   :  { %10828 = vmatprep.subr.bf16.mxu0 %v14249_v21 }
 0x30a   :  { %10830 = vmatpush3.bf16.msra.mxu0 %v14322_v23 }
 0x30b   :  { %10831 = vmatprep.subr.bf16.mxu0 %v14249_v21 }
 0x30e   :  { %10833 = vmatpush3.bf16.msra.mxu0 %v14323_v4 }
 0x30f   :  { %10834 = vmatprep.subr.bf16.mxu0 %v14249_v21 }
 0x312   :  { %10836 = vmatpush3.bf16.msra.mxu0 %v14324_v35 }
 0x313   :  { %10837 = vmatprep.subr.bf16.mxu0 %v14249_v21 }
 0x3c8   :  { %v2382_v55 = vpop.f32.mrb[8].mxu0 }
 0x3c9   :  { %v2386_v37 = vadd.f32 %v13046_v53, %v2382_v55  ;;  %v8718_v10 = vpop.f32.mrb[9].mxu0 }
 0x3cb   :  { %11831 = vtanh.f32 %v2386_v37 }
 0x3d5   :  { %v11832_v56 = vpop.eup %11831 }
 0x3d6   :  { %v13175_v14 = vand.u32 4294901760, %v11832_v56 }
 0x3d8   :  { %v2472_v17 = vsub.f32 %v11832_v56, %v13175_v14 }
 0x3da   :  { %v2473_v16 = vand.u32 4294901760, %v2472_v17 }
 0x3dc   :  { %v2474_v8 = vsub.f32 %v2472_v17, %v2473_v16 }
 0x3de   :  { %v2475_v30 = vand.u32 4294901760, %v2474_v8 }
 0x3e0   :  { %8752 = vmatmul.mubr.f32.vlgmr.msra.gmra.mrb[2].mxu1 %v2475_v30 }
 0x3e1   :  { %10695 = vmatpush3.bf16.msra.mxu1 %v14369_v12  ;;  %8786 = vmatprep.mubr.msk.f32.mxu1 %vm11946_vm0, %v14260_v1 }
 0x3e2   :  { %10696 = vmatprep.subr.bf16.mxu1 %v14249_v21 }
 0x3e5   :  { %10698 = vmatpush3.bf16.msra.mxu1 %v14370_v29 }
 0x3e6   :  { %10699 = vmatprep.subr.bf16.mxu1 %v14249_v21 }
 0x3e9   :  { %10701 = vmatpush3.bf16.msra.mxu1 %v14371_v45 }
 0x3ea   :  { %10702 = vmatprep.subr.bf16.mxu1 %v14249_v21 }
 0x3ed   :  { %10704 = vmatpush3.bf16.msra.mxu1 %v14372_v42 }
 0x3ee   :  { %10705 = vmatprep.subr.bf16.mxu1 %v14249_v21 }
 0x3f1   :  { %10707 = vmatpush3.bf16.msra.mxu1 %v14373_v3 }
 0x3f2   :  { %10708 = vmatprep.subr.bf16.mxu1 %v14249_v21 }
 0x3f5   :  { %10710 = vmatpush3.bf16.msra.mxu1 %v14374_v15 }
 0x3f6   :  { %10711 = vmatprep.subr.bf16.mxu1 %v14249_v21 }
 0x3f9   :  { %10713 = vmatpush3.bf16.msra.mxu1 %v14375_v33 }
 0x3fa   :  { %10714 = vmatprep.subr.bf16.mxu1 %v14249_v21 }
 0x3fd   :  { %10716 = vmatpush3.bf16.msra.mxu1 %v14376_v47 }
 0x3fe   :  { %10717 = vmatprep.subr.bf16.mxu1 %v14249_v21 }
 0x400   :  { %8787 = vmatmul.mubr.f32.vlgmr.msra.gmra.mrb[2].mxu1 %v13175_v14 }
 0x401   :  { %10719 = vmatpush3.bf16.msra.mxu1 %v14377_v9  ;;  %8821 = vmatprep.mubr.msk.f32.mxu1 %vm11946_vm0, %v14260_v1 }
 0x402   :  { %10720 = vmatprep.subr.bf16.mxu1 %v14249_v21 }
 0x405   :  { %10722 = vmatpush3.bf16.msra.mxu1 %v14378_v25 }
 0x406   :  { %10723 = vmatprep.subr.bf16.mxu1 %v14249_v21 }
 0x409   :  { %10725 = vmatpush3.bf16.msra.mxu1 %v14379_v43 }
 0x40a   :  { %10726 = vmatprep.subr.bf16.mxu1 %v14249_v21 }
 0x40d   :  { %10728 = vmatpush3.bf16.msra.mxu1 %v14380_v36 }
 0x40e   :  { %10729 = vmatprep.subr.bf16.mxu1 %v14249_v21 }
 0x411   :  { %10731 = vmatpush3.bf16.msra.mxu1 %v14381_v52 }
 0x412   :  { %10732 = vmatprep.subr.bf16.mxu1 %v14249_v21 }
 0x415   :  { %10734 = vmatpush3.bf16.msra.mxu1 %v14382_v51 }
 0x416   :  { %10735 = vmatprep.subr.bf16.mxu1 %v14249_v21 }
 0x419   :  { %10737 = vmatpush3.bf16.msra.mxu1 %v14383_v34 }
 0x41a   :  { %10738 = vmatprep.subr.bf16.mxu1 %v14249_v21 }
 0x41d   :  { %10740 = vmatpush3.bf16.msra.mxu1 %v14384_v60 }
 0x41e   :  { %10741 = vmatprep.subr.bf16.mxu1 %v14249_v21 }
 0x420   :  { %8822 = vmatmul.mubr.f32.vlgmr.msra.gmra.mrb[2].mxu1 %v2472_v17 }
 0x421   :  { %10743 = vmatpush3.bf16.msra.mxu1 %v14317_v54  ;;  %8856 = vmatprep.mubr.msk.f32.mxu1 %vm11946_vm0, %v14260_v1 }
 0x422   :  { %10744 = vmatprep.subr.bf16.mxu1 %v14249_v21 }
 0x425   :  { %10746 = vmatpush3.bf16.msra.mxu1 %v14318_v62 }
 0x426   :  { %10747 = vmatprep.subr.bf16.mxu1 %v14249_v21 }
 0x429   :  { %10749 = vmatpush3.bf16.msra.mxu1 %v14319_v63 }
 0x42a   :  { %10750 = vmatprep.subr.bf16.mxu1 %v14249_v21 }
 0x42d   :  { %10752 = vmatpush3.bf16.msra.mxu1 %v14320_v18 }
 0x42e   :  { %10753 = vmatprep.subr.bf16.mxu1 %v14249_v21 }
 0x431   :  { %10755 = vmatpush3.bf16.msra.mxu1 %v14321_v22 }
 0x432   :  { %10756 = vmatprep.subr.bf16.mxu1 %v14249_v21 }
 0x435   :  { %10758 = vmatpush3.bf16.msra.mxu1 %v14322_v23 }
 0x436   :  { %10759 = vmatprep.subr.bf16.mxu1 %v14249_v21 }
 0x439   :  { %10761 = vmatpush3.bf16.msra.mxu1 %v14323_v4 }
 0x43a   :  { %10762 = vmatprep.subr.bf16.mxu1 %v14249_v21 }
 0x43d   :  { %10764 = vmatpush3.bf16.msra.mxu1 %v14324_v35 }
 0x43e   :  { %10765 = vmatprep.subr.bf16.mxu1 %v14249_v21 }
 0x440   :  { %8857 = vmatmul.mubr.f32.vlgmr.msra.gmra.mrb[2].mxu1 %v2473_v16 }
 0x441   :  { %10767 = vmatpush3.bf16.msra.mxu1 %v14385_v26  ;;  %8891 = vmatprep.mubr.msk.f32.mxu1 %vm11946_vm0, %v14260_v1 }
 0x442   :  { %10768 = vmatprep.subr.bf16.mxu1 %v14249_v21 }
 0x445   :  { %10770 = vmatpush3.bf16.msra.mxu1 %v14386_v5 }
 0x446   :  { %10771 = vmatprep.subr.bf16.mxu1 %v14249_v21 }
 0x449   :  { %10773 = vmatpush3.bf16.msra.mxu1 %v14387_v7 }
 0x44a   :  { %10774 = vmatprep.subr.bf16.mxu1 %v14249_v21 }
 0x44d   :  { %10776 = vmatpush3.bf16.msra.mxu1 %v14329_v44 }
 0x44e   :  { %10777 = vmatprep.subr.bf16.mxu1 %v14249_v21 }
 0x451   :  { %10779 = vmatpush3.bf16.msra.mxu1 %v14330_v6 }
 0x452   :  { %10780 = vmatprep.subr.bf16.mxu1 %v14249_v21 }
 0x455   :  { %10782 = vmatpush3.bf16.msra.mxu1 %v14331_v38 }
 0x456   :  { %10783 = vmatprep.subr.bf16.mxu1 %v14249_v21 }
 0x459   :  { %10785 = vmatpush3.bf16.msra.mxu1 %v14333_v19 }
 0x45a   :  { %10786 = vmatprep.subr.bf16.mxu1 %v14249_v21 }
 0x45d   :  { %10788 = vmatpush3.bf16.msra.mxu1 %v14334_v11 }
 0x45e   :  { %10789 = vmatprep.subr.bf16.mxu1 %v14249_v21 }
 0x460   :  { %8892 = vmatmul.mubr.f32.vlgmr.msra.gmra.mrb[2].mxu1 %v13175_v14 }
 0x461   :  { %10791 = vmatpush3.bf16.msra.mxu1 %v14317_v54  ;;  %8926 = vmatprep.mubr.msk.f32.mxu1 %vm11946_vm0, %v14260_v1 }
 0x462   :  { %10792 = vmatprep.subr.bf16.mxu1 %v14249_v21 }
 0x465   :  { %10794 = vmatpush3.bf16.msra.mxu1 %v14318_v62 }
 0x466   :  { %10795 = vmatprep.subr.bf16.mxu1 %v14249_v21 }
 0x469   :  { %10797 = vmatpush3.bf16.msra.mxu1 %v14319_v63 }
 0x46a   :  { %10798 = vmatprep.subr.bf16.mxu1 %v14249_v21 }
 0x46d   :  { %10800 = vmatpush3.bf16.msra.mxu1 %v14320_v18 }
 0x46e   :  { %10801 = vmatprep.subr.bf16.mxu1 %v14249_v21 }
 0x471   :  { %10803 = vmatpush3.bf16.msra.mxu1 %v14321_v22 }
 0x472   :  { %10804 = vmatprep.subr.bf16.mxu1 %v14249_v21 }
 0x475   :  { %10806 = vmatpush3.bf16.msra.mxu1 %v14322_v23 }
 0x476   :  { %10807 = vmatprep.subr.bf16.mxu1 %v14249_v21 }
 0x479   :  { %10809 = vmatpush3.bf16.msra.mxu1 %v14323_v4 }
 0x47a   :  { %10810 = vmatprep.subr.bf16.mxu1 %v14249_v21 }
 0x47d   :  { %10812 = vmatpush3.bf16.msra.mxu1 %v14324_v35 }
 0x47e   :  { %10957 = vmatprep.subr.bf16.mxu1 %v14249_v21 }
 0x480   :  { %8927 = vmatmul.mubr.f32.vlgmr.msra.gmra.mrb[2].mxu1 %v13175_v14 }
 0x481   :  { %10959 = vmatpush3.bf16.msra.mxu1 %v14317_v54  ;;  %9171 = vmatprep.mubr.msk.f32.mxu1 %vm11946_vm0, %v14260_v1 }
 0x482   :  { %10960 = vmatprep.subr.bf16.mxu1 %v14249_v21 }
 0x485   :  { %10962 = vmatpush3.bf16.msra.mxu1 %v14318_v62 }
 0x486   :  { %10963 = vmatprep.subr.bf16.mxu1 %v14249_v21 }
 0x489   :  { %10965 = vmatpush3.bf16.msra.mxu1 %v14319_v63 }
 0x48a   :  { %10966 = vmatprep.subr.bf16.mxu1 %v14249_v21 }
 0x48d   :  { %10968 = vmatpush3.bf16.msra.mxu1 %v14320_v18 }
 0x48e   :  { %10969 = vmatprep.subr.bf16.mxu1 %v14249_v21 }
 0x491   :  { %10971 = vmatpush3.bf16.msra.mxu1 %v14321_v22 }
 0x492   :  { %10972 = vmatprep.subr.bf16.mxu1 %v14249_v21 }
 0x495   :  { %10974 = vmatpush3.bf16.msra.mxu1 %v14322_v23 }
 0x496   :  { %10975 = vmatprep.subr.bf16.mxu1 %v14249_v21 }
 0x499   :  { %10977 = vmatpush3.bf16.msra.mxu1 %v14323_v4 }
 0x49a   :  { %10978 = vmatprep.subr.bf16.mxu1 %v14249_v21 }
 0x49d   :  { %10980 = vmatpush3.bf16.msra.mxu1 %v14324_v35 }
 0x49e   :  { %10981 = vmatprep.subr.bf16.mxu1 %v14249_v21 }
 0x553   :  { %v3027_v53 = vpop.f32.mrb[2].mxu1 }
 0x554   :  { %v3031_v41 = vadd.f32 %v13050_v57, %v3027_v53  ;;  %v8928_v48 = vpop.f32.mrb[3].mxu1 }
 0x556   :  { %11833 = vtanh.f32 %v3031_v41 }
 0x560   :  { %v11834_v58 = vpop.eup %11833 }
 0x561   :  { %v13290_v32 = vand.u32 4294901760, %v11834_v58 }
 0x563   :  { %v3117_v50 = vsub.f32 %v11834_v58, %v13290_v32 }
 0x565   :  { %v3118_v0 = vand.u32 4294901760, %v3117_v50 }
 0x567   :  { %v3119_v28 = vsub.f32 %v3117_v50, %v3118_v0 }
 0x569   :  { %v3120_v24 = vand.u32 4294901760, %v3119_v28 }
 0x56b   :  { %8962 = vmatmul.mubr.f32.vlgmr.msra.gmra.mrb[10].mxu0 %v3120_v24 }
 0x56c   :  { %10839 = vmatpush3.bf16.msra.mxu0 %v14369_v12  ;;  %8996 = vmatprep.mubr.msk.f32.mxu0 %vm11946_vm0, %v14260_v1 }
 0x56d   :  { %10840 = vmatprep.subr.bf16.mxu0 %v14249_v21 }
 0x570   :  { %10842 = vmatpush3.bf16.msra.mxu0 %v14370_v29 }
 0x571   :  { %10843 = vmatprep.subr.bf16.mxu0 %v14249_v21 }
 0x574   :  { %10845 = vmatpush3.bf16.msra.mxu0 %v14371_v45 }
 0x575   :  { %10846 = vmatprep.subr.bf16.mxu0 %v14249_v21 }
 0x578   :  { %10848 = vmatpush3.bf16.msra.mxu0 %v14372_v42 }
 0x579   :  { %10849 = vmatprep.subr.bf16.mxu0 %v14249_v21 }
 0x57c   :  { %10851 = vmatpush3.bf16.msra.mxu0 %v14373_v3 }
 0x57d   :  { %10852 = vmatprep.subr.bf16.mxu0 %v14249_v21 }
 0x580   :  { %10854 = vmatpush3.bf16.msra.mxu0 %v14374_v15 }
 0x581   :  { %10855 = vmatprep.subr.bf16.mxu0 %v14249_v21 }
 0x584   :  { %10857 = vmatpush3.bf16.msra.mxu0 %v14375_v33 }
 0x585   :  { %10858 = vmatprep.subr.bf16.mxu0 %v14249_v21 }
 0x588   :  { %10860 = vmatpush3.bf16.msra.mxu0 %v14376_v47 }
 0x589   :  { %10861 = vmatprep.subr.bf16.mxu0 %v14249_v21 }
 0x58b   :  { %8997 = vmatmul.mubr.f32.vlgmr.msra.gmra.mrb[10].mxu0 %v13290_v32 }
 0x58c   :  { %10863 = vmatpush3.bf16.msra.mxu0 %v14377_v9  ;;  %9031 = vmatprep.mubr.msk.f32.mxu0 %vm11946_vm0, %v14260_v1 }
 0x58d   :  { %10864 = vmatprep.subr.bf16.mxu0 %v14249_v21 }
 0x590   :  { %10866 = vmatpush3.bf16.msra.mxu0 %v14378_v25 }
 0x591   :  { %10867 = vmatprep.subr.bf16.mxu0 %v14249_v21 }
 0x594   :  { %10869 = vmatpush3.bf16.msra.mxu0 %v14379_v43 }
 0x595   :  { %10870 = vmatprep.subr.bf16.mxu0 %v14249_v21 }
 0x598   :  { %10872 = vmatpush3.bf16.msra.mxu0 %v14380_v36 }
 0x599   :  { %10873 = vmatprep.subr.bf16.mxu0 %v14249_v21 }
 0x59c   :  { %10875 = vmatpush3.bf16.msra.mxu0 %v14381_v52 }
 0x59d   :  { %10876 = vmatprep.subr.bf16.mxu0 %v14249_v21 }
 0x5a0   :  { %10878 = vmatpush3.bf16.msra.mxu0 %v14382_v51 }
 0x5a1   :  { %10879 = vmatprep.subr.bf16.mxu0 %v14249_v21 }
 0x5a4   :  { %10881 = vmatpush3.bf16.msra.mxu0 %v14383_v34 }
 0x5a5   :  { %10882 = vmatprep.subr.bf16.mxu0 %v14249_v21 }
 0x5a8   :  { %10884 = vmatpush3.bf16.msra.mxu0 %v14384_v60 }
 0x5a9   :  { %10885 = vmatprep.subr.bf16.mxu0 %v14249_v21 }
 0x5ab   :  { %9032 = vmatmul.mubr.f32.vlgmr.msra.gmra.mrb[10].mxu0 %v3117_v50 }
 0x5ac   :  { %10887 = vmatpush3.bf16.msra.mxu0 %v14317_v54  ;;  %9066 = vmatprep.mubr.msk.f32.mxu0 %vm11946_vm0, %v14260_v1 }
 0x5ad   :  { %10888 = vmatprep.subr.bf16.mxu0 %v14249_v21 }
 0x5b0   :  { %10890 = vmatpush3.bf16.msra.mxu0 %v14318_v62 }
 0x5b1   :  { %10891 = vmatprep.subr.bf16.mxu0 %v14249_v21 }
 0x5b4   :  { %10893 = vmatpush3.bf16.msra.mxu0 %v14319_v63 }
 0x5b5   :  { %10894 = vmatprep.subr.bf16.mxu0 %v14249_v21 }
 0x5b8   :  { %10896 = vmatpush3.bf16.msra.mxu0 %v14320_v18 }
 0x5b9   :  { %10897 = vmatprep.subr.bf16.mxu0 %v14249_v21 }
 0x5bc   :  { %10899 = vmatpush3.bf16.msra.mxu0 %v14321_v22 }
 0x5bd   :  { %10900 = vmatprep.subr.bf16.mxu0 %v14249_v21 }
 0x5c0   :  { %10902 = vmatpush3.bf16.msra.mxu0 %v14322_v23 }
 0x5c1   :  { %10903 = vmatprep.subr.bf16.mxu0 %v14249_v21 }
 0x5c4   :  { %10905 = vmatpush3.bf16.msra.mxu0 %v14323_v4 }
 0x5c5   :  { %10906 = vmatprep.subr.bf16.mxu0 %v14249_v21 }
 0x5c8   :  { %10908 = vmatpush3.bf16.msra.mxu0 %v14324_v35 }
 0x5c9   :  { %10909 = vmatprep.subr.bf16.mxu0 %v14249_v21 }
 0x5cb   :  { %9067 = vmatmul.mubr.f32.vlgmr.msra.gmra.mrb[10].mxu0 %v3118_v0 }
 0x5cc   :  { %10911 = vmatpush3.bf16.msra.mxu0 %v14385_v26  ;;  %9101 = vmatprep.mubr.msk.f32.mxu0 %vm11946_vm0, %v14260_v1 }
 0x5cd   :  { %10912 = vmatprep.subr.bf16.mxu0 %v14249_v21 }
 0x5d0   :  { %10914 = vmatpush3.bf16.msra.mxu0 %v14386_v5 }
 0x5d1   :  { %10915 = vmatprep.subr.bf16.mxu0 %v14249_v21 }
 0x5d4   :  { %10917 = vmatpush3.bf16.msra.mxu0 %v14387_v7 }
 0x5d5   :  { %10918 = vmatprep.subr.bf16.mxu0 %v14249_v21 }
 0x5d8   :  { %10920 = vmatpush3.bf16.msra.mxu0 %v14329_v44 }
 0x5d9   :  { %10921 = vmatprep.subr.bf16.mxu0 %v14249_v21 }
 0x5dc   :  { %10923 = vmatpush3.bf16.msra.mxu0 %v14330_v6 }
 0x5dd   :  { %10924 = vmatprep.subr.bf16.mxu0 %v14249_v21 }
 0x5e0   :  { %10926 = vmatpush3.bf16.msra.mxu0 %v14331_v38 }
 0x5e1   :  { %10927 = vmatprep.subr.bf16.mxu0 %v14249_v21 }
 0x5e4   :  { %10929 = vmatpush3.bf16.msra.mxu0 %v14333_v19 }
 0x5e5   :  { %10930 = vmatprep.subr.bf16.mxu0 %v14249_v21 }
 0x5e8   :  { %10932 = vmatpush3.bf16.msra.mxu0 %v14334_v11 }
 0x5e9   :  { %10933 = vmatprep.subr.bf16.mxu0 %v14249_v21 }
 0x5eb   :  { %9102 = vmatmul.mubr.f32.vlgmr.msra.gmra.mrb[10].mxu0 %v13290_v32 }
 0x5ec   :  { %10935 = vmatpush3.bf16.msra.mxu0 %v14317_v54  ;;  %9136 = vmatprep.mubr.msk.f32.mxu0 %vm11946_vm0, %v14260_v1 }
 0x5ed   :  { %10936 = vmatprep.subr.bf16.mxu0 %v14249_v21 }
 0x5f0   :  { %10938 = vmatpush3.bf16.msra.mxu0 %v14318_v62 }
 0x5f1   :  { %10939 = vmatprep.subr.bf16.mxu0 %v14249_v21 }
 0x5f4   :  { %10941 = vmatpush3.bf16.msra.mxu0 %v14319_v63 }
 0x5f5   :  { %10942 = vmatprep.subr.bf16.mxu0 %v14249_v21 }
 0x5f8   :  { %10944 = vmatpush3.bf16.msra.mxu0 %v14320_v18 }
 0x5f9   :  { %10945 = vmatprep.subr.bf16.mxu0 %v14249_v21 }
 0x5fc   :  { %10947 = vmatpush3.bf16.msra.mxu0 %v14321_v22 }
 0x5fd   :  { %10948 = vmatprep.subr.bf16.mxu0 %v14249_v21 }
 0x600   :  { %10950 = vmatpush3.bf16.msra.mxu0 %v14322_v23 }
 0x601   :  { %10951 = vmatprep.subr.bf16.mxu0 %v14249_v21 }
 0x604   :  { %10953 = vmatpush3.bf16.msra.mxu0 %v14323_v4 }
 0x605   :  { %10954 = vmatprep.subr.bf16.mxu0 %v14249_v21 }
 0x608   :  { %10956 = vmatpush3.bf16.msra.mxu0 %v14324_v35 }
 0x609   :  { %11101 = vmatprep.subr.bf16.mxu0 %v14249_v21 }
 0x60b   :  { %9137 = vmatmul.mubr.f32.vlgmr.msra.gmra.mrb[10].mxu0 %v13290_v32 }
 0x60c   :  { %11103 = vmatpush3.bf16.msra.mxu0 %v14317_v54  ;;  %9381 = vmatprep.mubr.msk.f32.mxu0 %vm11946_vm0, %v14260_v1 }
 0x60d   :  { %11104 = vmatprep.subr.bf16.mxu0 %v14249_v21 }
 0x610   :  { %11106 = vmatpush3.bf16.msra.mxu0 %v14318_v62 }
 0x611   :  { %11107 = vmatprep.subr.bf16.mxu0 %v14249_v21 }
 0x614   :  { %11109 = vmatpush3.bf16.msra.mxu0 %v14319_v63 }
 0x615   :  { %11110 = vmatprep.subr.bf16.mxu0 %v14249_v21 }
 0x618   :  { %11112 = vmatpush3.bf16.msra.mxu0 %v14320_v18 }
 0x619   :  { %11113 = vmatprep.subr.bf16.mxu0 %v14249_v21 }
 0x61c   :  { %11115 = vmatpush3.bf16.msra.mxu0 %v14321_v22 }
 0x61d   :  { %11116 = vmatprep.subr.bf16.mxu0 %v14249_v21 }
 0x620   :  { %11118 = vmatpush3.bf16.msra.mxu0 %v14322_v23 }
 0x621   :  { %11119 = vmatprep.subr.bf16.mxu0 %v14249_v21 }
 0x624   :  { %11121 = vmatpush3.bf16.msra.mxu0 %v14323_v4 }
 0x625   :  { %11122 = vmatprep.subr.bf16.mxu0 %v14249_v21 }
 0x628   :  { %11124 = vmatpush3.bf16.msra.mxu0 %v14324_v35 }
 0x629   :  { %11125 = vmatprep.subr.bf16.mxu0 %v14249_v21 }
 0x6de   :  { %v3672_v57 = vpop.f32.mrb[10].mxu0 }
 0x6df   :  { %v3676_v13 = vadd.f32 %v13048_v2, %v3672_v57  ;;  %v9138_v31 = vpop.f32.mrb[11].mxu0 }
 0x6e1   :  { %11835 = vtanh.f32 %v3676_v13 }
 0x6eb   :  { %v11836_v20 = vpop.eup %11835 }
 0x6ec   :  { %v13405_v59 = vand.u32 4294901760, %v11836_v20 }
 0x6ee   :  { %v3762_v40 = vsub.f32 %v11836_v20, %v13405_v59 }
 0x6f0   :  { %v3763_v46 = vand.u32 4294901760, %v3762_v40 }
 0x6f2   :  { %v3764_v55 = vsub.f32 %v3762_v40, %v3763_v46 }
 0x6f4   :  { %v3765_v37 = vand.u32 4294901760, %v3764_v55 }
 0x6f6   :  { %9172 = vmatmul.mubr.f32.vlgmr.msra.gmra.mrb[4].mxu1 %v3765_v37 }
 0x6f7   :  { %10983 = vmatpush3.bf16.msra.mxu1 %v14369_v12  ;;  %9206 = vmatprep.mubr.msk.f32.mxu1 %vm11946_vm0, %v14260_v1 }
 0x6f8   :  { %10984 = vmatprep.subr.bf16.mxu1 %v14249_v21 }
 0x6fb   :  { %10986 = vmatpush3.bf16.msra.mxu1 %v14370_v29 }
 0x6fc   :  { %10987 = vmatprep.subr.bf16.mxu1 %v14249_v21 }
 0x6ff   :  { %10989 = vmatpush3.bf16.msra.mxu1 %v14371_v45 }
 0x700   :  { %10990 = vmatprep.subr.bf16.mxu1 %v14249_v21 }
 0x703   :  { %10992 = vmatpush3.bf16.msra.mxu1 %v14372_v42 }
 0x704   :  { %10993 = vmatprep.subr.bf16.mxu1 %v14249_v21 }
 0x707   :  { %10995 = vmatpush3.bf16.msra.mxu1 %v14373_v3 }
 0x708   :  { %10996 = vmatprep.subr.bf16.mxu1 %v14249_v21 }
 0x70b   :  { %10998 = vmatpush3.bf16.msra.mxu1 %v14374_v15 }
 0x70c   :  { %10999 = vmatprep.subr.bf16.mxu1 %v14249_v21 }
 0x70f   :  { %11001 = vmatpush3.bf16.msra.mxu1 %v14375_v33 }
 0x710   :  { %11002 = vmatprep.subr.bf16.mxu1 %v14249_v21 }
 0x713   :  { %11004 = vmatpush3.bf16.msra.mxu1 %v14376_v47 }
 0x714   :  { %11005 = vmatprep.subr.bf16.mxu1 %v14249_v21 }
 0x716   :  { %9207 = vmatmul.mubr.f32.vlgmr.msra.gmra.mrb[4].mxu1 %v13405_v59 }
 0x717   :  { %11007 = vmatpush3.bf16.msra.mxu1 %v14377_v9  ;;  %9241 = vmatprep.mubr.msk.f32.mxu1 %vm11946_vm0, %v14260_v1 }
 0x718   :  { %11008 = vmatprep.subr.bf16.mxu1 %v14249_v21 }
 0x71b   :  { %11010 = vmatpush3.bf16.msra.mxu1 %v14378_v25 }
 0x71c   :  { %11011 = vmatprep.subr.bf16.mxu1 %v14249_v21 }
 0x71f   :  { %11013 = vmatpush3.bf16.msra.mxu1 %v14379_v43 }
 0x720   :  { %11014 = vmatprep.subr.bf16.mxu1 %v14249_v21 }
 0x723   :  { %11016 = vmatpush3.bf16.msra.mxu1 %v14380_v36 }
 0x724   :  { %11017 = vmatprep.subr.bf16.mxu1 %v14249_v21 }
 0x727   :  { %11019 = vmatpush3.bf16.msra.mxu1 %v14381_v52 }
 0x728   :  { %11020 = vmatprep.subr.bf16.mxu1 %v14249_v21 }
 0x72b   :  { %11022 = vmatpush3.bf16.msra.mxu1 %v14382_v51 }
 0x72c   :  { %11023 = vmatprep.subr.bf16.mxu1 %v14249_v21 }
 0x72f   :  { %11025 = vmatpush3.bf16.msra.mxu1 %v14383_v34 }
 0x730   :  { %11026 = vmatprep.subr.bf16.mxu1 %v14249_v21 }
 0x733   :  { %11028 = vmatpush3.bf16.msra.mxu1 %v14384_v60 }
 0x734   :  { %11029 = vmatprep.subr.bf16.mxu1 %v14249_v21 }
 0x736   :  { %9242 = vmatmul.mubr.f32.vlgmr.msra.gmra.mrb[4].mxu1 %v3762_v40 }
 0x737   :  { %11031 = vmatpush3.bf16.msra.mxu1 %v14317_v54  ;;  %9276 = vmatprep.mubr.msk.f32.mxu1 %vm11946_vm0, %v14260_v1 }
 0x738   :  { %11032 = vmatprep.subr.bf16.mxu1 %v14249_v21 }
 0x73b   :  { %11034 = vmatpush3.bf16.msra.mxu1 %v14318_v62 }
 0x73c   :  { %11035 = vmatprep.subr.bf16.mxu1 %v14249_v21 }
 0x73f   :  { %11037 = vmatpush3.bf16.msra.mxu1 %v14319_v63 }
 0x740   :  { %11038 = vmatprep.subr.bf16.mxu1 %v14249_v21 }
 0x743   :  { %11040 = vmatpush3.bf16.msra.mxu1 %v14320_v18 }
 0x744   :  { %11041 = vmatprep.subr.bf16.mxu1 %v14249_v21 }
 0x747   :  { %11043 = vmatpush3.bf16.msra.mxu1 %v14321_v22 }
 0x748   :  { %11044 = vmatprep.subr.bf16.mxu1 %v14249_v21 }
 0x74b   :  { %11046 = vmatpush3.bf16.msra.mxu1 %v14322_v23 }
 0x74c   :  { %11047 = vmatprep.subr.bf16.mxu1 %v14249_v21 }
 0x74f   :  { %11049 = vmatpush3.bf16.msra.mxu1 %v14323_v4 }
 0x750   :  { %11050 = vmatprep.subr.bf16.mxu1 %v14249_v21 }
 0x753   :  { %11052 = vmatpush3.bf16.msra.mxu1 %v14324_v35 }
 0x754   :  { %11053 = vmatprep.subr.bf16.mxu1 %v14249_v21 }
 0x756   :  { %9277 = vmatmul.mubr.f32.vlgmr.msra.gmra.mrb[4].mxu1 %v3763_v46 }
 0x757   :  { %11055 = vmatpush3.bf16.msra.mxu1 %v14385_v26  ;;  %9311 = vmatprep.mubr.msk.f32.mxu1 %vm11946_vm0, %v14260_v1 }
 0x758   :  { %11056 = vmatprep.subr.bf16.mxu1 %v14249_v21 }
 0x75b   :  { %11058 = vmatpush3.bf16.msra.mxu1 %v14386_v5 }
 0x75c   :  { %11059 = vmatprep.subr.bf16.mxu1 %v14249_v21 }
 0x75f   :  { %11061 = vmatpush3.bf16.msra.mxu1 %v14387_v7 }
 0x760   :  { %11062 = vmatprep.subr.bf16.mxu1 %v14249_v21 }
 0x763   :  { %11064 = vmatpush3.bf16.msra.mxu1 %v14329_v44 }
 0x764   :  { %11065 = vmatprep.subr.bf16.mxu1 %v14249_v21 }
 0x767   :  { %11067 = vmatpush3.bf16.msra.mxu1 %v14330_v6 }
 0x768   :  { %11068 = vmatprep.subr.bf16.mxu1 %v14249_v21 }
 0x76b   :  { %11070 = vmatpush3.bf16.msra.mxu1 %v14331_v38 }
 0x76c   :  { %11071 = vmatprep.subr.bf16.mxu1 %v14249_v21 }
 0x76f   :  { %11073 = vmatpush3.bf16.msra.mxu1 %v14333_v19 }
 0x770   :  { %11074 = vmatprep.subr.bf16.mxu1 %v14249_v21 }
 0x773   :  { %11076 = vmatpush3.bf16.msra.mxu1 %v14334_v11 }
 0x774   :  { %11077 = vmatprep.subr.bf16.mxu1 %v14249_v21 }
 0x776   :  { %9312 = vmatmul.mubr.f32.vlgmr.msra.gmra.mrb[4].mxu1 %v13405_v59 }
 0x777   :  { %11079 = vmatpush3.bf16.msra.mxu1 %v14317_v54  ;;  %9346 = vmatprep.mubr.msk.f32.mxu1 %vm11946_vm0, %v14260_v1 }
 0x778   :  { %11080 = vmatprep.subr.bf16.mxu1 %v14249_v21 }
 0x77b   :  { %11082 = vmatpush3.bf16.msra.mxu1 %v14318_v62 }
 0x77c   :  { %11083 = vmatprep.subr.bf16.mxu1 %v14249_v21 }
 0x77f   :  { %11085 = vmatpush3.bf16.msra.mxu1 %v14319_v63 }
 0x780   :  { %11086 = vmatprep.subr.bf16.mxu1 %v14249_v21 }
 0x783   :  { %11088 = vmatpush3.bf16.msra.mxu1 %v14320_v18 }
 0x784   :  { %11089 = vmatprep.subr.bf16.mxu1 %v14249_v21 }
 0x787   :  { %11091 = vmatpush3.bf16.msra.mxu1 %v14321_v22 }
 0x788   :  { %11092 = vmatprep.subr.bf16.mxu1 %v14249_v21 }
 0x78b   :  { %11094 = vmatpush3.bf16.msra.mxu1 %v14322_v23 }
 0x78c   :  { %11095 = vmatprep.subr.bf16.mxu1 %v14249_v21 }
 0x78f   :  { %11097 = vmatpush3.bf16.msra.mxu1 %v14323_v4 }
 0x790   :  { %11098 = vmatprep.subr.bf16.mxu1 %v14249_v21 }
 0x793   :  { %11100 = vmatpush3.bf16.msra.mxu1 %v14324_v35 }
 0x794   :  { %11245 = vmatprep.subr.bf16.mxu1 %v14249_v21 }
 0x796   :  { %9347 = vmatmul.mubr.f32.vlgmr.msra.gmra.mrb[4].mxu1 %v13405_v59 }
 0x797   :  { %11247 = vmatpush3.bf16.msra.mxu1 %v14317_v54  ;;  %9591 = vmatprep.mubr.msk.f32.mxu1 %vm11946_vm0, %v14260_v1 }
 0x798   :  { %11248 = vmatprep.subr.bf16.mxu1 %v14249_v21 }
 0x79b   :  { %11250 = vmatpush3.bf16.msra.mxu1 %v14318_v62 }
 0x79c   :  { %11251 = vmatprep.subr.bf16.mxu1 %v14249_v21 }
 0x79f   :  { %11253 = vmatpush3.bf16.msra.mxu1 %v14319_v63 }
 0x7a0   :  { %11254 = vmatprep.subr.bf16.mxu1 %v14249_v21 }
 0x7a3   :  { %11256 = vmatpush3.bf16.msra.mxu1 %v14320_v18 }
 0x7a4   :  { %11257 = vmatprep.subr.bf16.mxu1 %v14249_v21 }
 0x7a7   :  { %11259 = vmatpush3.bf16.msra.mxu1 %v14321_v22 }
 0x7a8   :  { %11260 = vmatprep.subr.bf16.mxu1 %v14249_v21 }
 0x7ab   :  { %11262 = vmatpush3.bf16.msra.mxu1 %v14322_v23 }
 0x7ac   :  { %11263 = vmatprep.subr.bf16.mxu1 %v14249_v21 }
 0x7af   :  { %11265 = vmatpush3.bf16.msra.mxu1 %v14323_v4 }
 0x7b0   :  { %11266 = vmatprep.subr.bf16.mxu1 %v14249_v21 }
 0x7b3   :  { %11268 = vmatpush3.bf16.msra.mxu1 %v14324_v35 }
 0x7b4   :  { %11269 = vmatprep.subr.bf16.mxu1 %v14249_v21 }
 0x869   :  { %v4317_v2 = vpop.f32.mrb[4].mxu1 }
 0x86a   :  { %v4321_v10 = vadd.f32 %v13054_v39, %v4317_v2  ;;  %v9348_v56 = vpop.f32.mrb[5].mxu1 }
 0x86c   :  { %11837 = vtanh.f32 %v4321_v10 }
 0x876   :  { %v11838_v14 = vpop.eup %11837 }
 0x877   :  { %v13520_v17 = vand.u32 4294901760, %v11838_v14 }
 0x879   :  { %v4407_v16 = vsub.f32 %v11838_v14, %v13520_v17 }
 0x87b   :  { %v4408_v8 = vand.u32 4294901760, %v4407_v16 }
 0x87d   :  { %v4409_v30 = vsub.f32 %v4407_v16, %v4408_v8 }
 0x87f   :  { %v4410_v53 = vand.u32 4294901760, %v4409_v30 }
 0x881   :  { %9382 = vmatmul.mubr.f32.vlgmr.msra.gmra.mrb[12].mxu0 %v4410_v53 }
 0x882   :  { %11127 = vmatpush3.bf16.msra.mxu0 %v14369_v12  ;;  %9416 = vmatprep.mubr.msk.f32.mxu0 %vm11946_vm0, %v14260_v1 }
 0x883   :  { %11128 = vmatprep.subr.bf16.mxu0 %v14249_v21 }
 0x886   :  { %11130 = vmatpush3.bf16.msra.mxu0 %v14370_v29 }
 0x887   :  { %11131 = vmatprep.subr.bf16.mxu0 %v14249_v21 }
 0x88a   :  { %11133 = vmatpush3.bf16.msra.mxu0 %v14371_v45 }
 0x88b   :  { %11134 = vmatprep.subr.bf16.mxu0 %v14249_v21 }
 0x88e   :  { %11136 = vmatpush3.bf16.msra.mxu0 %v14372_v42 }
 0x88f   :  { %11137 = vmatprep.subr.bf16.mxu0 %v14249_v21 }
 0x892   :  { %11139 = vmatpush3.bf16.msra.mxu0 %v14373_v3 }
 0x893   :  { %11140 = vmatprep.subr.bf16.mxu0 %v14249_v21 }
 0x896   :  { %11142 = vmatpush3.bf16.msra.mxu0 %v14374_v15 }
 0x897   :  { %11143 = vmatprep.subr.bf16.mxu0 %v14249_v21 }
 0x89a   :  { %11145 = vmatpush3.bf16.msra.mxu0 %v14375_v33 }
 0x89b   :  { %11146 = vmatprep.subr.bf16.mxu0 %v14249_v21 }
 0x89e   :  { %11148 = vmatpush3.bf16.msra.mxu0 %v14376_v47 }
 0x89f   :  { %11149 = vmatprep.subr.bf16.mxu0 %v14249_v21 }
 0x8a1   :  { %9417 = vmatmul.mubr.f32.vlgmr.msra.gmra.mrb[12].mxu0 %v13520_v17 }
 0x8a2   :  { %11151 = vmatpush3.bf16.msra.mxu0 %v14377_v9  ;;  %9451 = vmatprep.mubr.msk.f32.mxu0 %vm11946_vm0, %v14260_v1 }
 0x8a3   :  { %11152 = vmatprep.subr.bf16.mxu0 %v14249_v21 }
 0x8a6   :  { %11154 = vmatpush3.bf16.msra.mxu0 %v14378_v25 }
 0x8a7   :  { %11155 = vmatprep.subr.bf16.mxu0 %v14249_v21 }
 0x8aa   :  { %11157 = vmatpush3.bf16.msra.mxu0 %v14379_v43 }
 0x8ab   :  { %11158 = vmatprep.subr.bf16.mxu0 %v14249_v21 }
 0x8ae   :  { %11160 = vmatpush3.bf16.msra.mxu0 %v14380_v36 }
 0x8af   :  { %11161 = vmatprep.subr.bf16.mxu0 %v14249_v21 }
 0x8b2   :  { %11163 = vmatpush3.bf16.msra.mxu0 %v14381_v52 }
 0x8b3   :  { %11164 = vmatprep.subr.bf16.mxu0 %v14249_v21 }
 0x8b6   :  { %11166 = vmatpush3.bf16.msra.mxu0 %v14382_v51 }
 0x8b7   :  { %11167 = vmatprep.subr.bf16.mxu0 %v14249_v21 }
 0x8ba   :  { %11169 = vmatpush3.bf16.msra.mxu0 %v14383_v34 }
 0x8bb   :  { %11170 = vmatprep.subr.bf16.mxu0 %v14249_v21 }
 0x8be   :  { %11172 = vmatpush3.bf16.msra.mxu0 %v14384_v60 }
 0x8bf   :  { %11173 = vmatprep.subr.bf16.mxu0 %v14249_v21 }
 0x8c1   :  { %9452 = vmatmul.mubr.f32.vlgmr.msra.gmra.mrb[12].mxu0 %v4407_v16  ;;  %v6272_v16 = vld [vmem:[#allocation8 + $0x70] sm:$0xff] }
 0x8c2   :  { %11175 = vmatpush3.bf16.msra.mxu0 %v14317_v54  ;;  %9486 = vmatprep.mubr.msk.f32.mxu0 %vm11946_vm0, %v14260_v1 }
 0x8c3   :  { %11176 = vmatprep.subr.bf16.mxu0 %v14249_v21 }
 0x8c6   :  { %11178 = vmatpush3.bf16.msra.mxu0 %v14318_v62 }
 0x8c7   :  { %11179 = vmatprep.subr.bf16.mxu0 %v14249_v21 }
 0x8ca   :  { %11181 = vmatpush3.bf16.msra.mxu0 %v14319_v63 }
 0x8cb   :  { %11182 = vmatprep.subr.bf16.mxu0 %v14249_v21 }
 0x8ce   :  { %11184 = vmatpush3.bf16.msra.mxu0 %v14320_v18 }
 0x8cf   :  { %11185 = vmatprep.subr.bf16.mxu0 %v14249_v21 }
 0x8d2   :  { %11187 = vmatpush3.bf16.msra.mxu0 %v14321_v22 }
 0x8d3   :  { %11188 = vmatprep.subr.bf16.mxu0 %v14249_v21 }
 0x8d6   :  { %11190 = vmatpush3.bf16.msra.mxu0 %v14322_v23 }
 0x8d7   :  { %11191 = vmatprep.subr.bf16.mxu0 %v14249_v21 }
 0x8da   :  { %11193 = vmatpush3.bf16.msra.mxu0 %v14323_v4 }
 0x8db   :  { %11194 = vmatprep.subr.bf16.mxu0 %v14249_v21 }
 0x8de   :  { %11196 = vmatpush3.bf16.msra.mxu0 %v14324_v35 }
 0x8df   :  { %11197 = vmatprep.subr.bf16.mxu0 %v14249_v21 }
 0x8e1   :  { %9487 = vmatmul.mubr.f32.vlgmr.msra.gmra.mrb[12].mxu0 %v4408_v8  ;;  %v6273_v8 = vld [vmem:[#allocation8 + $0x78] sm:$0xff] }
 0x8e2   :  { %11199 = vmatpush3.bf16.msra.mxu0 %v14385_v26  ;;  %9521 = vmatprep.mubr.msk.f32.mxu0 %vm11946_vm0, %v14260_v1 }
 0x8e3   :  { %11200 = vmatprep.subr.bf16.mxu0 %v14249_v21 }
 0x8e6   :  { %11202 = vmatpush3.bf16.msra.mxu0 %v14386_v5 }
 0x8e7   :  { %11203 = vmatprep.subr.bf16.mxu0 %v14249_v21 }
 0x8ea   :  { %11205 = vmatpush3.bf16.msra.mxu0 %v14387_v7 }
 0x8eb   :  { %11206 = vmatprep.subr.bf16.mxu0 %v14249_v21 }
 0x8ee   :  { %11208 = vmatpush3.bf16.msra.mxu0 %v14329_v44 }
 0x8ef   :  { %11209 = vmatprep.subr.bf16.mxu0 %v14249_v21 }
 0x8f2   :  { %11211 = vmatpush3.bf16.msra.mxu0 %v14330_v6 }
 0x8f3   :  { %11212 = vmatprep.subr.bf16.mxu0 %v14249_v21 }
 0x8f6   :  { %11214 = vmatpush3.bf16.msra.mxu0 %v14331_v38 }
 0x8f7   :  { %11215 = vmatprep.subr.bf16.mxu0 %v14249_v21 }
 0x8fa   :  { %11217 = vmatpush3.bf16.msra.mxu0 %v14333_v19 }
 0x8fb   :  { %11218 = vmatprep.subr.bf16.mxu0 %v14249_v21 }
 0x8fe   :  { %11220 = vmatpush3.bf16.msra.mxu0 %v14334_v11 }
 0x8ff   :  { %11221 = vmatprep.subr.bf16.mxu0 %v14249_v21 }
 0x901   :  { %9522 = vmatmul.mubr.f32.vlgmr.msra.gmra.mrb[12].mxu0 %v13520_v17 }
 0x902   :  { %11223 = vmatpush3.bf16.msra.mxu0 %v14317_v54  ;;  %9556 = vmatprep.mubr.msk.f32.mxu0 %vm11946_vm0, %v14260_v1 }
 0x903   :  { %11224 = vmatprep.subr.bf16.mxu0 %v14249_v21 }
 0x906   :  { %11226 = vmatpush3.bf16.msra.mxu0 %v14318_v62 }
 0x907   :  { %11227 = vmatprep.subr.bf16.mxu0 %v14249_v21 }
 0x90a   :  { %11229 = vmatpush3.bf16.msra.mxu0 %v14319_v63 }
 0x90b   :  { %11230 = vmatprep.subr.bf16.mxu0 %v14249_v21 }
 0x90e   :  { %11232 = vmatpush3.bf16.msra.mxu0 %v14320_v18 }
 0x90f   :  { %11233 = vmatprep.subr.bf16.mxu0 %v14249_v21 }
 0x912   :  { %11235 = vmatpush3.bf16.msra.mxu0 %v14321_v22 }
 0x913   :  { %11236 = vmatprep.subr.bf16.mxu0 %v14249_v21 }
 0x916   :  { %11238 = vmatpush3.bf16.msra.mxu0 %v14322_v23 }
 0x917   :  { %11239 = vmatprep.subr.bf16.mxu0 %v14249_v21 }
 0x91a   :  { %11241 = vmatpush3.bf16.msra.mxu0 %v14323_v4 }
 0x91b   :  { %11242 = vmatprep.subr.bf16.mxu0 %v14249_v21 }
 0x91e   :  { %11244 = vmatpush3.bf16.msra.mxu0 %v14324_v35 }
 0x91f   :  { %11389 = vmatprep.subr.bf16.mxu0 %v14249_v21 }
 0x921   :  { %9557 = vmatmul.mubr.f32.vlgmr.msra.gmra.mrb[12].mxu0 %v13520_v17 }
 0x922   :  { %11391 = vmatpush3.bf16.msra.mxu0 %v14317_v54  ;;  %9801 = vmatprep.mubr.msk.f32.mxu0 %vm11946_vm0, %v14260_v1 }
 0x923   :  { %11392 = vmatprep.subr.bf16.mxu0 %v14249_v21 }
 0x926   :  { %11394 = vmatpush3.bf16.msra.mxu0 %v14318_v62 }
 0x927   :  { %11395 = vmatprep.subr.bf16.mxu0 %v14249_v21 }
 0x92a   :  { %11397 = vmatpush3.bf16.msra.mxu0 %v14319_v63 }
 0x92b   :  { %11398 = vmatprep.subr.bf16.mxu0 %v14249_v21 }
 0x92e   :  { %11400 = vmatpush3.bf16.msra.mxu0 %v14320_v18 }
 0x92f   :  { %11401 = vmatprep.subr.bf16.mxu0 %v14249_v21 }
 0x932   :  { %11403 = vmatpush3.bf16.msra.mxu0 %v14321_v22 }
 0x933   :  { %11404 = vmatprep.subr.bf16.mxu0 %v14249_v21 }
 0x936   :  { %11406 = vmatpush3.bf16.msra.mxu0 %v14322_v23 }
 0x937   :  { %11407 = vmatprep.subr.bf16.mxu0 %v14249_v21 }
 0x93a   :  { %11409 = vmatpush3.bf16.msra.mxu0 %v14323_v4 }
 0x93b   :  { %11410 = vmatprep.subr.bf16.mxu0 %v14249_v21 }
 0x93e   :  { %11412 = vmatpush3.bf16.msra.mxu0 %v14324_v35 }
 0x93f   :  { %11413 = vmatprep.subr.bf16.mxu0 %v14249_v21 }
 0x9f4   :  { %v4962_v39 = vpop.f32.mrb[12].mxu0 }
 0x9f5   :  { %v4966_v41 = vadd.f32 %v13052_v27, %v4962_v39  ;;  %v9558_v48 = vpop.f32.mrb[13].mxu0 }
 0x9f7   :  { %11839 = vtanh.f32 %v4966_v41 }
 0xa01   :  { %v11840_v58 = vpop.eup %11839 }
 0xa02   :  { %v13635_v32 = vand.u32 4294901760, %v11840_v58 }
 0xa04   :  { %v5052_v50 = vsub.f32 %v11840_v58, %v13635_v32 }
 0xa06   :  { %v5053_v0 = vand.u32 4294901760, %v5052_v50 }
 0xa08   :  { %v5054_v28 = vsub.f32 %v5052_v50, %v5053_v0 }
 0xa0a   :  { %v5055_v24 = vand.u32 4294901760, %v5054_v28 }
 0xa0c   :  { %9592 = vmatmul.mubr.f32.vlgmr.msra.gmra.mrb[6].mxu1 %v5055_v24  ;;  %v6324_v24 = vand.u32 4294901760, %v6272_v16 }
 0xa0d   :  { %11271 = vmatpush3.bf16.msra.mxu1 %v14369_v12  ;;  %9626 = vmatprep.mubr.msk.f32.mxu1 %vm11946_vm0, %v14260_v1 }
 0xa0e   :  { %11272 = vmatprep.subr.bf16.mxu1 %v14249_v21 }
 0xa11   :  { %11274 = vmatpush3.bf16.msra.mxu1 %v14370_v29 }
 0xa12   :  { %11275 = vmatprep.subr.bf16.mxu1 %v14249_v21 }
 0xa15   :  { %11277 = vmatpush3.bf16.msra.mxu1 %v14371_v45 }
 0xa16   :  { %11278 = vmatprep.subr.bf16.mxu1 %v14249_v21 }
 0xa19   :  { %11280 = vmatpush3.bf16.msra.mxu1 %v14372_v42 }
 0xa1a   :  { %11281 = vmatprep.subr.bf16.mxu1 %v14249_v21 }
 0xa1d   :  { %11283 = vmatpush3.bf16.msra.mxu1 %v14373_v3 }
 0xa1e   :  { %11284 = vmatprep.subr.bf16.mxu1 %v14249_v21 }
 0xa21   :  { %11286 = vmatpush3.bf16.msra.mxu1 %v14374_v15 }
 0xa22   :  { %11287 = vmatprep.subr.bf16.mxu1 %v14249_v21 }
 0xa25   :  { %11289 = vmatpush3.bf16.msra.mxu1 %v14375_v33 }
 0xa26   :  { %11290 = vmatprep.subr.bf16.mxu1 %v14249_v21 }
 0xa29   :  { %11292 = vmatpush3.bf16.msra.mxu1 %v14376_v47 }
 0xa2a   :  { %11293 = vmatprep.subr.bf16.mxu1 %v14249_v21 }
 0xa2c   :  { %9627 = vmatmul.mubr.f32.vlgmr.msra.gmra.mrb[6].mxu1 %v13635_v32 }
 0xa2d   :  { %11295 = vmatpush3.bf16.msra.mxu1 %v14377_v9  ;;  %9661 = vmatprep.mubr.msk.f32.mxu1 %vm11946_vm0, %v14260_v1 }
 0xa2e   :  { %11296 = vmatprep.subr.bf16.mxu1 %v14249_v21 }
 0xa31   :  { %11298 = vmatpush3.bf16.msra.mxu1 %v14378_v25 }
 0xa32   :  { %11299 = vmatprep.subr.bf16.mxu1 %v14249_v21 }
 0xa35   :  { %11301 = vmatpush3.bf16.msra.mxu1 %v14379_v43 }
 0xa36   :  { %11302 = vmatprep.subr.bf16.mxu1 %v14249_v21 }
 0xa39   :  { %11304 = vmatpush3.bf16.msra.mxu1 %v14380_v36 }
 0xa3a   :  { %11305 = vmatprep.subr.bf16.mxu1 %v14249_v21 }
 0xa3d   :  { %11307 = vmatpush3.bf16.msra.mxu1 %v14381_v52 }
 0xa3e   :  { %11308 = vmatprep.subr.bf16.mxu1 %v14249_v21 }
 0xa41   :  { %11310 = vmatpush3.bf16.msra.mxu1 %v14382_v51 }
 0xa42   :  { %11311 = vmatprep.subr.bf16.mxu1 %v14249_v21 }
 0xa45   :  { %11313 = vmatpush3.bf16.msra.mxu1 %v14383_v34 }
 0xa46   :  { %11314 = vmatprep.subr.bf16.mxu1 %v14249_v21 }
 0xa49   :  { %11316 = vmatpush3.bf16.msra.mxu1 %v14384_v60 }
 0xa4a   :  { %11317 = vmatprep.subr.bf16.mxu1 %v14249_v21 }
 0xa4c   :  { %9662 = vmatmul.mubr.f32.vlgmr.msra.gmra.mrb[6].mxu1 %v5052_v50 }
 0xa4d   :  { %11319 = vmatpush3.bf16.msra.mxu1 %v14317_v54  ;;  %9696 = vmatprep.mubr.msk.f32.mxu1 %vm11946_vm0, %v14260_v1 }
 0xa4e   :  { %11320 = vmatprep.subr.bf16.mxu1 %v14249_v21 }
 0xa51   :  { %11322 = vmatpush3.bf16.msra.mxu1 %v14318_v62 }
 0xa52   :  { %11323 = vmatprep.subr.bf16.mxu1 %v14249_v21 }
 0xa55   :  { %11325 = vmatpush3.bf16.msra.mxu1 %v14319_v63 }
 0xa56   :  { %11326 = vmatprep.subr.bf16.mxu1 %v14249_v21 }
 0xa59   :  { %11328 = vmatpush3.bf16.msra.mxu1 %v14320_v18 }
 0xa5a   :  { %11329 = vmatprep.subr.bf16.mxu1 %v14249_v21 }
 0xa5d   :  { %11331 = vmatpush3.bf16.msra.mxu1 %v14321_v22 }
 0xa5e   :  { %11332 = vmatprep.subr.bf16.mxu1 %v14249_v21 }
 0xa61   :  { %11334 = vmatpush3.bf16.msra.mxu1 %v14322_v23 }
 0xa62   :  { %11335 = vmatprep.subr.bf16.mxu1 %v14249_v21 }
 0xa65   :  { %11337 = vmatpush3.bf16.msra.mxu1 %v14323_v4 }
 0xa66   :  { %11338 = vmatprep.subr.bf16.mxu1 %v14249_v21 }
 0xa69   :  { %11340 = vmatpush3.bf16.msra.mxu1 %v14324_v35 }
 0xa6a   :  { %11341 = vmatprep.subr.bf16.mxu1 %v14249_v21 }
 0xa6c   :  { %9697 = vmatmul.mubr.f32.vlgmr.msra.gmra.mrb[6].mxu1 %v5053_v0 }
 0xa6d   :  { %11343 = vmatpush3.bf16.msra.mxu1 %v14385_v26  ;;  %9731 = vmatprep.mubr.msk.f32.mxu1 %vm11946_vm0, %v14260_v1 }
 0xa6e   :  { %11344 = vmatprep.subr.bf16.mxu1 %v14249_v21 }
 0xa71   :  { %11346 = vmatpush3.bf16.msra.mxu1 %v14386_v5 }
 0xa72   :  { %11347 = vmatprep.subr.bf16.mxu1 %v14249_v21 }
 0xa75   :  { %11349 = vmatpush3.bf16.msra.mxu1 %v14387_v7 }
 0xa76   :  { %11350 = vmatprep.subr.bf16.mxu1 %v14249_v21 }
 0xa79   :  { %11352 = vmatpush3.bf16.msra.mxu1 %v14329_v44 }
 0xa7a   :  { %11353 = vmatprep.subr.bf16.mxu1 %v14249_v21 }
 0xa7d   :  { %11355 = vmatpush3.bf16.msra.mxu1 %v14330_v6 }
 0xa7e   :  { %11356 = vmatprep.subr.bf16.mxu1 %v14249_v21 }
 0xa81   :  { %11358 = vmatpush3.bf16.msra.mxu1 %v14331_v38 }
 0xa82   :  { %11359 = vmatprep.subr.bf16.mxu1 %v14249_v21 }
 0xa85   :  { %11361 = vmatpush3.bf16.msra.mxu1 %v14333_v19 }
 0xa86   :  { %11362 = vmatprep.subr.bf16.mxu1 %v14249_v21 }
 0xa89   :  { %11364 = vmatpush3.bf16.msra.mxu1 %v14334_v11 }
 0xa8a   :  { %11365 = vmatprep.subr.bf16.mxu1 %v14249_v21 }
 0xa8c   :  { %9732 = vmatmul.mubr.f32.vlgmr.msra.gmra.mrb[6].mxu1 %v13635_v32 }
 0xa8d   :  { %11367 = vmatpush3.bf16.msra.mxu1 %v14317_v54  ;;  %9766 = vmatprep.mubr.msk.f32.mxu1 %vm11946_vm0, %v14260_v1 }
 0xa8e   :  { %11368 = vmatprep.subr.bf16.mxu1 %v14249_v21 }
 0xa91   :  { %11370 = vmatpush3.bf16.msra.mxu1 %v14318_v62 }
 0xa92   :  { %11371 = vmatprep.subr.bf16.mxu1 %v14249_v21 }
 0xa95   :  { %11373 = vmatpush3.bf16.msra.mxu1 %v14319_v63 }
 0xa96   :  { %11374 = vmatprep.subr.bf16.mxu1 %v14249_v21 }
 0xa99   :  { %11376 = vmatpush3.bf16.msra.mxu1 %v14320_v18 }
 0xa9a   :  { %11377 = vmatprep.subr.bf16.mxu1 %v14249_v21 }
 0xa9d   :  { %11379 = vmatpush3.bf16.msra.mxu1 %v14321_v22 }
 0xa9e   :  { %11380 = vmatprep.subr.bf16.mxu1 %v14249_v21 }
 0xaa1   :  { %11382 = vmatpush3.bf16.msra.mxu1 %v14322_v23 }
 0xaa2   :  { %11383 = vmatprep.subr.bf16.mxu1 %v14249_v21 }
 0xaa5   :  { %11385 = vmatpush3.bf16.msra.mxu1 %v14323_v4 }
 0xaa6   :  { %11386 = vmatprep.subr.bf16.mxu1 %v14249_v21 }
 0xaa9   :  { %11388 = vmatpush3.bf16.msra.mxu1 %v14324_v35 }
 0xaaa   :  { %11533 = vmatprep.subr.bf16.mxu1 %v14249_v21 }
 0xaac   :  { %9767 = vmatmul.mubr.f32.vlgmr.msra.gmra.mrb[6].mxu1 %v13635_v32 }
 0xaad   :  { %10011 = vmatprep.mubr.msk.f32.mxu1 %vm11946_vm0, %v14260_v1 }
 0xb7f   :  { %v5607_v27 = vpop.f32.mrb[6].mxu1 }
 0xb80   :  { %v5611_v57 = vadd.f32 %v13058_v49, %v5607_v27  ;;  %v9768_v13 = vpop.f32.mrb[7].mxu1  ;;  %v6258_v49 = vld [vmem:[#allocation8] sm:$0xff]  ;;  %v6327_v27 = vand.u32 4294901760, %v6273_v8 }
 0xb82   :  { %11841 = vtanh.f32 %v5611_v57 }
 0xb8c   :  { %v11842_v31 = vpop.eup %11841 }
 0xb8d   :  { %v13734_v20 = vand.u32 4294901760, %v11842_v31 }
 0xb8f   :  { %v13737_v59 = vsub.f32 %v11842_v31, %v13734_v20  ;;  %v13896_v31 = vpack.c.bf16 %v6327_v27, %v6324_v24 }
 0xb91   :  { %v5698_v40 = vand.u32 4294901760, %v13737_v59 }
 0xb93   :  { %v5699_v46 = vsub.f32 %v13737_v59, %v5698_v40 }
 0xb95   :  { %v5700_v55 = vand.u32 4294901760, %v5699_v46 }
 0xb97   :  { %9802 = vmatmul.mubr.f32.vlgmr.msra.gmra.mrb[14].mxu0 %v5700_v55 }
 0xb98   :  { %11415 = vmatpush3.bf16.msra.mxu0 %v14369_v12  ;;  %9836 = vmatprep.mubr.msk.f32.mxu0 %vm11946_vm0, %v14260_v1  ;;  %v6259_v12 = vld [vmem:[#allocation8 + $0x8] sm:$0xff] }
 0xb99   :  { %11416 = vmatprep.subr.bf16.mxu0 %v14249_v21 }
 0xb9c   :  { %11418 = vmatpush3.bf16.msra.mxu0 %v14370_v29  ;;  %v6260_v29 = vld [vmem:[#allocation8 + $0x10] sm:$0xff] }
 0xb9d   :  { %11419 = vmatprep.subr.bf16.mxu0 %v14249_v21 }
 0xba0   :  { %11421 = vmatpush3.bf16.msra.mxu0 %v14371_v45  ;;  %v6282_v45 = vand.u32 4294901760, %v6258_v49 }
 0xba1   :  { %11422 = vmatprep.subr.bf16.mxu0 %v14249_v21 }
 0xba2   :  { %v13768_v37 = vsub.f32 %v6258_v49, %v6282_v45 }
 0xba4   :  { %11424 = vmatpush3.bf16.msra.mxu0 %v14372_v42  ;;  %v6285_v42 = vand.u32 4294901760, %v6259_v12  ;;  %v6375_v57 = vand.u32 4294901760, %v13768_v37 }
 0xba5   :  { %11425 = vmatprep.subr.bf16.mxu0 %v14249_v21 }
 0xba6   :  { %v13770_v2 = vsub.f32 %v6259_v12, %v6285_v42 }
 0xba8   :  { %11427 = vmatpush3.bf16.msra.mxu0 %v14373_v3  ;;  %v6261_v3 = vld [vmem:[#allocation8 + $0x18] sm:$0xff]  ;;  %v6382_v13 = vand.u32 4294901760, %v13770_v2 }
 0xba9   :  { %11428 = vmatprep.subr.bf16.mxu0 %v14249_v21 }
 0xbaa   :  { %v6383_v46 = vsub.f32 %v13770_v2, %v6382_v13 }
 0xbac   :  { %11430 = vmatpush3.bf16.msra.mxu0 %v14374_v15  ;;  %v6288_v15 = vand.u32 4294901760, %v6260_v29 }
 0xbad   :  { %11431 = vmatprep.subr.bf16.mxu0 %v14249_v21 }
 0xbae   :  { %v13772_v10 = vsub.f32 %v6260_v29, %v6288_v15  ;;  %v6384_v29 = vand.u32 4294901760, %v6383_v46 }
 0xbb0   :  { %11433 = vmatpush3.bf16.msra.mxu0 %v14375_v33  ;;  %v6291_v33 = vand.u32 4294901760, %v6261_v3  ;;  %v6389_v55 = vand.u32 4294901760, %v13772_v10 }
 0xbb1   :  { %11434 = vmatprep.subr.bf16.mxu0 %v14249_v21 }
 0xbb2   :  { %v13774_v56 = vsub.f32 %v6261_v3, %v6291_v33 }
 0xbb4   :  { %11436 = vmatpush3.bf16.msra.mxu0 %v14376_v47  ;;  %v13766_v47 = vpack.c.bf16 %v6285_v42, %v6282_v45  ;;  %v6396_v49 = vand.u32 4294901760, %v13774_v56  ;;  %v6390_v45 = vsub.f32 %v13772_v10, %v6389_v55 }
 0xbb5   :  { %11437 = vmatprep.subr.bf16.mxu0 %v14249_v21 }
 0xbb6   :  { %11535 = vmatpush3.bf16.msra.mxu1 %v13766_v47  ;;  %v6397_v42 = vsub.f32 %v13774_v56, %v6396_v49 }
 0xbb7   :  { %9837 = vmatmul.mubr.f32.vlgmr.msra.gmra.mrb[14].mxu0 %v13734_v20  ;;  %11536 = vmatprep.subr.bf16.mxu1 %v14249_v21 }
 0xbb8   :  { %11439 = vmatpush3.bf16.msra.mxu0 %v14377_v9  ;;  %9871 = vmatprep.mubr.msk.f32.mxu0 %vm11946_vm0, %v14260_v1  ;;  %v13778_v9 = vpack.c.bf16 %v6291_v33, %v6288_v15  ;;  %v6391_v15 = vand.u32 4294901760, %v6390_v45  ;;  %v6398_v33 = vand.u32 4294901760, %v6397_v42 }
 0xbb9   :  { %11440 = vmatprep.subr.bf16.mxu0 %v14249_v21 }
 0xbba   :  { %11538 = vmatpush3.bf16.msra.mxu1 %v13778_v9 }
 0xbbb   :  { %11539 = vmatprep.subr.bf16.mxu1 %v14249_v21 }
 0xbbc   :  { %11442 = vmatpush3.bf16.msra.mxu0 %v14378_v25 }
 0xbbd   :  { %11443 = vmatprep.subr.bf16.mxu0 %v14249_v21 }
 0xbc0   :  { %11445 = vmatpush3.bf16.msra.mxu0 %v14379_v43 }
 0xbc1   :  { %11446 = vmatprep.subr.bf16.mxu0 %v14249_v21 }
 0xbc4   :  { %11448 = vmatpush3.bf16.msra.mxu0 %v14380_v36  ;;  %v6268_v36 = vld [vmem:[#allocation8 + $0x50] sm:$0xff] }
 0xbc5   :  { %11449 = vmatprep.subr.bf16.mxu0 %v14249_v21 }
 0xbc8   :  { %11451 = vmatpush3.bf16.msra.mxu0 %v14381_v52  ;;  %v6269_v52 = vld [vmem:[#allocation8 + $0x58] sm:$0xff] }
 0xbc9   :  { %11452 = vmatprep.subr.bf16.mxu0 %v14249_v21 }
 0xbcc   :  { %11454 = vmatpush3.bf16.msra.mxu0 %v14382_v51  ;;  %v6312_v51 = vand.u32 4294901760, %v6268_v36 }
 0xbcd   :  { %11455 = vmatprep.subr.bf16.mxu0 %v14249_v21 }
 0xbce   :  { %v13885_v32 = vsub.f32 %v6268_v36, %v6312_v51 }
 0xbd0   :  { %11457 = vmatpush3.bf16.msra.mxu0 %v14383_v34  ;;  %v6315_v34 = vand.u32 4294901760, %v6269_v52 }
 0xbd1   :  { %11458 = vmatprep.subr.bf16.mxu0 %v14249_v21 }
 0xbd2   :  { %v13887_v50 = vsub.f32 %v6269_v52, %v6315_v34 }
 0xbd4   :  { %11460 = vmatpush3.bf16.msra.mxu0 %v14384_v60  ;;  %v13866_v60 = vpack.c.bf16 %v6315_v34, %v6312_v51 }
 0xbd5   :  { %11461 = vmatprep.subr.bf16.mxu0 %v14249_v21 }
 0xbd7   :  { %9872 = vmatmul.mubr.f32.vlgmr.msra.gmra.mrb[14].mxu0 %v13737_v59  ;;  %v13900_v59 = vsub.f32 %v6273_v8, %v6327_v27  ;;  %v6445_v8 = vand.u32 4294901760, %v13885_v32 }
 0xbd8   :  { %11463 = vmatpush3.bf16.msra.mxu0 %v14317_v54  ;;  %9906 = vmatprep.mubr.msk.f32.mxu0 %vm11946_vm0, %v14260_v1 }
 0xbd9   :  { %11464 = vmatprep.subr.bf16.mxu0 %v14249_v21 }
 0xbdc   :  { %11466 = vmatpush3.bf16.msra.mxu0 %v14318_v62 }
 0xbdd   :  { %11467 = vmatprep.subr.bf16.mxu0 %v14249_v21 }
 0xbe0   :  { %11469 = vmatpush3.bf16.msra.mxu0 %v14319_v63 }
 0xbe1   :  { %11470 = vmatprep.subr.bf16.mxu0 %v14249_v21 }
 0xbe4   :  { %11472 = vmatpush3.bf16.msra.mxu0 %v14320_v18 }
 0xbe5   :  { %11473 = vmatprep.subr.bf16.mxu0 %v14249_v21 }
 0xbe8   :  { %11475 = vmatpush3.bf16.msra.mxu0 %v14321_v22 }
 0xbe9   :  { %11476 = vmatprep.subr.bf16.mxu0 %v14249_v21 }
 0xbec   :  { %11478 = vmatpush3.bf16.msra.mxu0 %v14322_v23 }
 0xbed   :  { %11479 = vmatprep.subr.bf16.mxu0 %v14249_v21 }
 0xbf0   :  { %11481 = vmatpush3.bf16.msra.mxu0 %v14323_v4 }
 0xbf1   :  { %11482 = vmatprep.subr.bf16.mxu0 %v14249_v21 }
 0xbf4   :  { %11484 = vmatpush3.bf16.msra.mxu0 %v14324_v35 }
 0xbf5   :  { %11485 = vmatprep.subr.bf16.mxu0 %v14249_v21 }
 0xbf7   :  { %9907 = vmatmul.mubr.f32.vlgmr.msra.gmra.mrb[14].mxu0 %v5698_v40  ;;  %v6376_v40 = vsub.f32 %v13768_v37, %v6375_v57 }
 0xbf8   :  { %11487 = vmatpush3.bf16.msra.mxu0 %v14385_v26  ;;  %9941 = vmatprep.mubr.msk.f32.mxu0 %vm11946_vm0, %v14260_v1  ;;  %v6270_v26 = vld [vmem:[#allocation8 + $0x60] sm:$0xff] }
 0xbf9   :  { %11488 = vmatprep.subr.bf16.mxu0 %v14249_v21  ;;  %v6377_v12 = vand.u32 4294901760, %v6376_v40  ;;  %v6446_v40 = vsub.f32 %v13885_v32, %v6445_v8 }
 0xbfb   :  { %v13918_v3 = vpack.c.bf16 %v6384_v29, %v6377_v12  ;;  %v6447_v12 = vand.u32 4294901760, %v6446_v40  ;;  %v11585_v40 = vpack.c.bf16 %v13774_v56, %v13772_v10 }
 0xbfc   :  { %11490 = vmatpush3.bf16.msra.mxu0 %v14386_v5  ;;  %v6271_v5 = vld [vmem:[#allocation8 + $0x68] sm:$0xff] }
 0xbfd   :  { %11491 = vmatprep.subr.bf16.mxu0 %v14249_v21  ;;  %v6321_v14 = vand.u32 4294901760, %v6271_v5 }
 0xbff   :  { %v13892_v28 = vsub.f32 %v6271_v5, %v6321_v14 }
 0xc00   :  { %11493 = vmatpush3.bf16.msra.mxu0 %v14387_v7  ;;  %v6318_v7 = vand.u32 4294901760, %v6270_v26 }
 0xc01   :  { %11494 = vmatprep.subr.bf16.mxu0 %v14249_v21  ;;  %v14223_v42 = vand.u32 4294901760, %v13892_v28 }
 0xc02   :  { %v13870_v17 = vpack.c.bf16 %v6321_v14, %v6318_v7  ;;  %v13890_v0 = vsub.f32 %v6270_v26, %v6318_v7 }
 0xc04   :  { %11496 = vmatpush3.bf16.msra.mxu0 %v14329_v44  ;;  %v14224_v45 = vand.u32 4294901760, %v13890_v0 }
 0xc05   :  { %11497 = vmatprep.subr.bf16.mxu0 %v14249_v21 }
 0xc08   :  { %11499 = vmatpush3.bf16.msra.mxu0 %v14330_v6  ;;  %v6265_v6 = vld [vmem:[#allocation8 + $0x38] sm:$0xff] }
 0xc09   :  { %11500 = vmatprep.subr.bf16.mxu0 %v14249_v21 }
 0xc0c   :  { %11502 = vmatpush3.bf16.msra.mxu0 %v14331_v38  ;;  %v6303_v38 = vand.u32 4294901760, %v6265_v6 }
 0xc0d   :  { %11503 = vmatprep.subr.bf16.mxu0 %v14249_v21 }
 0xc0e   :  { %v13878_v41 = vsub.f32 %v6265_v6, %v6303_v38 }
 0xc10   :  { %11505 = vmatpush3.bf16.msra.mxu0 %v14333_v19  ;;  %v6266_v19 = vld [vmem:[#allocation8 + $0x40] sm:$0xff] }
 0xc11   :  { %11506 = vmatprep.subr.bf16.mxu0 %v14249_v21 }
 0xc14   :  { %11508 = vmatpush3.bf16.msra.mxu0 %v14334_v11  ;;  %v6306_v11 = vand.u32 4294901760, %v6266_v19 }
 0xc15   :  { %11509 = vmatprep.subr.bf16.mxu0 %v14249_v21 }
 0xc16   :  { %v13881_v48 = vsub.f32 %v6266_v19, %v6306_v11 }
 0xc17   :  { %9942 = vmatmul.mubr.f32.vlgmr.msra.gmra.mrb[14].mxu0 %v13734_v20 }
 0xc18   :  { %11511 = vmatpush3.bf16.msra.mxu0 %v14317_v54  ;;  %9976 = vmatprep.mubr.msk.f32.mxu0 %vm11946_vm0, %v14260_v1  ;;  %v6262_v54 = vld [vmem:[#allocation8 + $0x20] sm:$0xff]  ;;  %v6431_v51 = vand.u32 4294901760, %v13881_v48 }
 0xc19   :  { %11512 = vmatprep.subr.bf16.mxu0 %v14249_v21 }
 0xc1a   :  { %v6432_v5 = vsub.f32 %v13881_v48, %v6431_v51 }
 0xc1c   :  { %11514 = vmatpush3.bf16.msra.mxu0 %v14318_v62  ;;  %v6263_v62 = vld [vmem:[#allocation8 + $0x28] sm:$0xff]  ;;  %v6433_v14 = vand.u32 4294901760, %v6432_v5 }
 0xc1d   :  { %11515 = vmatprep.subr.bf16.mxu0 %v14249_v21 }
 0xc20   :  { %11517 = vmatpush3.bf16.msra.mxu0 %v14319_v63  ;;  %v6294_v63 = vand.u32 4294901760, %v6262_v54 }
 0xc21   :  { %11518 = vmatprep.subr.bf16.mxu0 %v14249_v21 }
 0xc22   :  { %v13872_v30 = vsub.f32 %v6262_v54, %v6294_v63 }
 0xc24   :  { %11520 = vmatpush3.bf16.msra.mxu0 %v14320_v18  ;;  %v6297_v18 = vand.u32 4294901760, %v6263_v62  ;;  %v6403_v54 = vand.u32 4294901760, %v13872_v30 }
 0xc25   :  { %11521 = vmatprep.subr.bf16.mxu0 %v14249_v21 }
 0xc26   :  { %v13854_v44 = vpack.c.bf16 %v6297_v18, %v6294_v63  ;;  %v13874_v53 = vsub.f32 %v6263_v62, %v6297_v18  ;;  %v11561_v63 = vpack.c.bf16 %v6398_v33, %v6391_v15  ;;  %v6404_v18 = vsub.f32 %v13872_v30, %v6403_v54 }
 0xc27   :  { %v6460_v33 = vsub.f32 %v13890_v0, %v14224_v45 }
 0xc28   :  { %11523 = vmatpush3.bf16.msra.mxu0 %v14321_v22  ;;  %v6264_v22 = vld [vmem:[#allocation8 + $0x30] sm:$0xff]  ;;  %11541 = vmatpush3.bf16.msra.mxu1 %v13854_v44  ;;  %v6410_v62 = vand.u32 4294901760, %v13874_v53  ;;  %v6405_v6 = vand.u32 4294901760, %v6404_v18  ;;  %v6467_v18 = vsub.f32 %v13892_v28, %v14223_v42 }
 0xc29   :  { %11524 = vmatprep.subr.bf16.mxu0 %v14249_v21  ;;  %11542 = vmatprep.subr.bf16.mxu1 %v14249_v21 }
 0xc2c   :  { %11526 = vmatpush3.bf16.msra.mxu0 %v14322_v23  ;;  %v6300_v23 = vand.u32 4294901760, %v6264_v22 }
 0xc2d   :  { %11527 = vmatprep.subr.bf16.mxu0 %v14249_v21 }
 0xc2e   :  { %v13876_v39 = vsub.f32 %v6264_v22, %v6300_v23  ;;  %v6411_v22 = vsub.f32 %v13874_v53, %v6410_v62 }
 0xc30   :  { %11529 = vmatpush3.bf16.msra.mxu0 %v14323_v4  ;;  %v13858_v4 = vpack.c.bf16 %v6303_v38, %v6300_v23  ;;  %v6417_v23 = vand.u32 4294901760, %v13876_v39  ;;  %v6424_v38 = vand.u32 4294901760, %v13878_v41  ;;  %v6412_v19 = vand.u32 4294901760, %v6411_v22 }
 0xc31   :  { %11530 = vmatprep.subr.bf16.mxu0 %v14249_v21  ;;  %v6461_v22 = vand.u32 4294901760, %v6460_v33  ;;  %v11597_v33 = vpack.c.bf16 %v13887_v50, %v13885_v32 }
 0xc32   :  { %11544 = vmatpush3.bf16.msra.mxu1 %v13858_v4 }
 0xc33   :  { %11545 = vmatprep.subr.bf16.mxu1 %v14249_v21 }
 0xc34   :  { %11532 = vmatpush3.bf16.msra.mxu0 %v14324_v35  ;;  %v6267_v35 = vld [vmem:[#allocation8 + $0x48] sm:$0xff] }
 0xc35   :  { %v6309_v25 = vand.u32 4294901760, %v6267_v35 }
 0xc37   :  { %9977 = vmatmul.mubr.f32.vlgmr.msra.gmra.mrb[14].mxu0 %v13734_v20  ;;  %v13862_v43 = vpack.c.bf16 %v6309_v25, %v6306_v11  ;;  %v13883_v58 = vsub.f32 %v6267_v35, %v6309_v25  ;;  %v13898_v20 = vsub.f32 %v6272_v16, %v6324_v24  ;;  %v6418_v35 = vsub.f32 %v13876_v39, %v6417_v23 }
 0xc38   :  { %v6425_v11 = vsub.f32 %v13878_v41, %v6424_v38  ;;  %v11564_v25 = vpack.c.bf16 %v6412_v19, %v6405_v6  ;;  %v6452_v24 = vand.u32 4294901760, %v13887_v50  ;;  %v6468_v6 = vand.u32 4294901760, %v6467_v18 }
 0xc39   :  { %11547 = vmatpush3.bf16.msra.mxu1 %v13862_v43  ;;  %v6419_v36 = vand.u32 4294901760, %v6418_v35  ;;  %v6438_v34 = vand.u32 4294901760, %v13883_v58  ;;  %v14222_v19 = vand.u32 4294901760, %v13898_v20  ;;  %v14221_v35 = vand.u32 4294901760, %v13900_v59 }
 0xc3a   :  { %11548 = vmatprep.subr.bf16.mxu1 %v14249_v21  ;;  %v6426_v52 = vand.u32 4294901760, %v6425_v11  ;;  %v6453_v46 = vsub.f32 %v13887_v50, %v6452_v24  ;;  %v11576_v11 = vpack.c.bf16 %v6468_v6, %v6461_v22  ;;  %v11600_v18 = vpack.c.bf16 %v13892_v28, %v13890_v0 }
 0xc3b   :  { %v6439_v7 = vsub.f32 %v13883_v58, %v6438_v34  ;;  %v11603_v22 = vpack.c.bf16 %v13900_v59, %v13898_v20  ;;  %v11642_v10 = vpack.c.bf16 %v6438_v34, %v6431_v51  ;;  %v11645_v56 = vpack.c.bf16 %v6452_v24, %v6445_v8 }
 0xc3c   :  { %v11567_v26 = vpack.c.bf16 %v6426_v52, %v6419_v36  ;;  %v6454_v29 = vand.u32 4294901760, %v6453_v46  ;;  %v6474_v36 = vsub.f32 %v13898_v20, %v14222_v19  ;;  %v6481_v52 = vsub.f32 %v13900_v59, %v14221_v35 }
 0xc3d   :  { %11550 = vmatpush3.bf16.msra.mxu1 %v13866_v60  ;;  %v6440_v16 = vand.u32 4294901760, %v6439_v7  ;;  %v11588_v46 = vpack.c.bf16 %v13874_v53, %v13872_v30  ;;  %v14388_v30 = vand.u32 4294901760, %v13890_v0  ;;  %v14389_v53 = vand.u32 4294901760, %v13892_v28 }
 0xc3e   :  { %11551 = vmatprep.subr.bf16.mxu1 %v14249_v21  ;;  %v11573_v15 = vpack.c.bf16 %v6454_v29, %v6447_v12  ;;  %v6475_v5 = vand.u32 4294901760, %v6474_v36  ;;  %v6482_v7 = vand.u32 4294901760, %v6481_v52  ;;  %v11591_v12 = vpack.c.bf16 %v13878_v41, %v13876_v39 }
 0xc3f   :  { %v11570_v27 = vpack.c.bf16 %v6440_v16, %v6433_v14  ;;  %v11582_v16 = vpack.c.bf16 %v13770_v2, %v13768_v37  ;;  %v11594_v29 = vpack.c.bf16 %v13883_v58, %v13881_v48  ;;  %v11636_v37 = vpack.c.bf16 %v6410_v62, %v6403_v54 }
 0xc40   :  { %v11579_v14 = vpack.c.bf16 %v6482_v7, %v6475_v5  ;;  %v11639_v2 = vpack.c.bf16 %v6424_v38, %v6417_v23  ;;  %v11648_v39 = vpack.c.bf16 %v14389_v53, %v14388_v30  ;;  %v14390_v41 = vand.u32 4294901760, %v13898_v20 }
 0xc41   :  { %11553 = vmatpush3.bf16.msra.mxu1 %v13870_v17  ;;  %v14391_v48 = vand.u32 4294901760, %v13900_v59 }
 0xc42   :  { %11554 = vmatprep.subr.bf16.mxu1 %v14249_v21 }
 0xc43   :  { %v11651_v58 = vpack.c.bf16 %v14391_v48, %v14390_v41 }
 0xc45   :  { %11556 = vmatpush3.bf16.msra.mxu1 %v13896_v31 }
 0xc46   :  { %11557 = vmatprep.subr.bf16.mxu1 %v14249_v21 }
 0xd0a   :  { %v6252_v6 = vpop.f32.mrb[14].mxu0 }
 0xd0b   :  { %v6256_v36 = vadd.f32 %v13056_v61, %v6252_v6  ;;  %v9978_v52 = vpop.f32.mrb[15].mxu0  ;;  %v11630_v61 = vpack.c.bf16 %v6382_v13, %v6375_v57 }
 0xd0d   :  { %11843 = vtanh.f32 %v6256_v36 }
 0xd17   :  { %v11844_v5 = vpop.eup %11843 }
 0xd18   :  { %v13985_v7 = vand.u32 4294901760, %v11844_v5 }
 0xd1a   :  { %v6363_v35 = vsub.f32 %v11844_v5, %v13985_v7 }
 0xd1c   :  { %v6364_v19 = vand.u32 4294901760, %v6363_v35 }
 0xd1e   :  { %v6365_v42 = vsub.f32 %v6363_v35, %v6364_v19 }
 0xd20   :  { %v6366_v45 = vand.u32 4294901760, %v6365_v42 }
 0xd22   :  { %10012 = vmatmul.mubr.f32.vlgmr.msra.gmra.mrb[8].mxu1 %v6366_v45 }
 0xd23   :  { %11559 = vmatpush3.bf16.msra.mxu1 %v13918_v3  ;;  %10046 = vmatprep.mubr.msk.f32.mxu1 %vm11946_vm0, %v14260_v1  ;;  %v11633_v3 = vpack.c.bf16 %v6396_v49, %v6389_v55 }
 0xd24   :  { %11560 = vmatprep.subr.bf16.mxu1 %v14249_v21 }
 0xd27   :  { %11562 = vmatpush3.bf16.msra.mxu1 %v11561_v63 }
 0xd28   :  { %11563 = vmatprep.subr.bf16.mxu1 %v14249_v21 }
 0xd2b   :  { %11565 = vmatpush3.bf16.msra.mxu1 %v11564_v25 }
 0xd2c   :  { %11566 = vmatprep.subr.bf16.mxu1 %v14249_v21 }
 0xd2f   :  { %11568 = vmatpush3.bf16.msra.mxu1 %v11567_v26 }
 0xd30   :  { %11569 = vmatprep.subr.bf16.mxu1 %v14249_v21 }
 0xd33   :  { %11571 = vmatpush3.bf16.msra.mxu1 %v11570_v27 }
 0xd34   :  { %11572 = vmatprep.subr.bf16.mxu1 %v14249_v21 }
 0xd37   :  { %11574 = vmatpush3.bf16.msra.mxu1 %v11573_v15 }
 0xd38   :  { %11575 = vmatprep.subr.bf16.mxu1 %v14249_v21 }
 0xd3b   :  { %11577 = vmatpush3.bf16.msra.mxu1 %v11576_v11 }
 0xd3c   :  { %11578 = vmatprep.subr.bf16.mxu1 %v14249_v21 }
 0xd3f   :  { %11580 = vmatpush3.bf16.msra.mxu1 %v11579_v14 }
 0xd40   :  { %11581 = vmatprep.subr.bf16.mxu1 %v14249_v21 }
 0xd42   :  { %10047 = vmatmul.mubr.f32.vlgmr.msra.gmra.mrb[8].mxu1 %v13985_v7 }
 0xd43   :  { %11583 = vmatpush3.bf16.msra.mxu1 %v11582_v16  ;;  %10081 = vmatprep.mubr.msk.f32.mxu1 %vm11946_vm0, %v14260_v1 }
 0xd44   :  { %11584 = vmatprep.subr.bf16.mxu1 %v14249_v21 }
 0xd47   :  { %11586 = vmatpush3.bf16.msra.mxu1 %v11585_v40 }
 0xd48   :  { %11587 = vmatprep.subr.bf16.mxu1 %v14249_v21 }
 0xd4b   :  { %11589 = vmatpush3.bf16.msra.mxu1 %v11588_v46 }
 0xd4c   :  { %11590 = vmatprep.subr.bf16.mxu1 %v14249_v21 }
 0xd4f   :  { %11592 = vmatpush3.bf16.msra.mxu1 %v11591_v12 }
 0xd50   :  { %11593 = vmatprep.subr.bf16.mxu1 %v14249_v21 }
 0xd53   :  { %11595 = vmatpush3.bf16.msra.mxu1 %v11594_v29 }
 0xd54   :  { %11596 = vmatprep.subr.bf16.mxu1 %v14249_v21 }
 0xd57   :  { %11598 = vmatpush3.bf16.msra.mxu1 %v11597_v33 }
 0xd58   :  { %11599 = vmatprep.subr.bf16.mxu1 %v14249_v21 }
 0xd5b   :  { %11601 = vmatpush3.bf16.msra.mxu1 %v11600_v18 }
 0xd5c   :  { %11602 = vmatprep.subr.bf16.mxu1 %v14249_v21 }
 0xd5f   :  { %11604 = vmatpush3.bf16.msra.mxu1 %v11603_v22 }
 0xd60   :  { %11605 = vmatprep.subr.bf16.mxu1 %v14249_v21 }
 0xd62   :  { %10082 = vmatmul.mubr.f32.vlgmr.msra.gmra.mrb[8].mxu1 %v6363_v35 }
 0xd63   :  { %11607 = vmatpush3.bf16.msra.mxu1 %v13766_v47  ;;  %10116 = vmatprep.mubr.msk.f32.mxu1 %vm11946_vm0, %v14260_v1 }
 0xd64   :  { %11608 = vmatprep.subr.bf16.mxu1 %v14249_v21 }
 0xd67   :  { %11610 = vmatpush3.bf16.msra.mxu1 %v13778_v9 }
 0xd68   :  { %11611 = vmatprep.subr.bf16.mxu1 %v14249_v21 }
 0xd6b   :  { %11613 = vmatpush3.bf16.msra.mxu1 %v13854_v44 }
 0xd6c   :  { %11614 = vmatprep.subr.bf16.mxu1 %v14249_v21 }
 0xd6f   :  { %11616 = vmatpush3.bf16.msra.mxu1 %v13858_v4 }
 0xd70   :  { %11617 = vmatprep.subr.bf16.mxu1 %v14249_v21 }
 0xd73   :  { %11619 = vmatpush3.bf16.msra.mxu1 %v13862_v43 }
 0xd74   :  { %11620 = vmatprep.subr.bf16.mxu1 %v14249_v21 }
 0xd77   :  { %11622 = vmatpush3.bf16.msra.mxu1 %v13866_v60 }
 0xd78   :  { %11623 = vmatprep.subr.bf16.mxu1 %v14249_v21 }
 0xd7b   :  { %11625 = vmatpush3.bf16.msra.mxu1 %v13870_v17 }
 0xd7c   :  { %11626 = vmatprep.subr.bf16.mxu1 %v14249_v21 }
 0xd7f   :  { %11628 = vmatpush3.bf16.msra.mxu1 %v13896_v31 }
 0xd80   :  { %11629 = vmatprep.subr.bf16.mxu1 %v14249_v21 }
 0xd82   :  { %10117 = vmatmul.mubr.f32.vlgmr.msra.gmra.mrb[8].mxu1 %v6364_v19 }
 0xd83   :  { %11631 = vmatpush3.bf16.msra.mxu1 %v11630_v61  ;;  %10151 = vmatprep.mubr.msk.f32.mxu1 %vm11946_vm0, %v14260_v1 }
 0xd84   :  { %11632 = vmatprep.subr.bf16.mxu1 %v14249_v21 }
 0xd87   :  { %11634 = vmatpush3.bf16.msra.mxu1 %v11633_v3 }
 0xd88   :  { %11635 = vmatprep.subr.bf16.mxu1 %v14249_v21 }
 0xd8b   :  { %11637 = vmatpush3.bf16.msra.mxu1 %v11636_v37 }
 0xd8c   :  { %11638 = vmatprep.subr.bf16.mxu1 %v14249_v21 }
 0xd8f   :  { %11640 = vmatpush3.bf16.msra.mxu1 %v11639_v2 }
 0xd90   :  { %11641 = vmatprep.subr.bf16.mxu1 %v14249_v21 }
 0xd93   :  { %11643 = vmatpush3.bf16.msra.mxu1 %v11642_v10 }
 0xd94   :  { %11644 = vmatprep.subr.bf16.mxu1 %v14249_v21 }
 0xd97   :  { %11646 = vmatpush3.bf16.msra.mxu1 %v11645_v56 }
 0xd98   :  { %11647 = vmatprep.subr.bf16.mxu1 %v14249_v21 }
 0xd9b   :  { %11649 = vmatpush3.bf16.msra.mxu1 %v11648_v39 }
 0xd9c   :  { %11650 = vmatprep.subr.bf16.mxu1 %v14249_v21 }
 0xd9f   :  { %11652 = vmatpush3.bf16.msra.mxu1 %v11651_v58 }
 0xda0   :  { %11653 = vmatprep.subr.bf16.mxu1 %v14249_v21 }
 0xda2   :  { %10152 = vmatmul.mubr.f32.vlgmr.msra.gmra.mrb[8].mxu1 %v13985_v7 }
 0xda3   :  { %11655 = vmatpush3.bf16.msra.mxu1 %v13766_v47  ;;  %10186 = vmatprep.mubr.msk.f32.mxu1 %vm11946_vm0, %v14260_v1  ;;  %v6972_v1 = vld [vmem:[%s14109_s5] ss:$0 sm:$0xff] }
 0xda4   :  { %11656 = vmatprep.subr.bf16.mxu1 %v14249_v21 }
 0xda7   :  { %11658 = vmatpush3.bf16.msra.mxu1 %v13778_v9 }
 0xda8   :  { %11659 = vmatprep.subr.bf16.mxu1 %v14249_v21 }
 0xdab   :  { %11661 = vmatpush3.bf16.msra.mxu1 %v13854_v44 }
 0xdac   :  { %11662 = vmatprep.subr.bf16.mxu1 %v14249_v21 }
 0xdaf   :  { %11664 = vmatpush3.bf16.msra.mxu1 %v13858_v4 }
 0xdb0   :  { %11665 = vmatprep.subr.bf16.mxu1 %v14249_v21 }
 0xdb3   :  { %11667 = vmatpush3.bf16.msra.mxu1 %v13862_v43 }
 0xdb4   :  { %11668 = vmatprep.subr.bf16.mxu1 %v14249_v21 }
 0xdb7   :  { %11670 = vmatpush3.bf16.msra.mxu1 %v13866_v60 }
 0xdb8   :  { %11671 = vmatprep.subr.bf16.mxu1 %v14249_v21 }
 0xdbb   :  { %11673 = vmatpush3.bf16.msra.mxu1 %v13870_v17 }
 0xdbc   :  { %11674 = vmatprep.subr.bf16.mxu1 %v14249_v21 }
 0xdbf   :  { %11676 = vmatpush3.bf16.msra.mxu1 %v13896_v31 }
 0xdc2   :  { %10187 = vmatmul.mubr.f32.vlgmr.msra.gmra.mrb[8].mxu1 %v13985_v7 }
 0xe95   :  { %v6918_v47 = vpop.f32.mrb[8].mxu1 }
 0xe96   :  { %v11685_v9 = vadd.f32 %v6972_v1, %v6918_v47  ;;  %v10188_v44 = vpop.f32.mrb[9].mxu1 }
 0xe98   :  { %6922 = vst [vmem:[#allocation9] sm:$0xff] %v11685_v9 }
 0xe99   :  { %11922 = shalt.err (!%p11919_p0)
}
 0xe9a   :  { %s11923_s7 = scalar_lea.hbm %s14110_s6, 128 }
 0xe9b   :  { %p11924_p1 = scmp.ne.s32.totalorder %s14110_s6, %s11923_s7  ;;  %p11927_p2 = scmp.lt.u32.totalorder %s11923_s7, %s14110_s6 }
 0xe9d   :  { %p11929_p3 = pnand %p11927_p2, %p11924_p1 }
 0xe9f   :  { %11932 = shalt.err (!%p11929_p3)
}
 0xea0   :  { %6932 = dma.vmem_to_hbm [thread:$0]  %s6930_s27, 128, %s14110_s6, [#allocation5]  }
 0xea1   :  { %11937 = dma.done.wait [#allocation5], 128  }
 0xea2   :  { %11938 = vsyncadd [#allocation5], 4294967168 }
 0xea3   :  { %6936 = vsyncpa [#allocation4], 1 }
 0xea4   :  { %6937 = vsyncpa [#allocation7], 1 }
 0xea5   :  { %6938 = vsyncpa [#allocation5], 1 }

</bundles_post_ra>
